<compile_context>
chip_gen: v7x
topology: tpu7x:2x2x1
jax: 0.10.0
libtpu: 0.0.40
codegen_flags: <defaults>
</compile_context>

<pallas_src>
import numpy as np
import jax
import jax.numpy as jnp
from jax.experimental import pallas as pl
from jax.experimental.pallas import tpu as pltpu

NEG_SLOPE = 0.01  # torch.nn.LeakyReLU default
LOG_2PI = float(np.log(2.0 * np.pi))


def _leaky(x):
    # LeakyReLU as a single VALU max (for x<0, 0.01*x > x).
    return jnp.maximum(x, NEG_SLOPE * x)


def _mxu_dot(a_f32, w_bf16):
    # Native bf16 x bf16 -> f32 MXU path; accumulate in f32.
    return jnp.dot(a_f32.astype(jnp.bfloat16), w_bf16,
                   preferred_element_type=jnp.float32)


# --------------------------------------------------------------------------
# Fused kernel: diffusion chain + P_DNNS + decoder + loss, all VMEM-resident
# --------------------------------------------------------------------------
def ddgm_fused_kernel(
    # SMEM scalar tables, each (n_steps,)
    sqrt_1mb_ref, sqrt_b_ref, betas_ref, log_betas_ref,
    # VMEM activations
    x_ref, eps_ref,
    # stacked per-step P_DNN params (leading dim S = n_steps - 1); w4 is fused (M, 2D)
    w1_ref, b1_ref, w2_ref, b2_ref, w3_ref, b3_ref, w4_ref, b4_ref,
    # decoder params
    dw1_ref, db1_ref, dw2_ref, db2_ref, dw3_ref, db3_ref, dw4_ref, db4_ref,
    # outputs
    zs_ref, mus_ref, mux_ref, loss_ref,
):
    n_steps = eps_ref.shape[0]
    S = n_steps - 1
    B, D = x_ref.shape

    # ---- forward diffusion chain (unrolled); packed (n_steps*B, D) store ----
    cur = x_ref[...]
    for i in range(n_steps):
        cur = sqrt_1mb_ref[i] * cur + sqrt_b_ref[i] * eps_ref[i]
        zs_ref[i * B:(i + 1) * B, :] = cur
    del cur  # z's are re-read from zs_ref below (relieves vreg pressure)

    # ---- KL( N(z_last, sqrt(b_last)) || N(0, 1) ) ----
    z_last = zs_ref[S * B:(S + 1) * B, :]
    kl = jnp.mean(
        -0.5 * log_betas_ref[n_steps - 1]
        + (betas_ref[n_steps - 1] + z_last * z_last) * 0.5 - 0.5,
        axis=-1, keepdims=True)                                      # (B, 1)

    # ---- P_DNNS[i](zs[i+1]) -> (mu_i, log_var_i) and per-step KL ----
    for i in range(S):
        z_in = zs_ref[(i + 1) * B:(i + 2) * B, :]
        h = _leaky(_mxu_dot(z_in, w1_ref[i]) + b1_ref[i])
        h = _leaky(_mxu_dot(h, w2_ref[i]) + b2_ref[i])
        h = _leaky(_mxu_dot(h, w3_ref[i]) + b3_ref[i])
        out = _mxu_dot(h, w4_ref[i]) + b4_ref[i]                     # (B, 2D)
        mu_i = out[:, :D]          # torch.chunk(.., 2, dim=1) first half
        lv_i = out[:, D:]          # second half; 128-aligned lane slice
        mus_ref[i * B:(i + 1) * B, :] = mu_i
        diff = zs_ref[i * B:(i + 1) * B, :] - mu_i
        # KL(N(zs[i], sqrt(b_i)) || N(mu_i, sqrt(exp(lv_i)))); divide folded into exp(-lv)
        kl = kl + jnp.mean(
            0.5 * lv_i - 0.5 * log_betas_ref[i]
            + (betas_ref[i] + diff * diff) * (0.5 * jnp.exp(-lv_i)) - 0.5,
            axis=-1, keepdims=True)

    # ---- decoder_net(zs[0]) -> mu_x ----
    z0 = zs_ref[0:B, :]
    h = _leaky(_mxu_dot(z0, dw1_ref[...]) + db1_ref[...])
    h = _leaky(_mxu_dot(h, dw2_ref[...]) + db2_ref[...])
    h = _leaky(_mxu_dot(h, dw3_ref[...]) + db3_ref[...])
    mu_x = jnp.tanh(_mxu_dot(h, dw4_ref[...]) + db4_ref[...])
    mux_ref[...] = mu_x

    # ---- RE and final scalar loss ----
    d = x_ref[...] - mu_x
    re = jnp.mean(-0.5 * LOG_2PI - 0.5 * d * d, axis=-1, keepdims=True)  # (B, 1)
    loss_ref[0, 0] = -jnp.sum(re - kl) / B


# --------------------------------------------------------------------------
# Wrapper
# --------------------------------------------------------------------------
def ddgmnet_forward(x_img, eps, betas, p_params, d_params):
    B = x_img.shape[0]
    n_steps = betas.shape[0]
    S = n_steps - 1
    x = x_img.reshape(B, -1).astype(jnp.float32)          # x.view(B, -1), NCHW order
    D = x.shape[1]

    betas = betas.astype(jnp.float32)
    sqrt_1mb = jnp.sqrt(1.0 - betas)
    sqrt_b = jnp.sqrt(betas)
    log_betas = jnp.log(betas)

    smem = pl.BlockSpec(memory_space=pltpu.MemorySpace.SMEM)
    vmem = pl.BlockSpec(memory_space=pltpu.MemorySpace.VMEM)

    M = p_params[0].shape[-1]            # mid_dim
    M2 = d_params[0].shape[-1]           # 2 * mid_dim
    flops = 2 * B * (S * (D * M + 2 * M * M + M * 2 * D)
                     + (D * M2 + 2 * M2 * M2 + M2 * D))
    transcendentals = (S + 1) * B * D    # exp per KL step + tanh
    bytes_accessed = int(
        sum(int(np.prod(p.shape)) * p.dtype.itemsize
            for p in (x, eps, *p_params, *d_params))
        + (n_steps * B * D + S * B * D + B * D + 1) * 4)

    zs_flat, mus_flat, mu_x, loss = pl.pallas_call(
        ddgm_fused_kernel,
        out_shape=(
            jax.ShapeDtypeStruct((n_steps * B, D), jnp.float32),  # z_0 .. z_{n-1} packed
            jax.ShapeDtypeStruct((S * B, D), jnp.float32),        # mu_0 .. mu_{S-1} packed
            jax.ShapeDtypeStruct((B, D), jnp.float32),            # mu_x
            jax.ShapeDtypeStruct((1, 1), jnp.float32),            # loss
        ),
        in_specs=[smem, smem, smem, smem] + [vmem] * (2 + 8 + 8),
        out_specs=(vmem, vmem, vmem, smem),
        cost_estimate=pl.CostEstimate(
            flops=flops,
            transcendentals=transcendentals,
            bytes_accessed=bytes_accessed),
    )(sqrt_1mb, sqrt_b, betas, log_betas, x, eps, *p_params, *d_params)

    loss = loss[0, 0]
    # Torch returns python lists [x, z_0, ...] and [mu_x, mu_0, ...]; we return the
    # same contents as (head, stacked tail) to avoid per-element device slices.
    zs = (x, zs_flat.reshape(n_steps, B, D))
    mus = (mu_x, mus_flat.reshape(S, B, D))
    return loss, zs, mus


# --------------------------------------------------------------------------
# Parameter init (torch.nn.Linear-style uniform(+-1/sqrt(fan_in)); weights bf16)
# --------------------------------------------------------------------------
def init_linear(key, fan_in, fan_out, w_dtype=jnp.float32):
    kw, kb = jax.random.split(key)
    bound = 1.0 / np.sqrt(fan_in)
    w = jax.random.uniform(kw, (fan_in, fan_out), jnp.float32, -bound, bound).astype(w_dtype)
    b = jax.random.uniform(kb, (1, fan_out), jnp.float32, -bound, bound)
    return w, b


def init_pdnn_params(key, D, M, S, w_dtype=jnp.bfloat16):
    # final Linear(M, 2D): columns [:D] = mu, [D:] = log_var (same as torch.chunk)
    shapes = [(D, M), (M, M), (M, M), (M, 2 * D)]
    cols = [[] for _ in range(2 * len(shapes))]
    for s in range(S):
        ks = jax.random.split(jax.random.fold_in(key, s), len(shapes))
        for idx, (fi, fo) in enumerate(shapes):
            w, b = init_linear(ks[idx], fi, fo, w_dtype)
            cols[2 * idx].append(w)
            cols[2 * idx + 1].append(b)
    return tuple(jnp.stack(c, axis=0) for c in cols)


def init_decoder_params(key, D, M, w_dtype=jnp.bfloat16):
    ks = jax.random.split(key, 4)
    params = []
    for idx, (fi, fo) in enumerate([(D, 2 * M), (2 * M, 2 * M), (2 * M, 2 * M), (2 * M, D)]):
        w, b = init_linear(ks[idx], fi, fo, w_dtype)
        params += [w, b]
    return tuple(params)


# --------------------------------------------------------------------------
# Pure-JAX reference (same bf16 weights + bf16 matmul inputs) for verification
# --------------------------------------------------------------------------
def reference_forward(x_img, eps, betas, p_params, d_params):
    B = x_img.shape[0]
    x = x_img.reshape(B, -1).astype(jnp.float32)
    n_steps = betas.shape[0]
    betas = betas.astype(jnp.float32)
    D = x.shape[1]

    zs = []
    cur = x
    for i in range(n_steps):
        cur = jnp.sqrt(1 - betas[i]) * cur + jnp.sqrt(betas[i]) * eps[i]
        zs.append(cur)

    w1, b1, w2, b2, w3, b3, w4, b4 = p_params
    mus, lvs = [], []
    for i in range(n_steps - 1):
        h = zs[i + 1]
        h = _leaky(_mxu_dot(h, w1[i]) + b1[i])
        h = _leaky(_mxu_dot(h, w2[i]) + b2[i])
        h = _leaky(_mxu_dot(h, w3[i]) + b3[i])
        out = _mxu_dot(h, w4[i]) + b4[i]
        mus.append(out[:, :D])
        lvs.append(out[:, D:])

    dw1, db1, dw2, db2, dw3, db3, dw4, db4 = d_params
    h = _leaky(_mxu_dot(zs[0], dw1) + db1)
    h = _leaky(_mxu_dot(h, dw2) + db2)
    h = _leaky(_mxu_dot(h, dw3) + db3)
    mu_x = jnp.tanh(_mxu_dot(h, dw4) + db4)

    re = jnp.mean(-0.5 * jnp.log(2 * jnp.pi) - 0.5 * (x - mu_x) ** 2, axis=-1)
    kl = jnp.mean(-0.5 * jnp.log(betas[-1]) + (betas[-1] + zs[-1] ** 2) / 2 - 0.5, axis=-1)
    for i in range(n_steps - 1):
        kl = kl + jnp.mean(0.5 * lvs[i] - 0.5 * jnp.log(betas[i])
                           + (betas[i] + (zs[i] - mus[i]) ** 2) / (2 * jnp.exp(lvs[i])) - 0.5,
                           axis=-1)
    return -jnp.mean(re - kl)


if __name__ == "__main__":
    # config: channels=4, image_size=16, mid_dim=32, n_steps=4, linear schedule
    B, C, H, W = 2, 4, 16, 16
    M = 32
    n_steps = 4
    D = C * H * W

    key = jax.random.PRNGKey(0)
    kx, keps, kp, kd = jax.random.split(key, 4)
    x_img = jax.random.normal(kx, (B, C, H, W), jnp.float32)
    # pre-sampled Gaussian noise for reparameterization_gaussian_diffusion (one per step);
    # this replaces torch.randn_like (sampling is done host/XLA-side, not in-kernel).
    eps = jax.random.normal(keps, (n_steps, B, D), jnp.float32)
    betas = jnp.linspace(1e-5, 1e-2, n_steps).astype(jnp.float32)

    p_params = init_pdnn_params(kp, D, M, n_steps - 1)
    d_params = init_decoder_params(kd, D, M)

    fwd = jax.jit(ddgmnet_forward)
    loss, zs, mus = fwd(x_img, eps, betas, p_params, d_params)
    jax.block_until_ready(loss)

    loss_ref = reference_forward(x_img, eps, betas, p_params, d_params)
    np.testing.assert_allclose(np.asarray(loss), np.asarray(loss_ref), rtol=5e-2, atol=5e-2)
    assert np.isfinite(float(loss))

    x_flat, zs_stack = zs
    mu_x, mus_stack = mus
    assert x_flat.shape == (B, D) and zs_stack.shape == (n_steps, B, D)
    assert mu_x.shape == (B, D) and mus_stack.shape == (n_steps - 1, B, D)
    print("KERNEL_OK")
</pallas_src>

<mosaic_0001>
module attributes {stable_mosaic.version = 11 : i64} {
  func.func @ddgm_fused_kernel(%arg0: memref<4xf32, #tpu.memory_space<smem>>, %arg1: memref<4xf32, #tpu.memory_space<smem>>, %arg2: memref<4xf32, #tpu.memory_space<smem>>, %arg3: memref<4xf32, #tpu.memory_space<smem>>, %arg4: memref<2x1024xf32, #tpu.memory_space<vmem>>, %arg5: memref<4x2x1024xf32, #tpu.memory_space<vmem>>, %arg6: memref<3x1024x32xbf16, #tpu.memory_space<vmem>>, %arg7: memref<3x1x32xf32, #tpu.memory_space<vmem>>, %arg8: memref<3x32x32xbf16, #tpu.memory_space<vmem>>, %arg9: memref<3x1x32xf32, #tpu.memory_space<vmem>>, %arg10: memref<3x32x32xbf16, #tpu.memory_space<vmem>>, %arg11: memref<3x1x32xf32, #tpu.memory_space<vmem>>, %arg12: memref<3x32x2048xbf16, #tpu.memory_space<vmem>>, %arg13: memref<3x1x2048xf32, #tpu.memory_space<vmem>>, %arg14: memref<1024x64xbf16, #tpu.memory_space<vmem>>, %arg15: memref<1x64xf32, #tpu.memory_space<vmem>>, %arg16: memref<64x64xbf16, #tpu.memory_space<vmem>>, %arg17: memref<1x64xf32, #tpu.memory_space<vmem>>, %arg18: memref<64x64xbf16, #tpu.memory_space<vmem>>, %arg19: memref<1x64xf32, #tpu.memory_space<vmem>>, %arg20: memref<64x1024xbf16, #tpu.memory_space<vmem>>, %arg21: memref<1x1024xf32, #tpu.memory_space<vmem>>, %arg22: memref<8x1024xf32, #tpu.memory_space<vmem>>, %arg23: memref<6x1024xf32, #tpu.memory_space<vmem>>, %arg24: memref<2x1024xf32, #tpu.memory_space<vmem>>, %arg25: memref<1x1xf32, #tpu.memory_space<smem>>) attributes {dimension_semantics = [], scalar_prefetch = 0 : i64, scratch_operands = 0 : i64, tpu.core_type = #tpu.core_type<tc>} {
    %c0 = arith.constant 0 : index
    %c0_0 = arith.constant 0 : index
    %0 = vector.load %arg4[%c0, %c0_0] : memref<2x1024xf32, #tpu.memory_space<vmem>>, vector<2x1024xf32>
    %c0_1 = arith.constant 0 : index
    %1 = memref.load %arg0[%c0_1] : memref<4xf32, #tpu.memory_space<smem>>
    %2 = vector.broadcast %1 : f32 to vector<2x1024xf32>
    %3 = arith.mulf %2, %0 : vector<2x1024xf32>
    %c0_2 = arith.constant 0 : index
    %4 = memref.load %arg1[%c0_2] : memref<4xf32, #tpu.memory_space<smem>>
    %c0_3 = arith.constant 0 : index
    %c0_4 = arith.constant 0 : index
    %c0_5 = arith.constant 0 : index
    %5 = vector.load %arg5[%c0_3, %c0_4, %c0_5] : memref<4x2x1024xf32, #tpu.memory_space<vmem>>, vector<1x2x1024xf32>
    %6 = vector.shape_cast %5 : vector<1x2x1024xf32> to vector<2x1024xf32>
    %7 = vector.broadcast %4 : f32 to vector<2x1024xf32>
    %8 = arith.mulf %7, %6 : vector<2x1024xf32>
    %9 = arith.addf %3, %8 : vector<2x1024xf32>
    %c0_6 = arith.constant 0 : index
    %c0_7 = arith.constant 0 : index
    %10 = vector.load %arg22[%c0_6, %c0_7] : memref<8x1024xf32, #tpu.memory_space<vmem>>, vector<2x1024xf32>
    tpu.vector_store %arg22[%c0_6, %c0_7], %9 {strides = array<i32>} : memref<8x1024xf32, #tpu.memory_space<vmem>>, vector<2x1024xf32>,
    %c1 = arith.constant 1 : index
    %11 = memref.load %arg0[%c1] : memref<4xf32, #tpu.memory_space<smem>>
    %12 = vector.broadcast %11 : f32 to vector<2x1024xf32>
    %13 = arith.mulf %12, %9 : vector<2x1024xf32>
    %c1_8 = arith.constant 1 : index
    %14 = memref.load %arg1[%c1_8] : memref<4xf32, #tpu.memory_space<smem>>
    %c1_9 = arith.constant 1 : index
    %c0_10 = arith.constant 0 : index
    %c0_11 = arith.constant 0 : index
    %15 = vector.load %arg5[%c1_9, %c0_10, %c0_11] : memref<4x2x1024xf32, #tpu.memory_space<vmem>>, vector<1x2x1024xf32>
    %16 = vector.shape_cast %15 : vector<1x2x1024xf32> to vector<2x1024xf32>
    %17 = vector.broadcast %14 : f32 to vector<2x1024xf32>
    %18 = arith.mulf %17, %16 : vector<2x1024xf32>
    %19 = arith.addf %13, %18 : vector<2x1024xf32>
    %c2 = arith.constant 2 : index
    %c0_12 = arith.constant 0 : index
    %20 = vector.load %arg22[%c2, %c0_12] : memref<8x1024xf32, #tpu.memory_space<vmem>>, vector<2x1024xf32>
    tpu.vector_store %arg22[%c2, %c0_12], %19 {strides = array<i32>} : memref<8x1024xf32, #tpu.memory_space<vmem>>, vector<2x1024xf32>,
    %c2_13 = arith.constant 2 : index
    %21 = memref.load %arg0[%c2_13] : memref<4xf32, #tpu.memory_space<smem>>
    %22 = vector.broadcast %21 : f32 to vector<2x1024xf32>
    %23 = arith.mulf %22, %19 : vector<2x1024xf32>
    %c2_14 = arith.constant 2 : index
    %24 = memref.load %arg1[%c2_14] : memref<4xf32, #tpu.memory_space<smem>>
    %c2_15 = arith.constant 2 : index
    %c0_16 = arith.constant 0 : index
    %c0_17 = arith.constant 0 : index
    %25 = vector.load %arg5[%c2_15, %c0_16, %c0_17] : memref<4x2x1024xf32, #tpu.memory_space<vmem>>, vector<1x2x1024xf32>
    %26 = vector.shape_cast %25 : vector<1x2x1024xf32> to vector<2x1024xf32>
    %27 = vector.broadcast %24 : f32 to vector<2x1024xf32>
    %28 = arith.mulf %27, %26 : vector<2x1024xf32>
    %29 = arith.addf %23, %28 : vector<2x1024xf32>
    %c4 = arith.constant 4 : index
    %c0_18 = arith.constant 0 : index
    %30 = vector.load %arg22[%c4, %c0_18] : memref<8x1024xf32, #tpu.memory_space<vmem>>, vector<2x1024xf32>
    tpu.vector_store %arg22[%c4, %c0_18], %29 {strides = array<i32>} : memref<8x1024xf32, #tpu.memory_space<vmem>>, vector<2x1024xf32>,
    %c3 = arith.constant 3 : index
    %31 = memref.load %arg0[%c3] : memref<4xf32, #tpu.memory_space<smem>>
    %32 = vector.broadcast %31 : f32 to vector<2x1024xf32>
    %33 = arith.mulf %32, %29 : vector<2x1024xf32>
    %c3_19 = arith.constant 3 : index
    %34 = memref.load %arg1[%c3_19] : memref<4xf32, #tpu.memory_space<smem>>
    %c3_20 = arith.constant 3 : index
    %c0_21 = arith.constant 0 : index
    %c0_22 = arith.constant 0 : index
    %35 = vector.load %arg5[%c3_20, %c0_21, %c0_22] : memref<4x2x1024xf32, #tpu.memory_space<vmem>>, vector<1x2x1024xf32>
    %36 = vector.shape_cast %35 : vector<1x2x1024xf32> to vector<2x1024xf32>
    %37 = vector.broadcast %34 : f32 to vector<2x1024xf32>
    %38 = arith.mulf %37, %36 : vector<2x1024xf32>
    %39 = arith.addf %33, %38 : vector<2x1024xf32>
    %c6 = arith.constant 6 : index
    %c0_23 = arith.constant 0 : index
    %40 = vector.load %arg22[%c6, %c0_23] : memref<8x1024xf32, #tpu.memory_space<vmem>>, vector<2x1024xf32>
    tpu.vector_store %arg22[%c6, %c0_23], %39 {strides = array<i32>} : memref<8x1024xf32, #tpu.memory_space<vmem>>, vector<2x1024xf32>,
    %c6_24 = arith.constant 6 : index
    %c0_25 = arith.constant 0 : index
    %41 = vector.load %arg22[%c6_24, %c0_25] : memref<8x1024xf32, #tpu.memory_space<vmem>>, vector<2x1024xf32>
    %c3_26 = arith.constant 3 : index
    %42 = memref.load %arg3[%c3_26] : memref<4xf32, #tpu.memory_space<smem>>
    %cst = arith.constant -5.000000e-01 : f32
    %43 = arith.mulf %cst, %42 : f32
    %c3_27 = arith.constant 3 : index
    %44 = memref.load %arg2[%c3_27] : memref<4xf32, #tpu.memory_space<smem>>
    %45 = arith.mulf %41, %41 : vector<2x1024xf32>
    %46 = vector.broadcast %44 : f32 to vector<2x1024xf32>
    %47 = arith.addf %46, %45 : vector<2x1024xf32>
    %cst_28 = arith.constant 5.000000e-01 : f32
    %48 = vector.broadcast %cst_28 : f32 to vector<2x1024xf32>
    %49 = arith.mulf %47, %48 : vector<2x1024xf32>
    %50 = vector.broadcast %43 : f32 to vector<2x1024xf32>
    %51 = arith.addf %50, %49 : vector<2x1024xf32>
    %cst_29 = arith.constant 5.000000e-01 : f32
    %52 = vector.broadcast %cst_29 : f32 to vector<2x1024xf32>
    %53 = arith.subf %51, %52 : vector<2x1024xf32>
    %cst_30 = arith.constant dense<0.000000e+00> : vector<2xf32>
    %54 = vector.multi_reduction <add>, %53, %cst_30 [1] : vector<2x1024xf32> to vector<2xf32>
    %55 = vector.shape_cast %54 : vector<2xf32> to vector<2x1xf32>
    %cst_31 = arith.constant 1.024000e+03 : f32
    %56 = vector.broadcast %cst_31 : f32 to vector<2x1xf32>
    %57 = arith.divf %55, %56 : vector<2x1xf32>
    %c2_32 = arith.constant 2 : index
    %c0_33 = arith.constant 0 : index
    %58 = vector.load %arg22[%c2_32, %c0_33] : memref<8x1024xf32, #tpu.memory_space<vmem>>, vector<2x1024xf32>
    %c0_34 = arith.constant 0 : index
    %c0_35 = arith.constant 0 : index
    %c0_36 = arith.constant 0 : index
    %59 = vector.load %arg6[%c0_34, %c0_35, %c0_36] : memref<3x1024x32xbf16, #tpu.memory_space<vmem>>, vector<1x1024x32xbf16>
    %60 = vector.shape_cast %59 : vector<1x1024x32xbf16> to vector<1024x32xbf16>
    %61 = arith.truncf %58 : vector<2x1024xf32> to vector<2x1024xbf16>
    %cst_37 = arith.constant dense<0.000000e+00> : vector<2x32xf32>
    %62 = tpu.matmul %61, %60, %cst_37 {dimension_numbers = #tpu.dot_dimension_numbers<[1], [0], [0], [1], [0, 0, 1, 1], [], []>} : vector<2x1024xbf16>, vector<1024x32xbf16>, vector<2x32xf32> -> vector<2x32xf32>
    %c0_38 = arith.constant 0 : index
    %c0_39 = arith.constant 0 : index
    %c0_40 = arith.constant 0 : index
    %63 = vector.load %arg7[%c0_38, %c0_39, %c0_40] : memref<3x1x32xf32, #tpu.memory_space<vmem>>, vector<1x1x32xf32>
    %64 = vector.shape_cast %63 : vector<1x1x32xf32> to vector<1x32xf32>
    %65 = vector.broadcast %64 : vector<1x32xf32> to vector<2x32xf32>
    %66 = arith.addf %62, %65 : vector<2x32xf32>
    %cst_41 = arith.constant 0.00999999977 : f32
    %67 = vector.broadcast %cst_41 : f32 to vector<2x32xf32>
    %68 = arith.mulf %67, %66 : vector<2x32xf32>
    %69 = arith.maximumf %66, %68 : vector<2x32xf32>
    %c0_42 = arith.constant 0 : index
    %c0_43 = arith.constant 0 : index
    %c0_44 = arith.constant 0 : index
    %70 = vector.load %arg8[%c0_42, %c0_43, %c0_44] : memref<3x32x32xbf16, #tpu.memory_space<vmem>>, vector<1x32x32xbf16>
    %71 = vector.shape_cast %70 : vector<1x32x32xbf16> to vector<32x32xbf16>
    %72 = arith.truncf %69 : vector<2x32xf32> to vector<2x32xbf16>
    %cst_45 = arith.constant dense<0.000000e+00> : vector<2x32xf32>
    %73 = tpu.matmul %72, %71, %cst_45 {dimension_numbers = #tpu.dot_dimension_numbers<[1], [0], [0], [1], [0, 0, 1, 1], [], []>} : vector<2x32xbf16>, vector<32x32xbf16>, vector<2x32xf32> -> vector<2x32xf32>
    %c0_46 = arith.constant 0 : index
    %c0_47 = arith.constant 0 : index
    %c0_48 = arith.constant 0 : index
    %74 = vector.load %arg9[%c0_46, %c0_47, %c0_48] : memref<3x1x32xf32, #tpu.memory_space<vmem>>, vector<1x1x32xf32>
    %75 = vector.shape_cast %74 : vector<1x1x32xf32> to vector<1x32xf32>
    %76 = vector.broadcast %75 : vector<1x32xf32> to vector<2x32xf32>
    %77 = arith.addf %73, %76 : vector<2x32xf32>
    %cst_49 = arith.constant 0.00999999977 : f32
    %78 = vector.broadcast %cst_49 : f32 to vector<2x32xf32>
    %79 = arith.mulf %78, %77 : vector<2x32xf32>
    %80 = arith.maximumf %77, %79 : vector<2x32xf32>
    %c0_50 = arith.constant 0 : index
    %c0_51 = arith.constant 0 : index
    %c0_52 = arith.constant 0 : index
    %81 = vector.load %arg10[%c0_50, %c0_51, %c0_52] : memref<3x32x32xbf16, #tpu.memory_space<vmem>>, vector<1x32x32xbf16>
    %82 = vector.shape_cast %81 : vector<1x32x32xbf16> to vector<32x32xbf16>
    %83 = arith.truncf %80 : vector<2x32xf32> to vector<2x32xbf16>
    %cst_53 = arith.constant dense<0.000000e+00> : vector<2x32xf32>
    %84 = tpu.matmul %83, %82, %cst_53 {dimension_numbers = #tpu.dot_dimension_numbers<[1], [0], [0], [1], [0, 0, 1, 1], [], []>} : vector<2x32xbf16>, vector<32x32xbf16>, vector<2x32xf32> -> vector<2x32xf32>
    %c0_54 = arith.constant 0 : index
    %c0_55 = arith.constant 0 : index
    %c0_56 = arith.constant 0 : index
    %85 = vector.load %arg11[%c0_54, %c0_55, %c0_56] : memref<3x1x32xf32, #tpu.memory_space<vmem>>, vector<1x1x32xf32>
    %86 = vector.shape_cast %85 : vector<1x1x32xf32> to vector<1x32xf32>
    %87 = vector.broadcast %86 : vector<1x32xf32> to vector<2x32xf32>
    %88 = arith.addf %84, %87 : vector<2x32xf32>
    %cst_57 = arith.constant 0.00999999977 : f32
    %89 = vector.broadcast %cst_57 : f32 to vector<2x32xf32>
    %90 = arith.mulf %89, %88 : vector<2x32xf32>
    %91 = arith.maximumf %88, %90 : vector<2x32xf32>
    %c0_58 = arith.constant 0 : index
    %c0_59 = arith.constant 0 : index
    %c0_60 = arith.constant 0 : index
    %92 = vector.load %arg12[%c0_58, %c0_59, %c0_60] : memref<3x32x2048xbf16, #tpu.memory_space<vmem>>, vector<1x32x2048xbf16>
    %93 = vector.shape_cast %92 : vector<1x32x2048xbf16> to vector<32x2048xbf16>
    %94 = arith.truncf %91 : vector<2x32xf32> to vector<2x32xbf16>
    %cst_61 = arith.constant dense<0.000000e+00> : vector<2x2048xf32>
    %95 = tpu.matmul %94, %93, %cst_61 {dimension_numbers = #tpu.dot_dimension_numbers<[1], [0], [0], [1], [0, 0, 1, 1], [], []>} : vector<2x32xbf16>, vector<32x2048xbf16>, vector<2x2048xf32> -> vector<2x2048xf32>
    %c0_62 = arith.constant 0 : index
    %c0_63 = arith.constant 0 : index
    %c0_64 = arith.constant 0 : index
    %96 = vector.load %arg13[%c0_62, %c0_63, %c0_64] : memref<3x1x2048xf32, #tpu.memory_space<vmem>>, vector<1x1x2048xf32>
    %97 = vector.shape_cast %96 : vector<1x1x2048xf32> to vector<1x2048xf32>
    %98 = vector.broadcast %97 : vector<1x2048xf32> to vector<2x2048xf32>
    %99 = arith.addf %95, %98 : vector<2x2048xf32>
    %100 = vector.extract_strided_slice %99 {offsets = [0, 0], sizes = [2, 1024], strides = [1, 1]} : vector<2x2048xf32> to vector<2x1024xf32>
    %101 = vector.extract_strided_slice %99 {offsets = [0, 1024], sizes = [2, 1024], strides = [1, 1]} : vector<2x2048xf32> to vector<2x1024xf32>
    %c0_65 = arith.constant 0 : index
    %c0_66 = arith.constant 0 : index
    %102 = vector.load %arg23[%c0_65, %c0_66] : memref<6x1024xf32, #tpu.memory_space<vmem>>, vector<2x1024xf32>
    tpu.vector_store %arg23[%c0_65, %c0_66], %100 {strides = array<i32>} : memref<6x1024xf32, #tpu.memory_space<vmem>>, vector<2x1024xf32>,
    %c0_67 = arith.constant 0 : index
    %c0_68 = arith.constant 0 : index
    %103 = vector.load %arg22[%c0_67, %c0_68] : memref<8x1024xf32, #tpu.memory_space<vmem>>, vector<2x1024xf32>
    %104 = arith.subf %103, %100 : vector<2x1024xf32>
    %cst_69 = arith.constant 5.000000e-01 : f32
    %105 = vector.broadcast %cst_69 : f32 to vector<2x1024xf32>
    %106 = arith.mulf %105, %101 : vector<2x1024xf32>
    %c0_70 = arith.constant 0 : index
    %107 = memref.load %arg3[%c0_70] : memref<4xf32, #tpu.memory_space<smem>>
    %cst_71 = arith.constant 5.000000e-01 : f32
    %108 = arith.mulf %cst_71, %107 : f32
    %109 = vector.broadcast %108 : f32 to vector<2x1024xf32>
    %110 = arith.subf %106, %109 : vector<2x1024xf32>
    %c0_72 = arith.constant 0 : index
    %111 = memref.load %arg2[%c0_72] : memref<4xf32, #tpu.memory_space<smem>>
    %112 = arith.mulf %104, %104 : vector<2x1024xf32>
    %113 = vector.broadcast %111 : f32 to vector<2x1024xf32>
    %114 = arith.addf %113, %112 : vector<2x1024xf32>
    %cst_73 = arith.constant 0.000000e+00 : f32
    %115 = vector.broadcast %cst_73 : f32 to vector<2x1024xf32>
    %116 = arith.subf %115, %101 : vector<2x1024xf32>
    %117 = math.exp %116 : vector<2x1024xf32>
    %cst_74 = arith.constant 5.000000e-01 : f32
    %118 = vector.broadcast %cst_74 : f32 to vector<2x1024xf32>
    %119 = arith.mulf %118, %117 : vector<2x1024xf32>
    %120 = arith.mulf %114, %119 : vector<2x1024xf32>
    %121 = arith.addf %110, %120 : vector<2x1024xf32>
    %cst_75 = arith.constant 5.000000e-01 : f32
    %122 = vector.broadcast %cst_75 : f32 to vector<2x1024xf32>
    %123 = arith.subf %121, %122 : vector<2x1024xf32>
    %cst_76 = arith.constant dense<0.000000e+00> : vector<2xf32>
    %124 = vector.multi_reduction <add>, %123, %cst_76 [1] : vector<2x1024xf32> to vector<2xf32>
    %125 = vector.shape_cast %124 : vector<2xf32> to vector<2x1xf32>
    %cst_77 = arith.constant 1.024000e+03 : f32
    %126 = vector.broadcast %cst_77 : f32 to vector<2x1xf32>
    %127 = arith.divf %125, %126 : vector<2x1xf32>
    %128 = arith.addf %57, %127 : vector<2x1xf32>
    %c4_78 = arith.constant 4 : index
    %c0_79 = arith.constant 0 : index
    %129 = vector.load %arg22[%c4_78, %c0_79] : memref<8x1024xf32, #tpu.memory_space<vmem>>, vector<2x1024xf32>
    %c1_80 = arith.constant 1 : index
    %c0_81 = arith.constant 0 : index
    %c0_82 = arith.constant 0 : index
    %130 = vector.load %arg6[%c1_80, %c0_81, %c0_82] : memref<3x1024x32xbf16, #tpu.memory_space<vmem>>, vector<1x1024x32xbf16>
    %131 = vector.shape_cast %130 : vector<1x1024x32xbf16> to vector<1024x32xbf16>
    %132 = arith.truncf %129 : vector<2x1024xf32> to vector<2x1024xbf16>
    %cst_83 = arith.constant dense<0.000000e+00> : vector<2x32xf32>
    %133 = tpu.matmul %132, %131, %cst_83 {dimension_numbers = #tpu.dot_dimension_numbers<[1], [0], [0], [1], [0, 0, 1, 1], [], []>} : vector<2x1024xbf16>, vector<1024x32xbf16>, vector<2x32xf32> -> vector<2x32xf32>
    %c1_84 = arith.constant 1 : index
    %c0_85 = arith.constant 0 : index
    %c0_86 = arith.constant 0 : index
    %134 = vector.load %arg7[%c1_84, %c0_85, %c0_86] : memref<3x1x32xf32, #tpu.memory_space<vmem>>, vector<1x1x32xf32>
    %135 = vector.shape_cast %134 : vector<1x1x32xf32> to vector<1x32xf32>
    %136 = vector.broadcast %135 : vector<1x32xf32> to vector<2x32xf32>
    %137 = arith.addf %133, %136 : vector<2x32xf32>
    %cst_87 = arith.constant 0.00999999977 : f32
    %138 = vector.broadcast %cst_87 : f32 to vector<2x32xf32>
    %139 = arith.mulf %138, %137 : vector<2x32xf32>
    %140 = arith.maximumf %137, %139 : vector<2x32xf32>
    %c1_88 = arith.constant 1 : index
    %c0_89 = arith.constant 0 : index
    %c0_90 = arith.constant 0 : index
    %141 = vector.load %arg8[%c1_88, %c0_89, %c0_90] : memref<3x32x32xbf16, #tpu.memory_space<vmem>>, vector<1x32x32xbf16>
    %142 = vector.shape_cast %141 : vector<1x32x32xbf16> to vector<32x32xbf16>
    %143 = arith.truncf %140 : vector<2x32xf32> to vector<2x32xbf16>
    %cst_91 = arith.constant dense<0.000000e+00> : vector<2x32xf32>
    %144 = tpu.matmul %143, %142, %cst_91 {dimension_numbers = #tpu.dot_dimension_numbers<[1], [0], [0], [1], [0, 0, 1, 1], [], []>} : vector<2x32xbf16>, vector<32x32xbf16>, vector<2x32xf32> -> vector<2x32xf32>
    %c1_92 = arith.constant 1 : index
    %c0_93 = arith.constant 0 : index
    %c0_94 = arith.constant 0 : index
    %145 = vector.load %arg9[%c1_92, %c0_93, %c0_94] : memref<3x1x32xf32, #tpu.memory_space<vmem>>, vector<1x1x32xf32>
    %146 = vector.shape_cast %145 : vector<1x1x32xf32> to vector<1x32xf32>
    %147 = vector.broadcast %146 : vector<1x32xf32> to vector<2x32xf32>
    %148 = arith.addf %144, %147 : vector<2x32xf32>
    %cst_95 = arith.constant 0.00999999977 : f32
    %149 = vector.broadcast %cst_95 : f32 to vector<2x32xf32>
    %150 = arith.mulf %149, %148 : vector<2x32xf32>
    %151 = arith.maximumf %148, %150 : vector<2x32xf32>
    %c1_96 = arith.constant 1 : index
    %c0_97 = arith.constant 0 : index
    %c0_98 = arith.constant 0 : index
    %152 = vector.load %arg10[%c1_96, %c0_97, %c0_98] : memref<3x32x32xbf16, #tpu.memory_space<vmem>>, vector<1x32x32xbf16>
    %153 = vector.shape_cast %152 : vector<1x32x32xbf16> to vector<32x32xbf16>
    %154 = arith.truncf %151 : vector<2x32xf32> to vector<2x32xbf16>
    %cst_99 = arith.constant dense<0.000000e+00> : vector<2x32xf32>
    %155 = tpu.matmul %154, %153, %cst_99 {dimension_numbers = #tpu.dot_dimension_numbers<[1], [0], [0], [1], [0, 0, 1, 1], [], []>} : vector<2x32xbf16>, vector<32x32xbf16>, vector<2x32xf32> -> vector<2x32xf32>
    %c1_100 = arith.constant 1 : index
    %c0_101 = arith.constant 0 : index
    %c0_102 = arith.constant 0 : index
    %156 = vector.load %arg11[%c1_100, %c0_101, %c0_102] : memref<3x1x32xf32, #tpu.memory_space<vmem>>, vector<1x1x32xf32>
    %157 = vector.shape_cast %156 : vector<1x1x32xf32> to vector<1x32xf32>
    %158 = vector.broadcast %157 : vector<1x32xf32> to vector<2x32xf32>
    %159 = arith.addf %155, %158 : vector<2x32xf32>
    %cst_103 = arith.constant 0.00999999977 : f32
    %160 = vector.broadcast %cst_103 : f32 to vector<2x32xf32>
    %161 = arith.mulf %160, %159 : vector<2x32xf32>
    %162 = arith.maximumf %159, %161 : vector<2x32xf32>
    %c1_104 = arith.constant 1 : index
    %c0_105 = arith.constant 0 : index
    %c0_106 = arith.constant 0 : index
    %163 = vector.load %arg12[%c1_104, %c0_105, %c0_106] : memref<3x32x2048xbf16, #tpu.memory_space<vmem>>, vector<1x32x2048xbf16>
    %164 = vector.shape_cast %163 : vector<1x32x2048xbf16> to vector<32x2048xbf16>
    %165 = arith.truncf %162 : vector<2x32xf32> to vector<2x32xbf16>
    %cst_107 = arith.constant dense<0.000000e+00> : vector<2x2048xf32>
    %166 = tpu.matmul %165, %164, %cst_107 {dimension_numbers = #tpu.dot_dimension_numbers<[1], [0], [0], [1], [0, 0, 1, 1], [], []>} : vector<2x32xbf16>, vector<32x2048xbf16>, vector<2x2048xf32> -> vector<2x2048xf32>
    %c1_108 = arith.constant 1 : index
    %c0_109 = arith.constant 0 : index
    %c0_110 = arith.constant 0 : index
    %167 = vector.load %arg13[%c1_108, %c0_109, %c0_110] : memref<3x1x2048xf32, #tpu.memory_space<vmem>>, vector<1x1x2048xf32>
    %168 = vector.shape_cast %167 : vector<1x1x2048xf32> to vector<1x2048xf32>
    %169 = vector.broadcast %168 : vector<1x2048xf32> to vector<2x2048xf32>
    %170 = arith.addf %166, %169 : vector<2x2048xf32>
    %171 = vector.extract_strided_slice %170 {offsets = [0, 0], sizes = [2, 1024], strides = [1, 1]} : vector<2x2048xf32> to vector<2x1024xf32>
    %172 = vector.extract_strided_slice %170 {offsets = [0, 1024], sizes = [2, 1024], strides = [1, 1]} : vector<2x2048xf32> to vector<2x1024xf32>
    %c2_111 = arith.constant 2 : index
    %c0_112 = arith.constant 0 : index
    %173 = vector.load %arg23[%c2_111, %c0_112] : memref<6x1024xf32, #tpu.memory_space<vmem>>, vector<2x1024xf32>
    tpu.vector_store %arg23[%c2_111, %c0_112], %171 {strides = array<i32>} : memref<6x1024xf32, #tpu.memory_space<vmem>>, vector<2x1024xf32>,
    %c2_113 = arith.constant 2 : index
    %c0_114 = arith.constant 0 : index
    %174 = vector.load %arg22[%c2_113, %c0_114] : memref<8x1024xf32, #tpu.memory_space<vmem>>, vector<2x1024xf32>
    %175 = arith.subf %174, %171 : vector<2x1024xf32>
    %cst_115 = arith.constant 5.000000e-01 : f32
    %176 = vector.broadcast %cst_115 : f32 to vector<2x1024xf32>
    %177 = arith.mulf %176, %172 : vector<2x1024xf32>
    %c1_116 = arith.constant 1 : index
    %178 = memref.load %arg3[%c1_116] : memref<4xf32, #tpu.memory_space<smem>>
    %cst_117 = arith.constant 5.000000e-01 : f32
    %179 = arith.mulf %cst_117, %178 : f32
    %180 = vector.broadcast %179 : f32 to vector<2x1024xf32>
    %181 = arith.subf %177, %180 : vector<2x1024xf32>
    %c1_118 = arith.constant 1 : index
    %182 = memref.load %arg2[%c1_118] : memref<4xf32, #tpu.memory_space<smem>>
    %183 = arith.mulf %175, %175 : vector<2x1024xf32>
    %184 = vector.broadcast %182 : f32 to vector<2x1024xf32>
    %185 = arith.addf %184, %183 : vector<2x1024xf32>
    %cst_119 = arith.constant 0.000000e+00 : f32
    %186 = vector.broadcast %cst_119 : f32 to vector<2x1024xf32>
    %187 = arith.subf %186, %172 : vector<2x1024xf32>
    %188 = math.exp %187 : vector<2x1024xf32>
    %cst_120 = arith.constant 5.000000e-01 : f32
    %189 = vector.broadcast %cst_120 : f32 to vector<2x1024xf32>
    %190 = arith.mulf %189, %188 : vector<2x1024xf32>
    %191 = arith.mulf %185, %190 : vector<2x1024xf32>
    %192 = arith.addf %181, %191 : vector<2x1024xf32>
    %cst_121 = arith.constant 5.000000e-01 : f32
    %193 = vector.broadcast %cst_121 : f32 to vector<2x1024xf32>
    %194 = arith.subf %192, %193 : vector<2x1024xf32>
    %cst_122 = arith.constant dense<0.000000e+00> : vector<2xf32>
    %195 = vector.multi_reduction <add>, %194, %cst_122 [1] : vector<2x1024xf32> to vector<2xf32>
    %196 = vector.shape_cast %195 : vector<2xf32> to vector<2x1xf32>
    %cst_123 = arith.constant 1.024000e+03 : f32
    %197 = vector.broadcast %cst_123 : f32 to vector<2x1xf32>
    %198 = arith.divf %196, %197 : vector<2x1xf32>
    %199 = arith.addf %128, %198 : vector<2x1xf32>
    %c6_124 = arith.constant 6 : index
    %c0_125 = arith.constant 0 : index
    %200 = vector.load %arg22[%c6_124, %c0_125] : memref<8x1024xf32, #tpu.memory_space<vmem>>, vector<2x1024xf32>
    %c2_126 = arith.constant 2 : index
    %c0_127 = arith.constant 0 : index
    %c0_128 = arith.constant 0 : index
    %201 = vector.load %arg6[%c2_126, %c0_127, %c0_128] : memref<3x1024x32xbf16, #tpu.memory_space<vmem>>, vector<1x1024x32xbf16>
    %202 = vector.shape_cast %201 : vector<1x1024x32xbf16> to vector<1024x32xbf16>
    %203 = arith.truncf %200 : vector<2x1024xf32> to vector<2x1024xbf16>
    %cst_129 = arith.constant dense<0.000000e+00> : vector<2x32xf32>
    %204 = tpu.matmul %203, %202, %cst_129 {dimension_numbers = #tpu.dot_dimension_numbers<[1], [0], [0], [1], [0, 0, 1, 1], [], []>} : vector<2x1024xbf16>, vector<1024x32xbf16>, vector<2x32xf32> -> vector<2x32xf32>
    %c2_130 = arith.constant 2 : index
    %c0_131 = arith.constant 0 : index
    %c0_132 = arith.constant 0 : index
    %205 = vector.load %arg7[%c2_130, %c0_131, %c0_132] : memref<3x1x32xf32, #tpu.memory_space<vmem>>, vector<1x1x32xf32>
    %206 = vector.shape_cast %205 : vector<1x1x32xf32> to vector<1x32xf32>
    %207 = vector.broadcast %206 : vector<1x32xf32> to vector<2x32xf32>
    %208 = arith.addf %204, %207 : vector<2x32xf32>
    %cst_133 = arith.constant 0.00999999977 : f32
    %209 = vector.broadcast %cst_133 : f32 to vector<2x32xf32>
    %210 = arith.mulf %209, %208 : vector<2x32xf32>
    %211 = arith.maximumf %208, %210 : vector<2x32xf32>
    %c2_134 = arith.constant 2 : index
    %c0_135 = arith.constant 0 : index
    %c0_136 = arith.constant 0 : index
    %212 = vector.load %arg8[%c2_134, %c0_135, %c0_136] : memref<3x32x32xbf16, #tpu.memory_space<vmem>>, vector<1x32x32xbf16>
    %213 = vector.shape_cast %212 : vector<1x32x32xbf16> to vector<32x32xbf16>
    %214 = arith.truncf %211 : vector<2x32xf32> to vector<2x32xbf16>
    %cst_137 = arith.constant dense<0.000000e+00> : vector<2x32xf32>
    %215 = tpu.matmul %214, %213, %cst_137 {dimension_numbers = #tpu.dot_dimension_numbers<[1], [0], [0], [1], [0, 0, 1, 1], [], []>} : vector<2x32xbf16>, vector<32x32xbf16>, vector<2x32xf32> -> vector<2x32xf32>
    %c2_138 = arith.constant 2 : index
    %c0_139 = arith.constant 0 : index
    %c0_140 = arith.constant 0 : index
    %216 = vector.load %arg9[%c2_138, %c0_139, %c0_140] : memref<3x1x32xf32, #tpu.memory_space<vmem>>, vector<1x1x32xf32>
    %217 = vector.shape_cast %216 : vector<1x1x32xf32> to vector<1x32xf32>
    %218 = vector.broadcast %217 : vector<1x32xf32> to vector<2x32xf32>
    %219 = arith.addf %215, %218 : vector<2x32xf32>
    %cst_141 = arith.constant 0.00999999977 : f32
    %220 = vector.broadcast %cst_141 : f32 to vector<2x32xf32>
    %221 = arith.mulf %220, %219 : vector<2x32xf32>
    %222 = arith.maximumf %219, %221 : vector<2x32xf32>
    %c2_142 = arith.constant 2 : index
    %c0_143 = arith.constant 0 : index
    %c0_144 = arith.constant 0 : index
    %223 = vector.load %arg10[%c2_142, %c0_143, %c0_144] : memref<3x32x32xbf16, #tpu.memory_space<vmem>>, vector<1x32x32xbf16>
    %224 = vector.shape_cast %223 : vector<1x32x32xbf16> to vector<32x32xbf16>
    %225 = arith.truncf %222 : vector<2x32xf32> to vector<2x32xbf16>
    %cst_145 = arith.constant dense<0.000000e+00> : vector<2x32xf32>
    %226 = tpu.matmul %225, %224, %cst_145 {dimension_numbers = #tpu.dot_dimension_numbers<[1], [0], [0], [1], [0, 0, 1, 1], [], []>} : vector<2x32xbf16>, vector<32x32xbf16>, vector<2x32xf32> -> vector<2x32xf32>
    %c2_146 = arith.constant 2 : index
    %c0_147 = arith.constant 0 : index
    %c0_148 = arith.constant 0 : index
    %227 = vector.load %arg11[%c2_146, %c0_147, %c0_148] : memref<3x1x32xf32, #tpu.memory_space<vmem>>, vector<1x1x32xf32>
    %228 = vector.shape_cast %227 : vector<1x1x32xf32> to vector<1x32xf32>
    %229 = vector.broadcast %228 : vector<1x32xf32> to vector<2x32xf32>
    %230 = arith.addf %226, %229 : vector<2x32xf32>
    %cst_149 = arith.constant 0.00999999977 : f32
    %231 = vector.broadcast %cst_149 : f32 to vector<2x32xf32>
    %232 = arith.mulf %231, %230 : vector<2x32xf32>
    %233 = arith.maximumf %230, %232 : vector<2x32xf32>
    %c2_150 = arith.constant 2 : index
    %c0_151 = arith.constant 0 : index
    %c0_152 = arith.constant 0 : index
    %234 = vector.load %arg12[%c2_150, %c0_151, %c0_152] : memref<3x32x2048xbf16, #tpu.memory_space<vmem>>, vector<1x32x2048xbf16>
    %235 = vector.shape_cast %234 : vector<1x32x2048xbf16> to vector<32x2048xbf16>
    %236 = arith.truncf %233 : vector<2x32xf32> to vector<2x32xbf16>
    %cst_153 = arith.constant dense<0.000000e+00> : vector<2x2048xf32>
    %237 = tpu.matmul %236, %235, %cst_153 {dimension_numbers = #tpu.dot_dimension_numbers<[1], [0], [0], [1], [0, 0, 1, 1], [], []>} : vector<2x32xbf16>, vector<32x2048xbf16>, vector<2x2048xf32> -> vector<2x2048xf32>
    %c2_154 = arith.constant 2 : index
    %c0_155 = arith.constant 0 : index
    %c0_156 = arith.constant 0 : index
    %238 = vector.load %arg13[%c2_154, %c0_155, %c0_156] : memref<3x1x2048xf32, #tpu.memory_space<vmem>>, vector<1x1x2048xf32>
    %239 = vector.shape_cast %238 : vector<1x1x2048xf32> to vector<1x2048xf32>
    %240 = vector.broadcast %239 : vector<1x2048xf32> to vector<2x2048xf32>
    %241 = arith.addf %237, %240 : vector<2x2048xf32>
    %242 = vector.extract_strided_slice %241 {offsets = [0, 0], sizes = [2, 1024], strides = [1, 1]} : vector<2x2048xf32> to vector<2x1024xf32>
    %243 = vector.extract_strided_slice %241 {offsets = [0, 1024], sizes = [2, 1024], strides = [1, 1]} : vector<2x2048xf32> to vector<2x1024xf32>
    %c4_157 = arith.constant 4 : index
    %c0_158 = arith.constant 0 : index
    %244 = vector.load %arg23[%c4_157, %c0_158] : memref<6x1024xf32, #tpu.memory_space<vmem>>, vector<2x1024xf32>
    tpu.vector_store %arg23[%c4_157, %c0_158], %242 {strides = array<i32>} : memref<6x1024xf32, #tpu.memory_space<vmem>>, vector<2x1024xf32>,
    %c4_159 = arith.constant 4 : index
    %c0_160 = arith.constant 0 : index
    %245 = vector.load %arg22[%c4_159, %c0_160] : memref<8x1024xf32, #tpu.memory_space<vmem>>, vector<2x1024xf32>
    %246 = arith.subf %245, %242 : vector<2x1024xf32>
    %cst_161 = arith.constant 5.000000e-01 : f32
    %247 = vector.broadcast %cst_161 : f32 to vector<2x1024xf32>
    %248 = arith.mulf %247, %243 : vector<2x1024xf32>
    %c2_162 = arith.constant 2 : index
    %249 = memref.load %arg3[%c2_162] : memref<4xf32, #tpu.memory_space<smem>>
    %cst_163 = arith.constant 5.000000e-01 : f32
    %250 = arith.mulf %cst_163, %249 : f32
    %251 = vector.broadcast %250 : f32 to vector<2x1024xf32>
    %252 = arith.subf %248, %251 : vector<2x1024xf32>
    %c2_164 = arith.constant 2 : index
    %253 = memref.load %arg2[%c2_164] : memref<4xf32, #tpu.memory_space<smem>>
    %254 = arith.mulf %246, %246 : vector<2x1024xf32>
    %255 = vector.broadcast %253 : f32 to vector<2x1024xf32>
    %256 = arith.addf %255, %254 : vector<2x1024xf32>
    %cst_165 = arith.constant 0.000000e+00 : f32
    %257 = vector.broadcast %cst_165 : f32 to vector<2x1024xf32>
    %258 = arith.subf %257, %243 : vector<2x1024xf32>
    %259 = math.exp %258 : vector<2x1024xf32>
    %cst_166 = arith.constant 5.000000e-01 : f32
    %260 = vector.broadcast %cst_166 : f32 to vector<2x1024xf32>
    %261 = arith.mulf %260, %259 : vector<2x1024xf32>
    %262 = arith.mulf %256, %261 : vector<2x1024xf32>
    %263 = arith.addf %252, %262 : vector<2x1024xf32>
    %cst_167 = arith.constant 5.000000e-01 : f32
    %264 = vector.broadcast %cst_167 : f32 to vector<2x1024xf32>
    %265 = arith.subf %263, %264 : vector<2x1024xf32>
    %cst_168 = arith.constant dense<0.000000e+00> : vector<2xf32>
    %266 = vector.multi_reduction <add>, %265, %cst_168 [1] : vector<2x1024xf32> to vector<2xf32>
    %267 = vector.shape_cast %266 : vector<2xf32> to vector<2x1xf32>
    %cst_169 = arith.constant 1.024000e+03 : f32
    %268 = vector.broadcast %cst_169 : f32 to vector<2x1xf32>
    %269 = arith.divf %267, %268 : vector<2x1xf32>
    %270 = arith.addf %199, %269 : vector<2x1xf32>
    %c0_170 = arith.constant 0 : index
    %c0_171 = arith.constant 0 : index
    %271 = vector.load %arg22[%c0_170, %c0_171] : memref<8x1024xf32, #tpu.memory_space<vmem>>, vector<2x1024xf32>
    %c0_172 = arith.constant 0 : index
    %c0_173 = arith.constant 0 : index
    %272 = vector.load %arg14[%c0_172, %c0_173] : memref<1024x64xbf16, #tpu.memory_space<vmem>>, vector<1024x64xbf16>
    %273 = arith.truncf %271 : vector<2x1024xf32> to vector<2x1024xbf16>
    %cst_174 = arith.constant dense<0.000000e+00> : vector<2x64xf32>
    %274 = tpu.matmul %273, %272, %cst_174 {dimension_numbers = #tpu.dot_dimension_numbers<[1], [0], [0], [1], [0, 0, 1, 1], [], []>} : vector<2x1024xbf16>, vector<1024x64xbf16>, vector<2x64xf32> -> vector<2x64xf32>
    %c0_175 = arith.constant 0 : index
    %c0_176 = arith.constant 0 : index
    %275 = vector.load %arg15[%c0_175, %c0_176] : memref<1x64xf32, #tpu.memory_space<vmem>>, vector<1x64xf32>
    %276 = vector.broadcast %275 : vector<1x64xf32> to vector<2x64xf32>
    %277 = arith.addf %274, %276 : vector<2x64xf32>
    %cst_177 = arith.constant 0.00999999977 : f32
    %278 = vector.broadcast %cst_177 : f32 to vector<2x64xf32>
    %279 = arith.mulf %278, %277 : vector<2x64xf32>
    %280 = arith.maximumf %277, %279 : vector<2x64xf32>
    %c0_178 = arith.constant 0 : index
    %c0_179 = arith.constant 0 : index
    %281 = vector.load %arg16[%c0_178, %c0_179] : memref<64x64xbf16, #tpu.memory_space<vmem>>, vector<64x64xbf16>
    %282 = arith.truncf %280 : vector<2x64xf32> to vector<2x64xbf16>
    %cst_180 = arith.constant dense<0.000000e+00> : vector<2x64xf32>
    %283 = tpu.matmul %282, %281, %cst_180 {dimension_numbers = #tpu.dot_dimension_numbers<[1], [0], [0], [1], [0, 0, 1, 1], [], []>} : vector<2x64xbf16>, vector<64x64xbf16>, vector<2x64xf32> -> vector<2x64xf32>
    %c0_181 = arith.constant 0 : index
    %c0_182 = arith.constant 0 : index
    %284 = vector.load %arg17[%c0_181, %c0_182] : memref<1x64xf32, #tpu.memory_space<vmem>>, vector<1x64xf32>
    %285 = vector.broadcast %284 : vector<1x64xf32> to vector<2x64xf32>
    %286 = arith.addf %283, %285 : vector<2x64xf32>
    %cst_183 = arith.constant 0.00999999977 : f32
    %287 = vector.broadcast %cst_183 : f32 to vector<2x64xf32>
    %288 = arith.mulf %287, %286 : vector<2x64xf32>
    %289 = arith.maximumf %286, %288 : vector<2x64xf32>
    %c0_184 = arith.constant 0 : index
    %c0_185 = arith.constant 0 : index
    %290 = vector.load %arg18[%c0_184, %c0_185] : memref<64x64xbf16, #tpu.memory_space<vmem>>, vector<64x64xbf16>
    %291 = arith.truncf %289 : vector<2x64xf32> to vector<2x64xbf16>
    %cst_186 = arith.constant dense<0.000000e+00> : vector<2x64xf32>
    %292 = tpu.matmul %291, %290, %cst_186 {dimension_numbers = #tpu.dot_dimension_numbers<[1], [0], [0], [1], [0, 0, 1, 1], [], []>} : vector<2x64xbf16>, vector<64x64xbf16>, vector<2x64xf32> -> vector<2x64xf32>
    %c0_187 = arith.constant 0 : index
    %c0_188 = arith.constant 0 : index
    %293 = vector.load %arg19[%c0_187, %c0_188] : memref<1x64xf32, #tpu.memory_space<vmem>>, vector<1x64xf32>
    %294 = vector.broadcast %293 : vector<1x64xf32> to vector<2x64xf32>
    %295 = arith.addf %292, %294 : vector<2x64xf32>
    %cst_189 = arith.constant 0.00999999977 : f32
    %296 = vector.broadcast %cst_189 : f32 to vector<2x64xf32>
    %297 = arith.mulf %296, %295 : vector<2x64xf32>
    %298 = arith.maximumf %295, %297 : vector<2x64xf32>
    %c0_190 = arith.constant 0 : index
    %c0_191 = arith.constant 0 : index
    %299 = vector.load %arg20[%c0_190, %c0_191] : memref<64x1024xbf16, #tpu.memory_space<vmem>>, vector<64x1024xbf16>
    %300 = arith.truncf %298 : vector<2x64xf32> to vector<2x64xbf16>
    %cst_192 = arith.constant dense<0.000000e+00> : vector<2x1024xf32>
    %301 = tpu.matmul %300, %299, %cst_192 {dimension_numbers = #tpu.dot_dimension_numbers<[1], [0], [0], [1], [0, 0, 1, 1], [], []>} : vector<2x64xbf16>, vector<64x1024xbf16>, vector<2x1024xf32> -> vector<2x1024xf32>
    %c0_193 = arith.constant 0 : index
    %c0_194 = arith.constant 0 : index
    %302 = vector.load %arg21[%c0_193, %c0_194] : memref<1x1024xf32, #tpu.memory_space<vmem>>, vector<1x1024xf32>
    %303 = vector.broadcast %302 : vector<1x1024xf32> to vector<2x1024xf32>
    %304 = arith.addf %301, %303 : vector<2x1024xf32>
    %305 = math.tanh %304 : vector<2x1024xf32>
    %c0_195 = arith.constant 0 : index
    %c0_196 = arith.constant 0 : index
    %306 = vector.load %arg24[%c0_195, %c0_196] : memref<2x1024xf32, #tpu.memory_space<vmem>>, vector<2x1024xf32>
    tpu.vector_store %arg24[%c0_195, %c0_196], %305 {strides = array<i32>} : memref<2x1024xf32, #tpu.memory_space<vmem>>, vector<2x1024xf32>,
    %c0_197 = arith.constant 0 : index
    %c0_198 = arith.constant 0 : index
    %307 = vector.load %arg4[%c0_197, %c0_198] : memref<2x1024xf32, #tpu.memory_space<vmem>>, vector<2x1024xf32>
    %308 = arith.subf %307, %305 : vector<2x1024xf32>
    %cst_199 = arith.constant 5.000000e-01 : f32
    %309 = vector.broadcast %cst_199 : f32 to vector<2x1024xf32>
    %310 = arith.mulf %309, %308 : vector<2x1024xf32>
    %311 = arith.mulf %310, %308 : vector<2x1024xf32>
    %cst_200 = arith.constant -0.918938517 : f32
    %312 = vector.broadcast %cst_200 : f32 to vector<2x1024xf32>
    %313 = arith.subf %312, %311 : vector<2x1024xf32>
    %cst_201 = arith.constant dense<0.000000e+00> : vector<2xf32>
    %314 = vector.multi_reduction <add>, %313, %cst_201 [1] : vector<2x1024xf32> to vector<2xf32>
    %315 = vector.shape_cast %314 : vector<2xf32> to vector<2x1xf32>
    %cst_202 = arith.constant 1.024000e+03 : f32
    %316 = vector.broadcast %cst_202 : f32 to vector<2x1xf32>
    %317 = arith.divf %315, %316 : vector<2x1xf32>
    %318 = arith.subf %317, %270 : vector<2x1xf32>
    %319 = vector.shape_cast %318 : vector<2x1xf32> to vector<1x2x1xf32>
    %cst_203 = arith.constant dense<0.000000e+00> : vector<1xf32>
    %320 = vector.multi_reduction <add>, %319, %cst_203 [1, 2] : vector<1x2x1xf32> to vector<1xf32>
    %321 = vector.shape_cast %320 : vector<1xf32> to vector<1x1x1xf32>
    %322 = vector.extract %321[0, 0, 0] : f32 from vector<1x1x1xf32>
    %cst_204 = arith.constant 0.000000e+00 : f32
    %323 = arith.subf %cst_204, %322 : f32
    %cst_205 = arith.constant 2.000000e+00 : f32
    %324 = arith.divf %323, %cst_205 : f32
    %c0_206 = arith.constant 0 : index
    %c0_207 = arith.constant 0 : index
    %325 = memref.load %arg25[%c0_206, %c0_207] : memref<1x1xf32, #tpu.memory_space<smem>>
    memref.store %324, %arg25[%c0_206, %c0_207] : memref<1x1xf32, #tpu.memory_space<smem>>
    return
  }
}

</mosaic_0001>

<bundles_post_ra>
// kernel: ddgmnet_forward.1
= control target key start
LH: loop header
LB: loop body
LE: loop exit
PB: predicated region body
PF: predicated region fallthrough
CT: control target
= control target key end

     0   :  { %s11183_s0 = inlined_call_operand.vmem [shape: f32[4], index: 0, kind: input, shape index: {}]   ;;  %s11184_s1 = inlined_call_operand.vmem [shape: f32[4], index: 1, kind: input, shape index: {}]   ;;  %s11185_s2 = inlined_call_operand.vmem [shape: f32[4], index: 2, kind: input, shape index: {}]   ;;  %s11186_s3 = inlined_call_operand.vmem [shape: f32[4], index: 3, kind: input, shape index: {}]   ;;  %s11187_s4 = inlined_call_operand.vmem [shape: f32[2,1024], index: 4, kind: input, shape index: {}]   ;;  %s11188_s5 = inlined_call_operand.vmem [shape: f32[4,2,1024], index: 5, kind: input, shape index: {}]   ;;  %s11189_s6 = inlined_call_operand.vmem [shape: bf16[3,1024,32], index: 6, kind: input, shape index: {}]   ;;  %s11190_s7 = inlined_call_operand.vmem [shape: f32[3,1,32], index: 7, kind: input, shape index: {}]   ;;  %s11191_s8 = inlined_call_operand.vmem [shape: bf16[3,32,32], index: 8, kind: input, shape index: {}]   ;;  %s11192_s9 = inlined_call_operand.vmem [shape: f32[3,1,32], index: 9, kind: input, shape index: {}]   ;;  %s11193_s10 = inlined_call_operand.vmem [shape: bf16[3,32,32], index: 10, kind: input, shape index: {}]   ;;  %s11194_s11 = inlined_call_operand.vmem [shape: f32[3,1,32], index: 11, kind: input, shape index: {}]   ;;  %s11195_s12 = inlined_call_operand.vmem [shape: bf16[3,32,2048], index: 12, kind: input, shape index: {}]   ;;  %s11196_s13 = inlined_call_operand.vmem [shape: f32[3,1,2048], index: 13, kind: input, shape index: {}]   ;;  %s11197_s14 = inlined_call_operand.vmem [shape: bf16[1024,64], index: 14, kind: input, shape index: {}]   ;;  %s11198_s15 = inlined_call_operand.vmem [shape: f32[1,64], index: 15, kind: input, shape index: {}]   ;;  %s11199_s16 = inlined_call_operand.vmem [shape: bf16[64,64], index: 16, kind: input, shape index: {}]   ;;  %s11200_s17 = inlined_call_operand.vmem [shape: f32[1,64], index: 17, kind: input, shape index: {}]   ;;  %s11201_s18 = inlined_call_operand.vmem [shape: bf16[64,64], index: 18, kind: input, shape index: {}]   ;;  %s11202_s19 = inlined_call_operand.vmem [shape: f32[1,64], index: 19, kind: input, shape index: {}]   ;;  %s11203_s20 = inlined_call_operand.vmem [shape: bf16[64,1024], index: 20, kind: input, shape index: {}]   ;;  %s11204_s21 = inlined_call_operand.vmem [shape: f32[1,1024], index: 21, kind: input, shape index: {}]   ;;  %s11205_s22 = inlined_call_operand.vmem [shape: f32[8,1024], index: 22, kind: output, shape index: {0}]   ;;  %s11206_s23 = inlined_call_operand.vmem [shape: f32[6,1024], index: 23, kind: output, shape index: {1}]   ;;  %s11207_s24 = inlined_call_operand.hbm [shape: f32[2,1024], index: 24, kind: output, shape index: {2}]   ;;  %s11208_s25 = inlined_call_operand.hbm [shape: f32[1,1], index: 25, kind: output, shape index: {3}]  }
   0x1   :  { %11216 = sst [smem:[#allocation18_spill]] %s11183_s0 }
   0x2   :  { %11217 = sst [smem:[#allocation19_spill]] %s11184_s1 }
   0x3   :  { %11218 = sst [smem:[#allocation20_spill]] %s11185_s2 }
   0x4   :  { %11219 = sst [smem:[#allocation21_spill]] %s11186_s3 }
   0x5   :  { %11220 = sst [smem:[#allocation22_spill]] %s11187_s4 }
   0x6   :  { %11221 = sst [smem:[#allocation23_spill]] %s11188_s5 }
   0x7   :  { %11222 = sst [smem:[#allocation24_spill]] %s11189_s6 }
   0x8   :  { %11223 = sst [smem:[#allocation25_spill]] %s11190_s7 }
   0x9   :  { %11224 = sst [smem:[#allocation26_spill]] %s11191_s8 }
   0xa   :  { %11225 = sst [smem:[#allocation27_spill]] %s11192_s9 }
   0xb   :  { %11226 = sst [smem:[#allocation28_spill]] %s11208_s25 }
   0xc   :  { %31 = vsyncpa [#allocation5], 0 }
   0xd   :  { %32 = vsyncpa [#allocation7], 0 }
   0xe   :  { %33 = vsyncpa [#allocation10], 0 }
   0xf   :  { %34 = vsyncpa [#allocation3], 0  ;;  %s11227_s6 = sld [smem:[#allocation19_spill]] }
  0x15   :  { %s52_s30 = sshll.u32 %s11227_s6, 4  ;;  %s53_s30 = int_to_ptr.vmem [resolvable:$true] %s52_s30 }
  0x16   :  { %35 = vsyncpa [#allocation4], 0  ;;  %s11228_s26 = sld [smem:[#allocation18_spill]]  ;;  %s8563_s8 = scalar_lea.vmem %s53_s30, 16 }
  0x17   :  { %p8564_p0 = scmp.ne.s32.totalorder %s53_s30, %s8563_s8  ;;  %p8568_p1 = scmp.lt.s32.totalorder %s53_s30, %s53_s30 }
  0x18   :  { %p8569_p2 = scmp.lt.s32.totalorder %s8563_s8, %s8563_s8 }
  0x1a   :  { %p8570_p3 = por %p8569_p2, %p8568_p1 }
  0x1c   :  { %s42_s1 = sshll.u32 %s11228_s26, 4  ;;  %p8571_p4 = pnand %p8570_p3, %p8564_p0  ;;  %s43_s1 = int_to_ptr.vmem [resolvable:$true] %s42_s1 }
  0x1e   :  { %8574 = shalt.err (!%p8571_p4)
}
  0x1f   :  { %s8653_s27 = smov [#allocation6]   ;;  %s8575_s4 = scalar_lea.vmem %s43_s1, 16 }
  0x20   :  { %55 = dma.vmem_to_smem %s53_s30, 16, %s8653_s27, [#allocation7]  }
  0x21   :  { %p8576_p5 = scmp.ne.s32.totalorder %s43_s1, %s8575_s4  ;;  %p8580_p6 = scmp.lt.s32.totalorder %s43_s1, %s43_s1 }
  0x22   :  { %p8581_p7 = scmp.lt.s32.totalorder %s8575_s4, %s8575_s4 }
  0x24   :  { %p8582_p8 = por %p8581_p7, %p8580_p6 }
  0x26   :  { %p8583_p9 = pnand %p8582_p8, %p8576_p5 }
  0x28   :  { %8586 = shalt.err (!%p8583_p9)
}
  0x29   :  { %s8654_s28 = smov [#allocation2]   ;;  %s11229_s0 = sld [smem:[#allocation20_spill]] }
  0x2a   :  { %45 = dma.vmem_to_smem %s43_s1, 16, %s8654_s28, [#allocation5]  }
  0x2b   :  { %s11230_s7 = sld [smem:[#allocation21_spill]] }
  0x2f   :  { %s62_s29 = sshll.u32 %s11229_s0, 4  ;;  %s63_s29 = int_to_ptr.vmem [resolvable:$true] %s62_s29 }
  0x30   :  { %s8587_s30 = scalar_lea.vmem %s63_s29, 16  ;;  %p8592_p11 = scmp.lt.s32.totalorder %s63_s29, %s63_s29 }
  0x31   :  { %s72_s3 = sshll.u32 %s11230_s7, 4  ;;  %p8588_p10 = scmp.ne.s32.totalorder %s63_s29, %s8587_s30  ;;  %s73_s3 = int_to_ptr.vmem [resolvable:$true] %s72_s3 }
  0x32   :  { %p8593_p12 = scmp.lt.s32.totalorder %s8587_s30, %s8587_s30 }
  0x34   :  { %p8594_p13 = por %p8593_p12, %p8592_p11 }
  0x36   :  { %p8595_p0 = pnand %p8594_p13, %p8588_p10 }
  0x38   :  { %8598 = shalt.err (!%p8595_p0)
}
  0x39   :  { %s8655_s26 = smov [#allocation8]   ;;  %s8599_s1 = scalar_lea.vmem %s73_s3, 16 }
  0x3a   :  { %65 = dma.vmem_to_smem %s63_s29, 16, %s8655_s26, [#allocation7]  }
  0x3b   :  { %p8600_p1 = scmp.ne.s32.totalorder %s73_s3, %s8599_s1  ;;  %p8604_p2 = scmp.lt.s32.totalorder %s73_s3, %s73_s3 }
  0x3c   :  { %p8605_p3 = scmp.lt.s32.totalorder %s8599_s1, %s8599_s1 }
  0x3e   :  { %p8606_p4 = por %p8605_p3, %p8604_p2 }
  0x40   :  { %p8607_p5 = pnand %p8606_p4, %p8600_p1 }
  0x42   :  { %8610 = shalt.err (!%p8607_p5)
}
  0x43   :  { %s8656_s8 = smov [#allocation9]  }
  0x44   :  { %75 = dma.vmem_to_smem %s73_s3, 16, %s8656_s8, [#allocation10]  }
  0x45   :  { %8643 = dma.done.wait [#allocation5], 16  }
  0x46   :  { %8644 = vsyncadd [#allocation5], 4294967280 }
  0x47   :  { %8645 = dma.done.wait [#allocation7], 32  }
  0x48   :  { %8646 = vsyncadd [#allocation7], 4294967264 }
  0x49   :  { %8647 = dma.done.wait [#allocation10], 16  }
  0x4a   :  { %8648 = vsyncadd [#allocation10], 4294967280 }
  0x4b   :  { %124 = sfence }
  0x4c   :  { %s11231_s28 = sld [smem:[#allocation24_spill]]  ;;  %s128_s7 = sld [smem:[#allocation2]]  ;;  %v8657_v36 = vmov 1983009808   ;;  %v146_v38 = vlaneseq  ;;  %vm8659_vm0 = vmmov 0   ;;  %vm1205_vm1 = vcmask 261120  }
  0x4d   :  { %s132_s3 = sld [smem:[#allocation6]]  ;;  %s8901_s30 = sld [smem:[#allocation2 + $0x1]]  ;;  %v144_v37 = vunpack.c.l.s4 %v8657_v36  ;;  %vm440_vm2 = vcmask 1047558   ;;  %vm2045_vm3 = vcmask 1041408   ;;  %vm6177_vm4 = vcmask 523264  }
  0x4e   :  { %s11232_s8 = sld [smem:[#allocation22_spill]]  ;;  %s11233_s0 = sld [smem:[#allocation23_spill]]  ;;  %v8924_v45 = vshrl.u32 %v146_v38, 7  ;;  %vm6840_vm5 = vcmask 1024  }
  0x4f   :  { %s6900_s6 = sld [smem:[#allocation6 + $0x1]]  ;;  %v145_v44 = vunpack.c.0.s8 %v144_v37  ;;  %s11234_s1 = sld [smem:[#allocation26_spill]] }
  0x50   :  { %s11235_s29 = sld [smem:[#allocation25_spill]]  ;;  %s11236_s26 = sld [smem:[#allocation27_spill]] }
  0x51   :  { %v8935_v57 = vsub.s32 %v145_v44, %v8924_v45  ;;  %s6907_s25 = sld [smem:[#allocation2 + $0x2]]  ;;  %s6924_s2 = sld [smem:[#allocation8 + $0x3]] }
  0x52   :  { %v8223_v0 = vld [vmem:[%s11231_s28 + $0x40] sm:$0xff]   ;;  %v8227_v4 = vld [vmem:[%s11231_s28 + $0x48] sm:$0xff]   ;;  %v8231_v8 = vld [vmem:[%s11231_s28 + $0x50] sm:$0xff]   ;;  %v129_v42 = vstv %s128_s7  ;;  %s6908_s7 = sld [smem:[#allocation6 + $0x2]]  ;;  %s9613_s5 = sld [smem:[#allocation9 + $0x3]] }
  0x53   :  { %v8224_v1 = vld [vmem:[%s11231_s28 + $0xc0] sm:$0xff]   ;;  %7759 = vmatprep.subr.bf16.mxu0 %v8223_v0  ;;  %v8228_v5 = vld [vmem:[%s11231_s28 + $0xc8] sm:$0xff]   ;;  %v8232_v9 = vld [vmem:[%s11231_s28 + $0xd0] sm:$0xff]   ;;  %v135_v43 = vstv %s132_s3  ;;  %s9691_s27 = sld [smem:[#allocation9]] }
  0x54   :  { %v8225_v2 = vld [vmem:[%s11231_s28] sm:$0xff]   ;;  %7781 = vmatprep.subr.bf16.mxu1 %v8224_v1  ;;  %v8229_v6 = vld [vmem:[%s11231_s28 + $0x8] sm:$0xff]   ;;  %v8233_v10 = vld [vmem:[%s11231_s28 + $0x10] sm:$0xff]   ;;  %v193_v51 = vstv %s8901_s30  ;;  %s9699_s4 = sld [smem:[#allocation8]] }
  0x55   :  { %v8226_v3 = vld [vmem:[%s11231_s28 + $0x80] sm:$0xff]   ;;  %7760 = vmatpush3.bf16.msra.mxu0 %v8225_v2  ;;  %v8230_v7 = vld [vmem:[%s11231_s28 + $0x88] sm:$0xff]   ;;  %v8234_v11 = vld [vmem:[%s11231_s28 + $0x90] sm:$0xff]   ;;  %v200_v52 = vstv %s6900_s6 }
  0x56   :  { %7782 = vmatpush3.bf16.msra.mxu1 %v8226_v3  ;;  %7761 = vmatprep.subr.bf16.mxu0 %v8227_v4  ;;  %v8235_v12 = vld [vmem:[%s11231_s28 + $0x58] sm:$0xff]   ;;  %v8239_v16 = vld [vmem:[%s11231_s28 + $0x60] sm:$0xff]   ;;  %v8243_v20 = vld [vmem:[%s11231_s28 + $0x68] sm:$0xff]  }
  0x57   :  { %7783 = vmatprep.subr.bf16.mxu1 %v8228_v5  ;;  %v8236_v13 = vld [vmem:[%s11231_s28 + $0xd8] sm:$0xff]   ;;  %v8240_v17 = vld [vmem:[%s11231_s28 + $0xe0] sm:$0xff]   ;;  %v8244_v21 = vld [vmem:[%s11231_s28 + $0xe8] sm:$0xff]  }
  0x58   :  { %v8237_v14 = vld [vmem:[%s11231_s28 + $0x18] sm:$0xff]   ;;  %v8241_v18 = vld [vmem:[%s11231_s28 + $0x20] sm:$0xff]   ;;  %v8245_v22 = vld [vmem:[%s11231_s28 + $0x28] sm:$0xff]  }
  0x59   :  { %7762 = vmatpush3.bf16.msra.mxu0 %v8229_v6  ;;  %v8238_v15 = vld [vmem:[%s11231_s28 + $0x98] sm:$0xff]   ;;  %v8242_v19 = vld [vmem:[%s11231_s28 + $0xa0] sm:$0xff]   ;;  %v8246_v23 = vld [vmem:[%s11231_s28 + $0xa8] sm:$0xff]  }
  0x5a   :  { %7784 = vmatpush3.bf16.msra.mxu1 %v8230_v7  ;;  %7763 = vmatprep.subr.bf16.mxu0 %v8231_v8  ;;  %v8247_v24 = vld [vmem:[%s11231_s28 + $0x70] sm:$0xff]   ;;  %v8251_v28 = vld [vmem:[%s11231_s28 + $0x78] sm:$0xff]   ;;  %v126_v32 = vld [vmem:[%s11232_s8] sm:$0xff] }
  0x5b   :  { %7785 = vmatprep.subr.bf16.mxu1 %v8232_v9  ;;  %v8248_v25 = vld [vmem:[%s11231_s28 + $0xf0] sm:$0xff]   ;;  %v8252_v29 = vld [vmem:[%s11231_s28 + $0xf8] sm:$0xff]   ;;  %v127_v33 = vld [vmem:[%s11232_s8 + $0x8] sm:$0xff]  ;;  %v130_v47 = vmul.f32 %v129_v42, %v126_v32 }
  0x5c   :  { %v8249_v26 = vld [vmem:[%s11231_s28 + $0x30] sm:$0xff]   ;;  %v8253_v30 = vld [vmem:[%s11231_s28 + $0x38] sm:$0xff]   ;;  %v133_v34 = vld [vmem:[%s11233_s0] sm:$0xff]  ;;  %v131_v48 = vmul.f32 %v129_v42, %v127_v33 }
  0x5d   :  { %7764 = vmatpush3.bf16.msra.mxu0 %v8233_v10  ;;  %v8250_v27 = vld [vmem:[%s11231_s28 + $0xb0] sm:$0xff]   ;;  %v8254_v31 = vld [vmem:[%s11231_s28 + $0xb8] sm:$0xff]   ;;  %v134_v35 = vld [vmem:[%s11233_s0 + $0x8] sm:$0xff]  ;;  %v136_v49 = vmul.f32 %v135_v43, %v133_v34 }
  0x5e   :  { %7786 = vmatpush3.bf16.msra.mxu1 %v8234_v11  ;;  %7765 = vmatprep.subr.bf16.mxu0 %v8235_v12  ;;  %v8255_v39 = vld [vmem:[%s11231_s28 + $0x140] sm:$0xff]   ;;  %v6901_v41 = vld [vmem:[%s11233_s0 + $0x10] sm:$0xff]  ;;  %v6902_v46 = vld [vmem:[%s11233_s0 + $0x18] sm:$0xff]  ;;  %v137_v50 = vmul.f32 %v135_v43, %v134_v35 }
  0x5f   :  { %7787 = vmatprep.subr.bf16.mxu1 %v8236_v13  ;;  %v8256_v40 = vld [vmem:[%s11231_s28 + $0x1c0] sm:$0xff]   ;;  %v8930_v53 = vadd.f32 %v136_v49, %v130_v47  ;;  %v201_v55 = vmul.f32 %v6901_v41, %v200_v52  ;;  %v202_v56 = vmul.f32 %v6902_v46, %v200_v52  ;;  %v8267_v36 = vld [vmem:[%s11231_s28 + $0x158] sm:$0xff]   ;;  %v8275_v52 = vld [vmem:[%s11231_s28 + $0x168] sm:$0xff]  }
  0x60   :  { %v8932_v54 = vadd.f32 %v137_v50, %v131_v48  ;;  %v8272_v42 = vld [vmem:[%s11231_s28 + $0x1e0] sm:$0xff]   ;;  %v8269_v47 = vld [vmem:[%s11231_s28 + $0x118] sm:$0xff]   ;;  %v8276_v50 = vld [vmem:[%s11231_s28 + $0x1e8] sm:$0xff]  }
  0x61   :  { %7766 = vmatpush3.bf16.msra.mxu0 %v8237_v14  ;;  %v194_v58 = vmul.f32 %v193_v51, %v8930_v53  ;;  %6895 = vst.sshfl [vmem:[%s11205_s22] sm:$0x3 pattern:$0x76325410] %v8930_v53  ;;  %v8271_v48 = vld [vmem:[%s11231_s28 + $0x160] sm:$0xff]  }
  0x62   :  { %7788 = vmatpush3.bf16.msra.mxu1 %v8238_v15  ;;  %7767 = vmatprep.subr.bf16.mxu0 %v8239_v16  ;;  %v195_v59 = vmul.f32 %v193_v51, %v8932_v54  ;;  %6897 = vst.sshfl [vmem:[%s11205_s22 + $0x20] sm:$0x3 pattern:$0x76325410] %v8932_v54  ;;  %v8274_v49 = vld [vmem:[%s11231_s28 + $0x1a0] sm:$0xff]  }
  0x63   :  { %7789 = vmatprep.subr.bf16.mxu1 %v8240_v17  ;;  %v8947_v60 = vadd.f32 %v201_v55, %v194_v58  ;;  %v8273_v51 = vld [vmem:[%s11231_s28 + $0x120] sm:$0xff]   ;;  %v8278_v55 = vld [vmem:[%s11231_s28 + $0x1a8] sm:$0xff]  }
  0x64   :  { %v8949_v61 = vadd.f32 %v202_v56, %v195_v59  ;;  %v8280_v56 = vld [vmem:[%s11231_s28 + $0x1f0] sm:$0xff]   ;;  %v8277_v58 = vld [vmem:[%s11231_s28 + $0x128] sm:$0xff]  }
  0x65   :  { %7768 = vmatpush3.bf16.msra.mxu0 %v8241_v18  ;;  %v207_v62 = vcombine.low %v8947_v60, %v8947_v60  ;;  %6904 = vst.sshfl [vmem:[%s11205_s22 + $0x10] sm:$0x30 pattern:$0x76325410] %v8947_v60  ;;  %v221_v63 = vrot.slane %v8947_v60, %v8935_v57  ;;  %v8258_v18 = vld [vmem:[%s11231_s28 + $0x180] sm:$0xff]   ;;  %v8279_v59 = vld [vmem:[%s11231_s28 + $0x170] sm:$0xff]  }
  0x66   :  { %7790 = vmatpush3.bf16.msra.mxu1 %v8242_v19  ;;  %7769 = vmatprep.subr.bf16.mxu0 %v8243_v20  ;;  %v224_v0 = vcombine.low %v8949_v61, %v8949_v61  ;;  %6906 = vst.sshfl [vmem:[%s11205_s22 + $0x30] sm:$0x30 pattern:$0x76325410] %v8949_v61  ;;  %v238_v1 = vrot.slane %v8949_v61, %v8935_v57  ;;  %v8260_v20 = vld [vmem:[%s11231_s28 + $0x1c8] sm:$0xff]  }
  0x67   :  { %7791 = vmatprep.subr.bf16.mxu1 %v8244_v21  ;;  %v214_v2 = vrot.slane %v207_v62, %v8935_v57  ;;  %6903 = vst.sshfl [vmem:[%s11205_s22] sm:$0x30 pattern:$0x76325410] %v207_v62  ;;  %v223_v3 = vcombine.high %v221_v63, %v221_v63  ;;  %v8282_v62 = vld [vmem:[%s11231_s28 + $0x1b0] sm:$0xff]   ;;  %v8284_v63 = vld [vmem:[%s11231_s28 + $0x1f8] sm:$0xff]  }
  0x68   :  { %v231_v4 = vrot.slane %v224_v0, %v8935_v57  ;;  %6905 = vst.sshfl [vmem:[%s11205_s22 + $0x20] sm:$0x30 pattern:$0x76325410] %v224_v0  ;;  %v240_v5 = vcombine.high %v238_v1, %v238_v1  ;;  %v8281_v0 = vld [vmem:[%s11231_s28 + $0x130] sm:$0xff]   ;;  %v8283_v1 = vld [vmem:[%s11231_s28 + $0x178] sm:$0xff]  }
  0x69   :  { %7770 = vmatpush3.bf16.msra.mxu0 %v8245_v22  ;;  %v222_v6 = vcombine.high %v214_v2, %v214_v2  ;;  %252 = vst [vmem:[%s11205_s22 + $0x18] sm:$0xc] %v223_v3  ;;  %v8257_v22 = vld [vmem:[%s11231_s28 + $0x100] sm:$0xff]   ;;  %v8286_v2 = vld [vmem:[%s11231_s28 + $0x1b8] sm:$0xff]  }
  0x6a   :  { %7792 = vmatpush3.bf16.msra.mxu1 %v8246_v23  ;;  %7771 = vmatprep.subr.bf16.mxu0 %v8247_v24  ;;  %v239_v7 = vcombine.high %v231_v4, %v231_v4  ;;  %256 = vst [vmem:[%s11205_s22 + $0x38] sm:$0xc] %v240_v5  ;;  %v8259_v23 = vld [vmem:[%s11231_s28 + $0x148] sm:$0xff]   ;;  %v8285_v3 = vld [vmem:[%s11231_s28 + $0x138] sm:$0xff]   ;;  %v8287_v4 = vld [vmem:[%s11234_s1] sm:$0xff]   ;;  %v8658_v5 = vmov 0.0  }
  0x6b   :  { %7793 = vmatprep.subr.bf16.mxu1 %v8248_v25  ;;  %250 = vst [vmem:[%s11205_s22 + $0x8] sm:$0xc] %v222_v6  ;;  %v8261_v24 = vld [vmem:[%s11231_s28 + $0x108] sm:$0xff]  }
  0x6c   :  { %254 = vst [vmem:[%s11205_s22 + $0x28] sm:$0xc] %v239_v7  ;;  %v462_v8 = vld [vmem:[%s11205_s22 + $0x10] sm:$0xc]  ;;  %v8262_v25 = vld [vmem:[%s11231_s28 + $0x188] sm:$0xff]  }
  0x6d   :  { %7772 = vmatpush3.bf16.msra.mxu0 %v8249_v26  ;;  %v598_v10 = vpack.c.bf16 %v462_v8, %v462_v8  ;;  %v8263_v26 = vld [vmem:[%s11231_s28 + $0x150] sm:$0xff]   ;;  %v8288_v6 = vld [vmem:[%s11234_s1 + $0x8] sm:$0xff]  }
  0x6e   :  { %7794 = vmatpush3.bf16.msra.mxu1 %v8250_v27  ;;  %7773 = vmatprep.subr.bf16.mxu0 %v8251_v28  ;;  %v460_v9 = vld [vmem:[%s11205_s22] sm:$0xc]  ;;  %v8264_v27 = vld [vmem:[%s11231_s28 + $0x1d0] sm:$0xff]  }
  0x6f   :  { %7795 = vmatprep.subr.bf16.mxu1 %v8252_v29  ;;  %v596_v12 = vpack.c.bf16 %v460_v9, %v460_v9  ;;  %v621_v15 = vrot.slane %v598_v10, 1  ;;  %v8266_v28 = vld [vmem:[%s11231_s28 + $0x190] sm:$0xff]   ;;  %v8268_v29 = vld [vmem:[%s11231_s28 + $0x1d8] sm:$0xff]   ;;  %v464_v34 = vld [vmem:[%s11205_s22 + $0x20] sm:$0xc] }
  0x70   :  { %v463_v11 = vld [vmem:[%s11205_s22 + $0x18] sm:$0xc]  ;;  %v466_v35 = vld [vmem:[%s11205_s22 + $0x30] sm:$0xc]  ;;  %v600_v38 = vpack.c.bf16 %v464_v34, %v464_v34 }
  0x71   :  { %7774 = vmatpush3.bf16.msra.mxu0 %v8253_v30  ;;  %v599_v13 = vpack.c.bf16 %v463_v11, %v463_v11  ;;  %v619_v19 = vrot.slane %v596_v12, 1  ;;  %v467_v33 = vld [vmem:[%s11205_s22 + $0x38] sm:$0xc]  ;;  %v6933_v12 = vld [vmem:[%s11235_s29] ss:$0 sm:$0xff] }
  0x72   :  { %7796 = vmatpush3.bf16.msra.mxu1 %v8254_v31  ;;  %7803 = vmatprep.subr.bf16.mxu0 %v8255_v39  ;;  %v461_v14 = vld [vmem:[%s11205_s22 + $0x8] sm:$0xc]  ;;  %v8265_v31 = vld [vmem:[%s11231_s28 + $0x110] sm:$0xff]   ;;  %v603_v37 = vpack.c.bf16 %v467_v33, %v467_v33  ;;  %v602_v39 = vpack.c.bf16 %v466_v35, %v466_v35  ;;  %v623_v44 = vrot.slane %v600_v38, 1  ;;  %v8289_v35 = vld [vmem:[%s11193_s10] sm:$0xff]  }
  0x73   :  { %7825 = vmatprep.subr.bf16.mxu1 %v8256_v40  ;;  %v597_v16 = vpack.c.bf16 %v461_v14, %v461_v14  ;;  %v622_v17 = vrot.slane %v599_v13, 1  ;;  %v465_v30 = vld [vmem:[%s11205_s22 + $0x28] sm:$0xc]  ;;  %v8270_v40 = vld [vmem:[%s11231_s28 + $0x198] sm:$0xff]  }
  0x74   :  { %v601_v32 = vpack.c.bf16 %v465_v30, %v465_v30  ;;  %v626_v43 = vrot.slane %v603_v37, 1  ;;  %v625_v46 = vrot.slane %v602_v39, 1  ;;  %v6998_v37 = vld [vmem:[%s11236_s26] ss:$0 sm:$0xff] }
  0x75   :  { %v620_v21 = vrot.slane %v597_v16, 1  ;;  %1091 = vmatprep.mubr.bf16.mxu1 %v622_v17 }
  0x76   :  { %1092 = vmatmul.mubr.bf16.vlgmr.msra.gmra.mrb[0].mxu1 %v621_v15  ;;  %v624_v41 = vrot.slane %v601_v32, 1 }
  0x77   :  { %1051 = vmatprep.mubr.bf16.mxu0 %v620_v21  ;;  %7826 = vmatpush3.bf16.msra.mxu1 %v8258_v18 }
  0x78   :  { %1052 = vmatmul.mubr.bf16.vlgmr.msra.gmra.mrb[0].mxu0 %v619_v19  ;;  %7827 = vmatprep.subr.bf16.mxu1 %v8260_v20 }
  0x79   :  { %7804 = vmatpush3.bf16.msra.mxu0 %v8257_v22  ;;  %1131 = vmatprep.mubr.bf16.mxu0 %v624_v41 }
  0x7a   :  { %7805 = vmatprep.subr.bf16.mxu0 %v8259_v23  ;;  %1171 = vmatprep.mubr.bf16.mxu1 %v626_v43 }
  0x7b   :  { %7828 = vmatpush3.bf16.msra.mxu1 %v8262_v25 }
  0x7c   :  { %7829 = vmatprep.subr.bf16.mxu1 %v8264_v27 }
  0x7d   :  { %7806 = vmatpush3.bf16.msra.mxu0 %v8261_v24 }
  0x7e   :  { %7807 = vmatprep.subr.bf16.mxu0 %v8263_v26 }
  0x7f   :  { %7830 = vmatpush3.bf16.msra.mxu1 %v8266_v28 }
  0x80   :  { %7831 = vmatprep.subr.bf16.mxu1 %v8268_v29 }
  0x81   :  { %7808 = vmatpush3.bf16.msra.mxu0 %v8265_v31 }
  0x82   :  { %7809 = vmatprep.subr.bf16.mxu0 %v8267_v36  ;;  %v8290_v36 = vld [vmem:[%s11193_s10 + $0x8] sm:$0xff]  }
  0x83   :  { %7832 = vmatpush3.bf16.msra.mxu1 %v8270_v40 }
  0x84   :  { %7833 = vmatprep.subr.bf16.mxu1 %v8272_v42 }
  0x85   :  { %7810 = vmatpush3.bf16.msra.mxu0 %v8269_v47  ;;  %v1320_v47 = vld [vmem:[%s11195_s12] sm:$0xff] }
  0x86   :  { %7811 = vmatprep.subr.bf16.mxu0 %v8271_v48  ;;  %v1328_v48 = vld [vmem:[%s11195_s12 + $0x40] sm:$0xff] }
  0x87   :  { %7834 = vmatpush3.bf16.msra.mxu1 %v8274_v49  ;;  %v1321_v49 = vld [vmem:[%s11195_s12 + $0x8] sm:$0xff] }
  0x88   :  { %7835 = vmatprep.subr.bf16.mxu1 %v8276_v50  ;;  %v7007_v50 = vcombine.high %v1320_v47, %v1328_v48 }
  0x89   :  { %7812 = vmatpush3.bf16.msra.mxu0 %v8273_v51  ;;  %v1329_v51 = vld [vmem:[%s11195_s12 + $0x48] sm:$0xff] }
  0x8a   :  { %7813 = vmatprep.subr.bf16.mxu0 %v8275_v52  ;;  %v7006_v52 = vcombine.low %v1320_v47, %v1328_v48  ;;  %v1324_v48 = vld [vmem:[%s11195_s12 + $0x20] sm:$0xff] }
  0x8b   :  { %7836 = vmatpush3.bf16.msra.mxu1 %v8278_v55  ;;  %v7008_v55 = vcombine.low %v1321_v49, %v1329_v51 }
  0x8c   :  { %7837 = vmatprep.subr.bf16.mxu1 %v8280_v56  ;;  %v7009_v56 = vcombine.high %v1321_v49, %v1329_v51  ;;  %v1332_v49 = vld [vmem:[%s11195_s12 + $0x60] sm:$0xff]  ;;  %v1333_v51 = vld [vmem:[%s11195_s12 + $0x68] sm:$0xff] }
  0x8d   :  { %7814 = vmatpush3.bf16.msra.mxu0 %v8277_v58  ;;  %v1336_v58 = vld [vmem:[%s11195_s12 + $0x80] sm:$0xff] }
  0x8e   :  { %7815 = vmatprep.subr.bf16.mxu0 %v8279_v59  ;;  %v1344_v59 = vld [vmem:[%s11195_s12 + $0xc0] sm:$0xff] }
  0x8f   :  { %7838 = vmatpush3.bf16.msra.mxu1 %v8282_v62  ;;  %v1337_v62 = vld [vmem:[%s11195_s12 + $0x88] sm:$0xff] }
  0x90   :  { %7839 = vmatprep.subr.bf16.mxu1 %v8284_v63  ;;  %v7023_v63 = vcombine.high %v1336_v58, %v1344_v59 }
  0x91   :  { %7816 = vmatpush3.bf16.msra.mxu0 %v8281_v0  ;;  %v1345_v0 = vld [vmem:[%s11195_s12 + $0xc8] sm:$0xff] }
  0x92   :  { %7817 = vmatprep.subr.bf16.mxu0 %v8283_v1  ;;  %v7022_v1 = vcombine.low %v1336_v58, %v1344_v59  ;;  %v1340_v59 = vld [vmem:[%s11195_s12 + $0xa0] sm:$0xff] }
  0x93   :  { %7840 = vmatpush3.bf16.msra.mxu1 %v8286_v2  ;;  %v7024_v2 = vcombine.low %v1337_v62, %v1345_v0 }
  0x94   :  { %8147 = vmatprep.subr.bf16.mxu1 %v8658_v5 }
  0x95   :  { %7818 = vmatpush3.bf16.msra.mxu0 %v8285_v3  ;;  %v7025_v3 = vcombine.high %v1337_v62, %v1345_v0  ;;  %v1348_v62 = vld [vmem:[%s11195_s12 + $0xe0] sm:$0xff]  ;;  %v1349_v0 = vld [vmem:[%s11195_s12 + $0xe8] sm:$0xff] }
  0x96   :  { %1172 = vmatmul.mubr.bf16.vlgmr.msra.gmra.mrb[4].mxu1 %v625_v46  ;;  %8139 = vmatprep.subr.bf16.mxu0 %v8658_v5 }
  0x97   :  { %8151 = vmatprep.mubr.msk.bf16.mxu1 %vm8659_vm0, %v8658_v5  ;;  %8148 = vmatpush3.bf16.msra.mxu1 %v8289_v35 }
  0x98   :  { %1132 = vmatmul.mubr.bf16.vlgmr.msra.gmra.mrb[4].mxu0 %v623_v44  ;;  %8149 = vmatprep.subr.bf16.mxu1 %v8658_v5 }
  0x99   :  { %8140 = vmatpush3.bf16.msra.mxu0 %v8287_v4  ;;  %8143 = vmatprep.mubr.msk.bf16.mxu0 %vm8659_vm0, %v8658_v5  ;;  %v9156_v4 = vld [vmem:[%s11195_s12 + $0x10] sm:$0xff] }
  0x9a   :  { %8141 = vmatprep.subr.bf16.mxu0 %v8658_v5 }
  0x9b   :  { %8150 = vmatpush3.bf16.msra.mxu1 %v8290_v36 }
  0x9c   :  { %1641 = vmatprep.subr.bf16.mxu1 %v7009_v56  ;;  %v7015_v56 = vcombine.high %v1324_v48, %v1332_v49 }
  0x9d   :  { %8142 = vmatpush3.bf16.msra.mxu0 %v8288_v6  ;;  %v9161_v6 = vld [vmem:[%s11195_s12 + $0x50] sm:$0xff] }
  0x9e   :  { %1600 = vmatprep.subr.bf16.mxu0 %v7007_v50  ;;  %v1325_v50 = vld [vmem:[%s11195_s12 + $0x28] sm:$0xff] }
  0x9f   :  { %v7017_v58 = vcombine.high %v1325_v50, %v1333_v51 }
 0x149   :  { %v7797_v7 = vpop.f32.mrb[0].mxu1 }
 0x14a   :  { %v7798_v8 = vpop.f32.mrb[1].mxu1 }
 0x14b   :  { %v7775_v9 = vpop.f32.mrb[0].mxu0  ;;  %v7799_v10 = vadd.f32 %v7798_v8, %v7797_v7  ;;  %v7800_v11 = vpop.f32.mrb[2].mxu1  ;;  %v9166_v7 = vld [vmem:[%s11195_s12 + $0x18] sm:$0xff]  ;;  %v7011_v8 = vcombine.high %v9156_v4, %v9161_v6 }
 0x14c   :  { %v7776_v13 = vpop.f32.mrb[1].mxu0  ;;  %v7801_v14 = vpop.f32.mrb[3].mxu1 }
 0x14d   :  { %v7777_v15 = vadd.f32 %v7776_v13, %v7775_v9  ;;  %v7778_v16 = vpop.f32.mrb[2].mxu0  ;;  %v1331_v9 = vld [vmem:[%s11195_s12 + $0x58] sm:$0xff]  ;;  %v8660_v13 = vmov 0   ;;  %v258_v14 = vstv %s6907_s25  ;;  %s6915_s25 = sld [smem:[#allocation2 + $0x3]] }
 0x14e   :  { %v7779_v17 = vpop.f32.mrb[3].mxu0  ;;  %v7012_v11 = vcombine.low %v9166_v7, %v1331_v9  ;;  %v265_v16 = vstv %s6908_s7  ;;  %s6916_s7 = sld [smem:[#allocation6 + $0x3]] }
 0x14f   :  { %v1054_v18 = vadd.f32 %v7777_v15, %v6933_v12  ;;  %v7013_v12 = vcombine.high %v9166_v7, %v1331_v9  ;;  %v6909_v15 = vld [vmem:[%s11233_s0 + $0x20] sm:$0xff]  ;;  %v259_v17 = vmul.f32 %v258_v14, %v8947_v60  ;;  %v1334_v7 = vld [vmem:[%s11195_s12 + $0x70] sm:$0xff]  ;;  %v1335_v9 = vld [vmem:[%s11195_s12 + $0x78] sm:$0xff] }
 0x151   :  { %v1094_v19 = vadd.f32 %v7799_v10, %v1054_v18  ;;  %v7010_v10 = vcombine.low %v9156_v4, %v9161_v6  ;;  %v266_v18 = vmul.f32 %v6909_v15, %v265_v16  ;;  %v1326_v6 = vld [vmem:[%s11195_s12 + $0x30] sm:$0xff] }
 0x152   :  { %v1342_v15 = vld [vmem:[%s11195_s12 + $0xb0] sm:$0xff] }
 0x169   :  { %v7841_v20 = vpop.f32.mrb[4].mxu1 }
 0x16a   :  { %v7842_v21 = vpop.f32.mrb[5].mxu1 }
 0x16b   :  { %v7819_v22 = vpop.f32.mrb[4].mxu0  ;;  %v7843_v23 = vadd.f32 %v7842_v21, %v7841_v20  ;;  %v7844_v24 = vpop.f32.mrb[6].mxu1 }
 0x16c   :  { %v7820_v25 = vpop.f32.mrb[5].mxu0  ;;  %v7845_v26 = vpop.f32.mrb[7].mxu1  ;;  %v6910_v24 = vld [vmem:[%s11233_s0 + $0x28] sm:$0xff] }
 0x16d   :  { %v7821_v27 = vadd.f32 %v7820_v25, %v7819_v22  ;;  %v7822_v28 = vpop.f32.mrb[6].mxu0  ;;  %v260_v25 = vmul.f32 %v258_v14, %v8949_v61  ;;  %v267_v26 = vmul.f32 %v6910_v24, %v265_v16  ;;  %v1350_v16 = vld [vmem:[%s11195_s12 + $0xf0] sm:$0xff] }
 0x16e   :  { %v7823_v29 = vpop.f32.mrb[7].mxu0 }
 0x16f   :  { %v1134_v30 = vadd.f32 %v7821_v27, %v1094_v19  ;;  %v9183_v19 = vadd.f32 %v266_v18, %v259_v17  ;;  %v9207_v27 = vadd.f32 %v267_v26, %v260_v25  ;;  %v1343_v17 = vld [vmem:[%s11195_s12 + $0xb8] sm:$0xff]  ;;  %v7034_v25 = vcombine.low %v1342_v15, %v1350_v16 }
 0x170   :  { %v1351_v18 = vld [vmem:[%s11195_s12 + $0xf8] sm:$0xff] }
 0x171   :  { %v1174_v31 = vadd.f32 %v7843_v23, %v1134_v30  ;;  %6911 = vst.sshfl [vmem:[%s11205_s22 + $0x8] sm:$0xc pattern:$0x76325410] %v9183_v19  ;;  %v272_v20 = vcombine.high %v9183_v19, %v9183_v19  ;;  %v279_v60 = vrot.slane %v9183_v19, %v8935_v57  ;;  %v289_v28 = vcombine.high %v9207_v27, %v9207_v27 }
 0x172   :  { %6913 = vst.sshfl [vmem:[%s11205_s22 + $0x28] sm:$0xc pattern:$0x76325410] %v9207_v27  ;;  %v296_v61 = vrot.slane %v9207_v27, %v8935_v57  ;;  %v7036_v26 = vcombine.low %v1343_v17, %v1351_v18 }
 0x173   :  { %v1179_v32 = vmul.f32 0.01, %v1174_v31  ;;  %v286_v21 = vrot.slane %v272_v20, %v8935_v57  ;;  %6912 = vst.sshfl [vmem:[%s11205_s22 + $0x18] sm:$0xc pattern:$0x76325410] %v272_v20  ;;  %v287_v22 = vcombine.low %v279_v60, %v279_v60  ;;  %v303_v29 = vrot.slane %v289_v28, %v8935_v57 }
 0x174   :  { %6914 = vst.sshfl [vmem:[%s11205_s22 + $0x38] sm:$0xc pattern:$0x76325410] %v289_v28  ;;  %v304_v30 = vcombine.low %v296_v61, %v296_v61  ;;  %v7018_v20 = vcombine.low %v1326_v6, %v1334_v7  ;;  %v7035_v60 = vcombine.high %v1342_v15, %v1350_v16  ;;  %v8291_v28 = vld [vmem:[%s11231_s28 + $0x240] sm:$0xff]  }
 0x175   :  { %v1180_v33 = vmax.f32 %v1174_v31, %v1179_v32  ;;  %v288_v23 = vcombine.low %v286_v21, %v286_v21  ;;  %314 = vst [vmem:[%s11205_s22] sm:$0x30] %v287_v22  ;;  %v305_v31 = vcombine.low %v303_v29, %v303_v29  ;;  %v7002_v32 = vld [vmem:[%s11194_s11] ss:$0 sm:$0xff]  ;;  %v7037_v22 = vcombine.high %v1343_v17, %v1351_v18 }
 0x176   :  { %318 = vst [vmem:[%s11205_s22 + $0x20] sm:$0x30] %v304_v30  ;;  %v8292_v29 = vld [vmem:[%s11231_s28 + $0x2c0] sm:$0xff]  }
 0x177   :  { %v1185_v34 = vpack.c.bf16 %v1180_v33, %v1180_v33  ;;  %316 = vst [vmem:[%s11205_s22 + $0x10] sm:$0x30] %v288_v23  ;;  %320 = vst [vmem:[%s11205_s22 + $0x30] sm:$0x30] %v305_v31  ;;  %v8293_v31 = vld [vmem:[%s11231_s28 + $0x200] sm:$0xff]  }
 0x178   :  { %v2069_v23 = vld [vmem:[%s11205_s22 + $0x8] sm:$0x30] }
 0x179   :  { %8144 = vmatmul.mubr.msk.bf16.vlgmr.msra.gmra.mrb[8].mxu0 %vm1205_vm1, %v1185_v34  ;;  %v2206_v61 = vpack.c.bf16 %v2069_v23, %v2069_v23 }
 0x17a   :  { %1601 = vmatpush1.bf16.msra.mxu0 %v7006_v52  ;;  %1632 = vmatprep.mubr.bf16.mxu0 %v8660_v13  ;;  %v2071_v24 = vld [vmem:[%s11205_s22 + $0x18] sm:$0x30] }
 0x17b   :  { %1602 = vmatprep.subr.bf16.mxu0 %v7023_v63  ;;  %v1341_v63 = vld [vmem:[%s11195_s12 + $0xa8] sm:$0xff]  ;;  %v2208_v30 = vpack.c.bf16 %v2071_v24, %v2071_v24 }
 0x17c   :  { %v7033_v4 = vcombine.high %v1341_v63, %v1349_v0 }
 0x17e   :  { %1603 = vmatpush1.bf16.msra.mxu0 %v7022_v1  ;;  %v7014_v1 = vcombine.low %v1324_v48, %v1332_v49  ;;  %v8307_v48 = vld [vmem:[%s11231_s28 + $0x260] sm:$0xff]  }
 0x17f   :  { %1682 = vmatprep.subr.bf16.mxu0 %v7011_v8  ;;  %v1327_v8 = vld [vmem:[%s11195_s12 + $0x38] sm:$0xff]  ;;  %v8308_v49 = vld [vmem:[%s11231_s28 + $0x2e0] sm:$0xff]  }
 0x180   :  { %v7021_v14 = vcombine.high %v1327_v8, %v1335_v9  ;;  %v7020_v21 = vcombine.low %v1327_v8, %v1335_v9  ;;  %v2073_v8 = vld [vmem:[%s11205_s22 + $0x28] sm:$0x30]  ;;  %v2075_v9 = vld [vmem:[%s11205_s22 + $0x38] sm:$0x30] }
 0x181   :  { %v2210_v15 = vpack.c.bf16 %v2073_v8, %v2073_v8  ;;  %v2212_v16 = vpack.c.bf16 %v2075_v9, %v2075_v9  ;;  %v6917_v9 = vld [vmem:[%s11233_s0 + $0x30] sm:$0xff] }
 0x183   :  { %v2234_v23 = vrot.slane %v2210_v15, 2  ;;  %v2236_v24 = vrot.slane %v2212_v16, 2  ;;  %v6918_v16 = vld [vmem:[%s11233_s0 + $0x38] sm:$0xff]  ;;  %s1961_s0 = smul.f32 0.5, %s9691_s27 }
 0x24c   :  { %v1243_v38 = vpop.f32.mrb[8].mxu0 }
 0x24d   :  { %v1244_v39 = vadd.f32 %v6998_v37, %v1243_v38  ;;  %v8145_v40 = vpop.f32.mrb[9].mxu0 }
 0x24e   :  { %v1246_v41 = vpop.f32.mrb[10].mxu0  ;;  %v1346_v40 = vld [vmem:[%s11195_s12 + $0xd0] sm:$0xff] }
 0x24f   :  { %v1249_v42 = vmul.f32 0.01, %v1244_v39  ;;  %v8146_v43 = vpop.f32.mrb[11].mxu0  ;;  %v1339_v41 = vld [vmem:[%s11195_s12 + $0x98] sm:$0xff] }
 0x251   :  { %v1250_v44 = vmax.f32 %v1244_v39, %v1249_v42  ;;  %v1338_v39 = vld [vmem:[%s11195_s12 + $0x90] sm:$0xff]  ;;  %v1347_v42 = vld [vmem:[%s11195_s12 + $0xd8] sm:$0xff] }
 0x252   :  { %v7029_v47 = vcombine.high %v1339_v41, %v1347_v42  ;;  %v7026_v52 = vcombine.low %v1338_v39, %v1346_v40 }
 0x253   :  { %v1255_v46 = vpack.c.bf16 %v1250_v44, %v1250_v44 }
 0x255   :  { %8152 = vmatmul.mubr.msk.bf16.vlgmr.msra.gmra.mrb[8].mxu1 %vm1205_vm1, %v1255_v46  ;;  %v7027_v46 = vcombine.high %v1338_v39, %v1346_v40  ;;  %v8299_v39 = vld [vmem:[%s11231_s28 + $0x250] sm:$0xff]  }
 0x256   :  { %1642 = vmatpush1.bf16.msra.mxu1 %v7008_v55  ;;  %1673 = vmatprep.mubr.bf16.mxu1 %v8660_v13  ;;  %v7028_v55 = vcombine.low %v1339_v41, %v1347_v42  ;;  %v8300_v40 = vld [vmem:[%s11231_s28 + $0x2d0] sm:$0xff]  }
 0x257   :  { %1643 = vmatprep.subr.bf16.mxu1 %v7025_v3  ;;  %v7031_v3 = vcombine.high %v1340_v59, %v1348_v62  ;;  %v8301_v41 = vld [vmem:[%s11231_s28 + $0x210] sm:$0xff]  }
 0x258   :  { %v8302_v42 = vld [vmem:[%s11231_s28 + $0x290] sm:$0xff]  }
 0x25a   :  { %1644 = vmatpush1.bf16.msra.mxu1 %v7024_v2  ;;  %v7016_v2 = vcombine.low %v1325_v50, %v1333_v51  ;;  %v8309_v50 = vld [vmem:[%s11231_s28 + $0x220] sm:$0xff]  }
 0x25b   :  { %1723 = vmatprep.subr.bf16.mxu1 %v7013_v12  ;;  %v7019_v12 = vcombine.high %v1326_v6, %v1334_v7  ;;  %v8310_v51 = vld [vmem:[%s11231_s28 + $0x2a0] sm:$0xff]  }
 0x328   :  { %v1312_v33 = vpop.f32.mrb[8].mxu1 }
 0x329   :  { %v1313_v34 = vadd.f32 %v7002_v32, %v1312_v33  ;;  %v8153_v35 = vpop.f32.mrb[9].mxu1  ;;  %v8294_v32 = vld [vmem:[%s11231_s28 + $0x280] sm:$0xff]   ;;  %v8295_v33 = vld [vmem:[%s11231_s28 + $0x248] sm:$0xff]  }
 0x32a   :  { %v1315_v36 = vpop.f32.mrb[10].mxu1  ;;  %v2230_v35 = vrot.slane %v2206_v61, 2  ;;  %v8333_v61 = vld [vmem:[%s11231_s28 + $0x310] sm:$0xff]  }
 0x32b   :  { %v1318_v37 = vmul.f32 0.01, %v1313_v34  ;;  %v8154_v38 = vpop.f32.mrb[11].mxu1  ;;  %v2232_v36 = vrot.slane %v2208_v30, 2  ;;  %v8334_v30 = vld [vmem:[%s11231_s28 + $0x390] sm:$0xff]  }
 0x32c   :  { %v8298_v38 = vld [vmem:[%s11231_s28 + $0x288] sm:$0xff]  }
 0x32d   :  { %v1319_v43 = vmax.f32 %v1313_v34, %v1318_v37  ;;  %v8296_v34 = vld [vmem:[%s11231_s28 + $0x2c8] sm:$0xff]  }
 0x32e   :  { %v8297_v37 = vld [vmem:[%s11231_s28 + $0x208] sm:$0xff]  }
 0x32f   :  { %v9242_v44 = vpack.c.bf16 %v1319_v43, %v1319_v43  ;;  %v8303_v43 = vld [vmem:[%s11231_s28 + $0x258] sm:$0xff]  }
 0x331   :  { %7038 = vmatmul.mubr.msk.bf16.vlgmr.msra.gmra.mrb[12].mxu0 %vm1205_vm1, %v9242_v44  ;;  %7039 = vmatmul.mubr.msk.bf16.vlgmr.msra.gmra.mrb[12].mxu1 %vm1205_vm1, %v9242_v44 }
 0x332   :  { %1683 = vmatpush1.bf16.msra.mxu0 %v7010_v10  ;;  %1724 = vmatpush1.bf16.msra.mxu1 %v7012_v11  ;;  %v7030_v10 = vcombine.low %v1340_v59, %v1348_v62  ;;  %v7032_v11 = vcombine.low %v1341_v63, %v1349_v0  ;;  %v8315_v59 = vld [vmem:[%s11231_s28 + $0x270] sm:$0xff]  }
 0x333   :  { %1684 = vmatprep.subr.bf16.mxu0 %v7027_v46  ;;  %1725 = vmatprep.subr.bf16.mxu1 %v7029_v47  ;;  %v8305_v46 = vld [vmem:[%s11231_s28 + $0x218] sm:$0xff]   ;;  %v8316_v62 = vld [vmem:[%s11231_s28 + $0x2f0] sm:$0xff]  }
 0x334   :  { %1714 = vmatprep.mubr.bf16.mxu0 %v8660_v13  ;;  %1755 = vmatprep.mubr.bf16.mxu1 %v8660_v13  ;;  %v8306_v47 = vld [vmem:[%s11231_s28 + $0x298] sm:$0xff]   ;;  %v8317_v63 = vld [vmem:[%s11231_s28 + $0x230] sm:$0xff]  }
 0x335   :  { %v8318_v0 = vld [vmem:[%s11231_s28 + $0x2b0] sm:$0xff]  }
 0x336   :  { %1685 = vmatpush1.bf16.msra.mxu0 %v7026_v52  ;;  %1726 = vmatpush1.bf16.msra.mxu1 %v7028_v55  ;;  %v8311_v52 = vld [vmem:[%s11231_s28 + $0x268] sm:$0xff]  }
 0x337   :  { %1764 = vmatprep.subr.bf16.mxu0 %v7015_v56  ;;  %1805 = vmatprep.subr.bf16.mxu1 %v7017_v58  ;;  %v8312_v55 = vld [vmem:[%s11231_s28 + $0x2e8] sm:$0xff]  }
 0x338   :  { %v8313_v56 = vld [vmem:[%s11231_s28 + $0x228] sm:$0xff]  }
 0x339   :  { %7040 = vmatmul.mubr.msk.bf16.vlgmr.msra.gmra.mrb[16].mxu0 %vm1205_vm1, %v9242_v44  ;;  %7041 = vmatmul.mubr.msk.bf16.vlgmr.msra.gmra.mrb[16].mxu1 %vm1205_vm1, %v9242_v44  ;;  %v8314_v58 = vld [vmem:[%s11231_s28 + $0x2a8] sm:$0xff]  }
 0x33a   :  { %1765 = vmatpush1.bf16.msra.mxu0 %v7014_v1  ;;  %1806 = vmatpush1.bf16.msra.mxu1 %v7016_v2  ;;  %v2068_v1 = vld [vmem:[%s11205_s22] sm:$0x30]  ;;  %v2070_v2 = vld [vmem:[%s11205_s22 + $0x10] sm:$0x30] }
 0x33b   :  { %1766 = vmatprep.subr.bf16.mxu0 %v7031_v3  ;;  %1807 = vmatprep.subr.bf16.mxu1 %v7033_v4  ;;  %v8319_v3 = vld [vmem:[%s11231_s28 + $0x278] sm:$0xff]   ;;  %v2205_v6 = vpack.c.bf16 %v2068_v1, %v2068_v1  ;;  %v2207_v7 = vpack.c.bf16 %v2070_v2, %v2070_v2  ;;  %v159_v1 = vcombine.high %v8932_v54, %v8932_v54 }
 0x33c   :  { %1796 = vmatprep.mubr.bf16.mxu0 %v8660_v13  ;;  %1837 = vmatprep.mubr.bf16.mxu1 %v8660_v13  ;;  %v8320_v4 = vld [vmem:[%s11231_s28 + $0x2f8] sm:$0xff]  }
 0x33d   :  { %v2229_v17 = vrot.slane %v2205_v6, 2  ;;  %v2231_v18 = vrot.slane %v2207_v7, 2  ;;  %6898 = vst.sshfl [vmem:[%s11205_s22 + $0x30] sm:$0x3 pattern:$0x76325410] %v159_v1  ;;  %v173_v6 = vrot.slane %v159_v1, %v8935_v57 }
 0x33e   :  { %1767 = vmatpush1.bf16.msra.mxu0 %v7030_v10  ;;  %1808 = vmatpush1.bf16.msra.mxu1 %v7032_v11  ;;  %v8321_v10 = vld [vmem:[%s11231_s28 + $0x238] sm:$0xff]  }
 0x33f   :  { %1846 = vmatprep.subr.bf16.mxu0 %v7019_v12  ;;  %1887 = vmatprep.subr.bf16.mxu1 %v7021_v14  ;;  %v8322_v11 = vld [vmem:[%s11231_s28 + $0x2b8] sm:$0xff]   ;;  %v8323_v12 = vld [vmem:[%s11231_s28 + $0x340] sm:$0xff]   ;;  %v175_v8 = vcombine.high %v173_v6, %v173_v6 }
 0x340   :  { %v8324_v14 = vld [vmem:[%s11231_s28 + $0x3c0] sm:$0xff]  }
 0x341   :  { %7042 = vmatmul.mubr.msk.bf16.vlgmr.msra.gmra.mrb[20].mxu0 %vm1205_vm1, %v9242_v44  ;;  %7043 = vmatmul.mubr.msk.bf16.vlgmr.msra.gmra.mrb[20].mxu1 %vm1205_vm1, %v9242_v44  ;;  %191 = vst [vmem:[%s11205_s22 + $0x38] sm:$0x3] %v175_v8 }
 0x342   :  { %1847 = vmatpush1.bf16.msra.mxu0 %v7018_v20  ;;  %1888 = vmatpush1.bf16.msra.mxu1 %v7020_v21  ;;  %v8325_v20 = vld [vmem:[%s11231_s28 + $0x300] sm:$0xff]  }
 0x343   :  { %1848 = vmatprep.subr.bf16.mxu0 %v7035_v60  ;;  %1889 = vmatprep.subr.bf16.mxu1 %v7037_v22  ;;  %v8326_v21 = vld [vmem:[%s11231_s28 + $0x380] sm:$0xff]   ;;  %v8327_v60 = vld [vmem:[%s11231_s28 + $0x348] sm:$0xff]  }
 0x344   :  { %1878 = vmatprep.mubr.bf16.mxu0 %v8660_v13  ;;  %1919 = vmatprep.mubr.bf16.mxu1 %v8660_v13  ;;  %v8328_v22 = vld [vmem:[%s11231_s28 + $0x3c8] sm:$0xff]  }
 0x346   :  { %1849 = vmatpush1.bf16.msra.mxu0 %v7034_v25  ;;  %1890 = vmatpush1.bf16.msra.mxu1 %v7036_v26  ;;  %v8329_v25 = vld [vmem:[%s11231_s28 + $0x308] sm:$0xff]  }
 0x347   :  { %7853 = vmatprep.subr.bf16.mxu0 %v8291_v28  ;;  %7875 = vmatprep.subr.bf16.mxu1 %v8292_v29  ;;  %v8330_v26 = vld [vmem:[%s11231_s28 + $0x388] sm:$0xff]   ;;  %v8331_v28 = vld [vmem:[%s11231_s28 + $0x350] sm:$0xff]  }
 0x348   :  { %v8332_v29 = vld [vmem:[%s11231_s28 + $0x3d0] sm:$0xff]  }
 0x349   :  { %7044 = vmatmul.mubr.msk.bf16.vlgmr.msra.gmra.mrb[24].mxu0 %vm1205_vm1, %v9242_v44  ;;  %7045 = vmatmul.mubr.msk.bf16.vlgmr.msra.gmra.mrb[24].mxu1 %vm1205_vm1, %v9242_v44  ;;  %v8304_v44 = vld [vmem:[%s11231_s28 + $0x2d8] sm:$0xff]  }
 0x34a   :  { %7854 = vmatpush3.bf16.msra.mxu0 %v8293_v31  ;;  %7876 = vmatpush3.bf16.msra.mxu1 %v8294_v32  ;;  %v8335_v31 = vld [vmem:[%s11231_s28 + $0x358] sm:$0xff]  }
 0x34b   :  { %7855 = vmatprep.subr.bf16.mxu0 %v8295_v33  ;;  %7877 = vmatprep.subr.bf16.mxu1 %v8296_v34  ;;  %v8336_v32 = vld [vmem:[%s11231_s28 + $0x3d8] sm:$0xff]  }
 0x34c   :  { %2661 = vmatprep.mubr.bf16.mxu0 %v2230_v35  ;;  %2701 = vmatprep.mubr.bf16.mxu1 %v2232_v36  ;;  %v8337_v33 = vld [vmem:[%s11231_s28 + $0x318] sm:$0xff]   ;;  %v8339_v35 = vld [vmem:[%s11231_s28 + $0x360] sm:$0xff]  }
 0x34d   :  { %v8338_v34 = vld [vmem:[%s11231_s28 + $0x398] sm:$0xff]   ;;  %v8340_v36 = vld [vmem:[%s11231_s28 + $0x3e0] sm:$0xff]  }
 0x34e   :  { %7856 = vmatpush3.bf16.msra.mxu0 %v8297_v37  ;;  %7878 = vmatpush3.bf16.msra.mxu1 %v8298_v38  ;;  %v8341_v37 = vld [vmem:[%s11231_s28 + $0x320] sm:$0xff]  }
 0x34f   :  { %7857 = vmatprep.subr.bf16.mxu0 %v8299_v39  ;;  %7879 = vmatprep.subr.bf16.mxu1 %v8300_v40  ;;  %v8342_v38 = vld [vmem:[%s11231_s28 + $0x3a0] sm:$0xff]   ;;  %v8343_v39 = vld [vmem:[%s11231_s28 + $0x368] sm:$0xff]  }
 0x350   :  { %v8344_v40 = vld [vmem:[%s11231_s28 + $0x3e8] sm:$0xff]  }
 0x352   :  { %7858 = vmatpush3.bf16.msra.mxu0 %v8301_v41  ;;  %7880 = vmatpush3.bf16.msra.mxu1 %v8302_v42  ;;  %v8345_v41 = vld [vmem:[%s11231_s28 + $0x328] sm:$0xff]  }
 0x353   :  { %7859 = vmatprep.subr.bf16.mxu0 %v8303_v43  ;;  %7881 = vmatprep.subr.bf16.mxu1 %v8304_v44  ;;  %v8346_v42 = vld [vmem:[%s11231_s28 + $0x3a8] sm:$0xff]   ;;  %v8347_v43 = vld [vmem:[%s11231_s28 + $0x370] sm:$0xff]  }
 0x354   :  { %v8348_v44 = vld [vmem:[%s11231_s28 + $0x3f0] sm:$0xff]  }
 0x356   :  { %7860 = vmatpush3.bf16.msra.mxu0 %v8305_v46  ;;  %7882 = vmatpush3.bf16.msra.mxu1 %v8306_v47  ;;  %v142_v46 = vcombine.high %v8930_v53, %v8930_v53  ;;  %v8349_v47 = vld [vmem:[%s11231_s28 + $0x330] sm:$0xff]  }
 0x357   :  { %7861 = vmatprep.subr.bf16.mxu0 %v8307_v48  ;;  %7883 = vmatprep.subr.bf16.mxu1 %v8308_v49  ;;  %v149_v48 = vrot.slane %v8930_v53, %v8935_v57  ;;  %v8351_v53 = vld [vmem:[%s11231_s28 + $0x378] sm:$0xff]  }
 0x358   :  { %6896 = vst.sshfl [vmem:[%s11205_s22 + $0x10] sm:$0x3 pattern:$0x76325410] %v142_v46  ;;  %v156_v49 = vrot.slane %v142_v46, %v8935_v57 }
 0x35a   :  { %7862 = vmatpush3.bf16.msra.mxu0 %v8309_v50  ;;  %7884 = vmatpush3.bf16.msra.mxu1 %v8310_v51  ;;  %v8350_v50 = vld [vmem:[%s11231_s28 + $0x3b0] sm:$0xff]   ;;  %v2072_v51 = vld [vmem:[%s11205_s22 + $0x20] sm:$0x30] }
 0x35b   :  { %7863 = vmatprep.subr.bf16.mxu0 %v8311_v52  ;;  %7885 = vmatprep.subr.bf16.mxu1 %v8312_v55  ;;  %v2074_v52 = vld [vmem:[%s11205_s22 + $0x30] sm:$0x30]  ;;  %v8352_v55 = vld [vmem:[%s11231_s28 + $0x3f8] sm:$0xff]  }
 0x35e   :  { %7864 = vmatpush3.bf16.msra.mxu0 %v8313_v56  ;;  %7886 = vmatpush3.bf16.msra.mxu1 %v8314_v58  ;;  %v157_v56 = vcombine.high %v149_v48, %v149_v48  ;;  %v158_v58 = vcombine.high %v156_v49, %v156_v49 }
 0x35f   :  { %7865 = vmatprep.subr.bf16.mxu0 %v8315_v59  ;;  %7887 = vmatprep.subr.bf16.mxu1 %v8316_v62  ;;  %v2209_v59 = vpack.c.bf16 %v2072_v51, %v2072_v51  ;;  %v2211_v62 = vpack.c.bf16 %v2074_v52, %v2074_v52  ;;  %v9651_v51 = vsub.s32 4, %v8924_v45 }
 0x360   :  { %185 = vst [vmem:[%s11205_s22 + $0x8] sm:$0x3] %v157_v56  ;;  %187 = vst [vmem:[%s11205_s22 + $0x18] sm:$0x3] %v158_v58  ;;  %v9659_v58 = vsub.s32 6, %v8924_v45 }
 0x361   :  { %v2233_v2 = vrot.slane %v2209_v59, 2  ;;  %v9662_v59 = vsub.s32 5, %v8924_v45 }
 0x362   :  { %7866 = vmatpush3.bf16.msra.mxu0 %v8317_v63  ;;  %7888 = vmatpush3.bf16.msra.mxu1 %v8318_v0  ;;  %v8353_v63 = vld [vmem:[%s11231_s28 + $0x338] sm:$0xff]  }
 0x363   :  { %7867 = vmatprep.subr.bf16.mxu0 %v8319_v3  ;;  %7889 = vmatprep.subr.bf16.mxu1 %v8320_v4  ;;  %v8354_v0 = vld [vmem:[%s11231_s28 + $0x3b8] sm:$0xff]   ;;  %v2235_v3 = vrot.slane %v2211_v62, 2  ;;  %v166_v4 = vrot.slane %v8932_v54, %v8935_v57  ;;  %v323_v54 = vstv %s6915_s25  ;;  %s10911_s25 = sld [smem:[#allocation9 + $0x2]] }
 0x365   :  { %v174_v7 = vcombine.high %v166_v4, %v166_v4 }
 0x366   :  { %7868 = vmatpush3.bf16.msra.mxu0 %v8321_v10  ;;  %7890 = vmatpush3.bf16.msra.mxu1 %v8322_v11  ;;  %v330_v10 = vstv %s6916_s7  ;;  %v324_v11 = vmul.f32 %v323_v54, %v9183_v19 }
 0x367   :  { %7897 = vmatprep.subr.bf16.mxu0 %v8323_v12  ;;  %7919 = vmatprep.subr.bf16.mxu1 %v8324_v14  ;;  %189 = vst [vmem:[%s11205_s22 + $0x28] sm:$0x3] %v174_v7  ;;  %v331_v12 = vmul.f32 %v6917_v9, %v330_v10 }
 0x369   :  { %2662 = vmatmul.mubr.bf16.vlgmr.msra.gmra.mrb[28].mxu0 %v2229_v17  ;;  %2702 = vmatmul.mubr.bf16.vlgmr.msra.gmra.mrb[28].mxu1 %v2231_v18  ;;  %v333_v14 = vadd.f32 %v331_v12, %v324_v11  ;;  %v325_v17 = vmul.f32 %v323_v54, %v9207_v27  ;;  %v332_v18 = vmul.f32 %v6918_v16, %v330_v10 }
 0x36a   :  { %7898 = vmatpush3.bf16.msra.mxu0 %v8325_v20  ;;  %7920 = vmatpush3.bf16.msra.mxu1 %v8326_v21 }
 0x36b   :  { %7899 = vmatprep.subr.bf16.mxu0 %v8327_v60  ;;  %7921 = vmatprep.subr.bf16.mxu1 %v8328_v22  ;;  %v337_v15 = vcombine.low %v333_v14, %v333_v14  ;;  %6920 = vst.sshfl [vmem:[%s11205_s22 + $0x18] sm:$0xc0 pattern:$0x76325410] %v333_v14  ;;  %v334_v19 = vadd.f32 %v332_v18, %v325_v17 }
 0x36c   :  { %2741 = vmatprep.mubr.bf16.mxu0 %v2234_v23  ;;  %2781 = vmatprep.mubr.bf16.mxu1 %v2236_v24  ;;  %v351_v21 = vrot.slane %v333_v14, %v8935_v57 }
 0x36d   :  { %v344_v20 = vrot.slane %v337_v15, %v8935_v57  ;;  %6919 = vst.sshfl [vmem:[%s11205_s22 + $0x8] sm:$0xc0 pattern:$0x76325410] %v337_v15  ;;  %v354_v23 = vcombine.low %v334_v19, %v334_v19 }
 0x36e   :  { %7900 = vmatpush3.bf16.msra.mxu0 %v8329_v25  ;;  %7922 = vmatpush3.bf16.msra.mxu1 %v8330_v26  ;;  %v353_v22 = vcombine.low %v351_v21, %v351_v21  ;;  %6922 = vst.sshfl [vmem:[%s11205_s22 + $0x38] sm:$0xc0 pattern:$0x76325410] %v334_v19  ;;  %v368_v25 = vrot.slane %v334_v19, %v8935_v57 }
 0x36f   :  { %7901 = vmatprep.subr.bf16.mxu0 %v8331_v28  ;;  %7923 = vmatprep.subr.bf16.mxu1 %v8332_v29  ;;  %v352_v60 = vcombine.low %v344_v20, %v344_v20  ;;  %v361_v27 = vrot.slane %v354_v23, %v8935_v57  ;;  %6921 = vst.sshfl [vmem:[%s11205_s22 + $0x28] sm:$0xc0 pattern:$0x76325410] %v354_v23  ;;  %v8355_v28 = vld [vmem:[%s11234_s1 + $0x10] sm:$0xff]   ;;  %v8356_v29 = vld [vmem:[%s11234_s1 + $0x18] sm:$0xff]  }
 0x370   :  { %381 = vst [vmem:[%s11205_s22 + $0x10] sm:$0xc0] %v353_v22  ;;  %v370_v26 = vcombine.low %v368_v25, %v368_v25 }
 0x371   :  { %379 = vst [vmem:[%s11205_s22] sm:$0xc0] %v352_v60  ;;  %v369_v24 = vcombine.low %v361_v27, %v361_v27 }
 0x372   :  { %7902 = vmatpush3.bf16.msra.mxu0 %v8333_v61  ;;  %7924 = vmatpush3.bf16.msra.mxu1 %v8334_v30  ;;  %385 = vst [vmem:[%s11205_s22 + $0x30] sm:$0xc0] %v370_v26 }
 0x373   :  { %7903 = vmatprep.subr.bf16.mxu0 %v8335_v31  ;;  %7925 = vmatprep.subr.bf16.mxu1 %v8336_v32  ;;  %383 = vst [vmem:[%s11205_s22 + $0x20] sm:$0xc0] %v369_v24  ;;  %v9616_v31 = vsub.s32 0, %v8924_v45  ;;  %v9619_v32 = vsub.s32 2, %v8924_v45 }
 0x374   :  { %v388_v30 = vld [vmem:[%s11205_s22 + $0x8] sm:$0xc0] }
 0x376   :  { %7904 = vmatpush3.bf16.msra.mxu0 %v8337_v33  ;;  %7926 = vmatpush3.bf16.msra.mxu1 %v8338_v34  ;;  %v9624_v33 = vld [vmem:[%s11196_s13] sm:$0xff]  ;;  %v9627_v34 = vsub.s32 1, %v8924_v45  ;;  %v392_v16 = vld [vmem:[%s11205_s22 + $0x28] sm:$0xc0] }
 0x377   :  { %7905 = vmatprep.subr.bf16.mxu0 %v8339_v35  ;;  %7927 = vmatprep.subr.bf16.mxu1 %v8340_v36  ;;  %v9630_v35 = vsub.s32 3, %v8924_v45  ;;  %v1376_v11 = vrot.slane %v9624_v33, %v9651_v51  ;;  %v1384_v12 = vrot.slane %v9624_v33, %v9659_v58  ;;  %v1380_v14 = vrot.slane %v9624_v33, %v9662_v59 }
 0x378   :  { %v387_v61 = vld [vmem:[%s11205_s22] sm:$0xc0] }
 0x379   :  { %v398_v36 = vmul.f32 %v387_v61, %v387_v61  ;;  %v393_v26 = vld [vmem:[%s11205_s22 + $0x30] sm:$0xc0] }
 0x37a   :  { %7906 = vmatpush3.bf16.msra.mxu0 %v8341_v37  ;;  %7928 = vmatpush3.bf16.msra.mxu1 %v8342_v38  ;;  %v399_v37 = vmul.f32 %v388_v30, %v388_v30  ;;  %v389_v38 = vld [vmem:[%s11205_s22 + $0x10] sm:$0xc0]  ;;  %v391_v62 = vld [vmem:[%s11205_s22 + $0x20] sm:$0xc0] }
 0x37b   :  { %7907 = vmatprep.subr.bf16.mxu0 %v8343_v39  ;;  %7929 = vmatprep.subr.bf16.mxu1 %v8344_v40  ;;  %v9635_v39 = vstv %s6924_s2  ;;  %v1360_v40 = vrot.slane %v9624_v33, %v9616_v31  ;;  %v400_v46 = vmul.f32 %v389_v38, %v389_v38  ;;  %s396_s2 = smul.f32 -0.5, %s9613_s5 }
 0x37c   :  { %v408_v48 = vadd.f32 %v9635_v39, %v399_v37 }
 0x37d   :  { %v409_v8 = vadd.f32 %v9635_v39, %v400_v46  ;;  %v9693_v10 = vstv %s396_s2  ;;  %v404_v46 = vmul.f32 %v393_v26, %v393_v26 }
 0x37e   :  { %7908 = vmatpush3.bf16.msra.mxu0 %v8345_v41  ;;  %7930 = vmatpush3.bf16.msra.mxu1 %v8346_v42  ;;  %v1368_v41 = vrot.slane %v9624_v33, %v9619_v32  ;;  %v1364_v42 = vrot.slane %v9624_v33, %v9627_v34  ;;  %v416_v9 = vmul.f32 0.5, %v408_v48 }
 0x37f   :  { %7909 = vmatprep.subr.bf16.mxu0 %v8347_v43  ;;  %7931 = vmatprep.subr.bf16.mxu1 %v8348_v44  ;;  %v1372_v43 = vrot.slane %v9624_v33, %v9630_v35  ;;  %v390_v44 = vld [vmem:[%s11205_s22 + $0x18] sm:$0xc0]  ;;  %v417_v18 = vmul.f32 0.5, %v409_v8 }
 0x380   :  { %v401_v4 = vmul.f32 %v390_v44, %v390_v44  ;;  %v425_v19 = vadd.f32 %v9693_v10, %v416_v9  ;;  %v394_v44 = vld [vmem:[%s11205_s22 + $0x38] sm:$0xc0] }
 0x382   :  { %7910 = vmatpush3.bf16.msra.mxu0 %v8349_v47  ;;  %7932 = vmatpush3.bf16.msra.mxu1 %v8350_v50  ;;  %v407_v47 = vadd.f32 %v9635_v39, %v398_v36  ;;  %v410_v17 = vadd.f32 %v9635_v39, %v401_v4  ;;  %v9726_v36 = vld [vmem:[%s11196_s13 + $0x8] sm:$0xff] }
 0x383   :  { %7911 = vmatprep.subr.bf16.mxu0 %v8351_v53  ;;  %7933 = vmatprep.subr.bf16.mxu1 %v8352_v55  ;;  %v1392_v48 = vrot.slane %v9726_v36, %v9616_v31 }
 0x384   :  { %v415_v54 = vmul.f32 0.5, %v407_v47  ;;  %v418_v37 = vmul.f32 0.5, %v410_v17 }
 0x386   :  { %7912 = vmatpush3.bf16.msra.mxu0 %v8353_v63  ;;  %7934 = vmatpush3.bf16.msra.mxu1 %v8354_v0  ;;  %v424_v20 = vadd.f32 %v9693_v10, %v415_v54  ;;  %v9764_v54 = vstv %s1961_s0 }
 0x387   :  { %8155 = vmatprep.subr.bf16.mxu0 %v8658_v5  ;;  %8163 = vmatprep.subr.bf16.mxu1 %v8658_v5 }
 0x389   :  { %2742 = vmatmul.mubr.bf16.vlgmr.msra.gmra.mrb[32].mxu0 %v2233_v2  ;;  %2782 = vmatmul.mubr.bf16.vlgmr.msra.gmra.mrb[32].mxu1 %v2235_v3  ;;  %v9672_v3 = vsub.s32 7, %v8924_v45  ;;  %v402_v45 = vmul.f32 %v391_v62, %v391_v62  ;;  %v1404_v62 = vrot.slane %v9726_v36, %v9630_v35 }
 0x38a   :  { %8159 = vmatprep.mubr.msk.bf16.mxu0 %vm8659_vm0, %v8658_v5  ;;  %8167 = vmatprep.mubr.msk.bf16.mxu1 %vm8659_vm0, %v8658_v5 }
 0x38b   :  { %8156 = vmatpush3.bf16.msra.mxu0 %v8355_v28  ;;  %v1388_v15 = vrot.slane %v9624_v33, %v9672_v3  ;;  %v411_v22 = vadd.f32 %v9635_v39, %v402_v45  ;;  %v403_v28 = vmul.f32 %v392_v16, %v392_v16  ;;  %v1408_v45 = vrot.slane %v9726_v36, %v9651_v51 }
 0x38c   :  { %8157 = vmatprep.subr.bf16.mxu0 %v8658_v5 }
 0x38d   :  { %v419_v47 = vmul.f32 0.5, %v411_v22 }
 0x38f   :  { %8158 = vmatpush3.bf16.msra.mxu0 %v8356_v29 }
 0x404   :  { %v1634_v49 = vpop.f32.mrb[12].mxu0  ;;  %v1675_v50 = vpop.f32.mrb[12].mxu1 }
 0x405   :  { %v9654_v52 = vadd.f32 %v1634_v49, %v1360_v40  ;;  %v9656_v53 = vadd.f32 %v1675_v50, %v1368_v41  ;;  %v1636_v55 = vpop.f32.mrb[13].mxu0  ;;  %v1677_v56 = vpop.f32.mrb[13].mxu1  ;;  %v426_v41 = vadd.f32 %v9693_v10, %v417_v18  ;;  %v1400_v49 = vrot.slane %v9726_v36, %v9619_v32 }
 0x406   :  { %v9667_v63 = vadd.f32 %v1636_v55, %v1364_v42  ;;  %v9669_v0 = vadd.f32 %v1677_v56, %v1372_v43  ;;  %v1638_v1 = vpop.f32.mrb[14].mxu0  ;;  %v1679_v2 = vpop.f32.mrb[14].mxu1  ;;  %v6925_v42 = vadd.f32 -0.5, %v424_v20  ;;  %v6926_v43 = vadd.f32 -0.5, %v425_v19 }
 0x407   :  { %1928 = vst [vmem:[%s11206_s23] sm:$0x3] %v9654_v52  ;;  %1930 = vst [vmem:[%s11206_s23 + $0x10] sm:$0x3] %v9656_v53  ;;  %v1639_v6 = vpop.f32.mrb[15].mxu0  ;;  %v1680_v7 = vpop.f32.mrb[15].mxu1  ;;  %v412_v50 = vadd.f32 %v9635_v39, %v403_v28  ;;  %v9755_v55 = vstv %s9699_s4  ;;  %v1396_v56 = vrot.slane %v9726_v36, %v9627_v34  ;;  %v427_v1 = vadd.f32 %v9693_v10, %v418_v37  ;;  %s10345_s4 = sld [smem:[#allocation8 + $0x1]] }
 0x408   :  { %1929 = vst [vmem:[%s11206_s23 + $0x8] sm:$0x3] %v9667_v63  ;;  %1931 = vst [vmem:[%s11206_s23 + $0x18] sm:$0x3] %v9669_v0  ;;  %v405_v2 = vmul.f32 %v394_v44, %v394_v44  ;;  %v6927_v4 = vadd.f32 -0.5, %v426_v41  ;;  %v441_v6 = vsel %vm440_vm2, %v6925_v42, 0.0  ;;  %v1416_v18 = vrot.slane %v9726_v36, %v9659_v58 }
 0x409   :  { %v442_v7 = vsel %vm440_vm2, %v6926_v43, 0.0  ;;  %v420_v20 = vmul.f32 0.5, %v412_v50  ;;  %v1937_v50 = vld [vmem:[%s11205_s22 + $0x8] sm:$0x3] }
 0x40a   :  { %v414_v37 = vadd.f32 %v9635_v39, %v405_v2 }
 0x40c   :  { %v1716_v21 = vpop.f32.mrb[16].mxu0  ;;  %v1757_v60 = vpop.f32.mrb[16].mxu1 }
 0x40d   :  { %v9712_v23 = vadd.f32 %v1716_v21, %v1376_v11  ;;  %v9714_v27 = vadd.f32 %v1757_v60, %v1384_v12  ;;  %v1718_v24 = vpop.f32.mrb[17].mxu0  ;;  %v1759_v25 = vpop.f32.mrb[17].mxu1  ;;  %v413_v11 = vadd.f32 %v9635_v39, %v404_v46  ;;  %v428_v12 = vadd.f32 %v9693_v10, %v419_v47  ;;  %v1938_v46 = vld [vmem:[%s11205_s22 + $0x10] sm:$0x3] }
 0x40e   :  { %v9719_v29 = vadd.f32 %v1718_v24, %v1380_v14  ;;  %v9721_v61 = vadd.f32 %v1759_v25, %v1388_v15  ;;  %v1720_v30 = vpop.f32.mrb[18].mxu0  ;;  %v1761_v33 = vpop.f32.mrb[18].mxu1  ;;  %v6928_v24 = vadd.f32 -0.5, %v427_v1  ;;  %v443_v25 = vadd.f32 %v442_v7, %v441_v6 }
 0x40f   :  { %1932 = vst [vmem:[%s11206_s23 + $0x20] sm:$0x3] %v9712_v23  ;;  %1934 = vst [vmem:[%s11206_s23 + $0x30] sm:$0x3] %v9714_v27  ;;  %v1721_v38 = vpop.f32.mrb[19].mxu0  ;;  %v1762_v40 = vpop.f32.mrb[19].mxu1  ;;  %v1412_v39 = vrot.slane %v9726_v36, %v9662_v59  ;;  %v429_v1 = vadd.f32 %v9693_v10, %v420_v20 }
 0x410   :  { %1933 = vst [vmem:[%s11206_s23 + $0x28] sm:$0x3] %v9719_v29  ;;  %1935 = vst [vmem:[%s11206_s23 + $0x38] sm:$0x3] %v9721_v61  ;;  %v444_v38 = vsel %vm440_vm2, %v6927_v4, 0.0  ;;  %v421_v43 = vmul.f32 0.5, %v413_v11 }
 0x411   :  { %v1936_v40 = vld [vmem:[%s11205_s22] sm:$0x3]  ;;  %v6929_v44 = vadd.f32 -0.5, %v428_v12  ;;  %v445_v2 = vadd.f32 %v444_v38, %v443_v25  ;;  %v422_v6 = vmul.f32 0.5, %v414_v37  ;;  %v446_v7 = vsel %vm440_vm2, %v6928_v24, 0.0 }
 0x412   :  { %v1944_v4 = vsub.f32 %v1936_v40, %v9654_v52  ;;  %v430_v12 = vadd.f32 %v9693_v10, %v421_v43 }
 0x414   :  { %v1798_v8 = vpop.f32.mrb[20].mxu0  ;;  %v1839_v9 = vpop.f32.mrb[20].mxu1 }
 0x415   :  { %v9770_v14 = vadd.f32 %v1798_v8, %v1392_v48  ;;  %v9772_v15 = vadd.f32 %v1839_v9, %v1400_v49  ;;  %v1800_v16 = vpop.f32.mrb[21].mxu0  ;;  %v1841_v17 = vpop.f32.mrb[21].mxu1  ;;  %v1420_v49 = vrot.slane %v9726_v36, %v9672_v3  ;;  %v1946_v8 = vsub.f32 %v1938_v46, %v9656_v53  ;;  %v1939_v36 = vld [vmem:[%s11205_s22 + $0x18] sm:$0x3]  ;;  %v1941_v46 = vld [vmem:[%s11205_s22 + $0x28] sm:$0x3] }
 0x416   :  { %v9776_v19 = vadd.f32 %v1800_v16, %v1396_v56  ;;  %v9778_v21 = vadd.f32 %v1841_v17, %v1404_v62  ;;  %v1802_v60 = vpop.f32.mrb[22].mxu0  ;;  %v1843_v22 = vpop.f32.mrb[22].mxu1  ;;  %v448_v16 = vsel %vm440_vm2, %v6929_v44, 0.0  ;;  %v1945_v17 = vsub.f32 %v1937_v50, %v9667_v63  ;;  %v1940_v63 = vld [vmem:[%s11205_s22 + $0x20] sm:$0x3] }
 0x417   :  { %v1989_v26 = vsub.f32 0.0, %v9770_v14  ;;  %v1991_v28 = vsub.f32 0.0, %v9772_v15  ;;  %v1803_v30 = vpop.f32.mrb[23].mxu0  ;;  %v1844_v33 = vpop.f32.mrb[23].mxu1  ;;  %v1974_v40 = vmul.f32 %v1946_v8, %v1946_v8  ;;  %v1952_v8 = vmul.f32 0.5, %v9770_v14 }
 0x418   :  { %v1990_v41 = vsub.f32 0.0, %v9776_v19  ;;  %v1992_v42 = vsub.f32 0.0, %v9778_v21  ;;  %v1972_v30 = vmul.f32 %v1944_v4, %v1944_v4  ;;  %v1947_v33 = vsub.f32 %v1939_v36, %v9669_v0 }
 0x419   :  { %v1997_v47 = vmul.f32 1.442695, %v1989_v26  ;;  %v2001_v48 = vmul.f32 1.442695, %v1991_v28  ;;  %v447_v28 = vadd.f32 %v446_v7, %v445_v2  ;;  %v9828_v0 = vadd.f32 -0.5, %v429_v1 }
 0x41a   :  { %v1999_v56 = vmul.f32 1.442695, %v1990_v41  ;;  %v2003_v62 = vmul.f32 1.442695, %v1992_v42  ;;  %v1942_v41 = vld [vmem:[%s11205_s22 + $0x30] sm:$0x3]  ;;  %v1973_v44 = vmul.f32 %v1945_v17, %v1945_v17  ;;  %v1981_v2 = vadd.f32 %v9755_v55, %v1972_v30 }
 0x41b   :  { %8499 = vpow2.f32 %v1997_v47  ;;  %v1975_v1 = vmul.f32 %v1947_v33, %v1947_v33  ;;  %v1948_v4 = vsub.f32 %v1940_v63, %v9712_v23  ;;  %v1943_v7 = vld [vmem:[%s11205_s22 + $0x38] sm:$0x3]  ;;  %v1954_v23 = vmul.f32 0.5, %v9772_v15 }
 0x41c   :  { %8501 = vpow2.f32 %v2001_v48  ;;  %v1880_v9 = vpop.f32.mrb[24].mxu0  ;;  %v1921_v11 = vpop.f32.mrb[24].mxu1 }
 0x41d   :  { %8503 = vpow2.f32 %v1999_v56  ;;  %v9809_v52 = vadd.f32 %v1880_v9, %v1408_v45  ;;  %v9811_v20 = vadd.f32 %v1921_v11, %v1416_v18  ;;  %v1882_v60 = vpop.f32.mrb[25].mxu0  ;;  %v1923_v53 = vpop.f32.mrb[25].mxu1  ;;  %v9836_v56 = vadd.f32 -0.5, %v430_v12 }
 0x41e   :  { %8505 = vpow2.f32 %v2003_v62  ;;  %v9813_v22 = vadd.f32 %v1882_v60, %v1412_v39  ;;  %v9815_v24 = vadd.f32 %v1923_v53, %v1420_v49  ;;  %v1884_v25 = vpop.f32.mrb[26].mxu0  ;;  %v1925_v26 = vpop.f32.mrb[26].mxu1  ;;  %v9834_v39 = vadd.f32 %v9693_v10, %v422_v6 }
 0x41f   :  { %v1993_v45 = vsub.f32 0.0, %v9809_v52  ;;  %v1995_v18 = vsub.f32 0.0, %v9811_v20  ;;  %v1885_v37 = vpop.f32.mrb[27].mxu0  ;;  %v1926_v38 = vpop.f32.mrb[27].mxu1  ;;  %v9838_v62 = vadd.f32 %v448_v16, %v447_v28  ;;  %v1983_v10 = vadd.f32 %v9755_v55, %v1974_v40 }
 0x420   :  { %v1994_v42 = vsub.f32 0.0, %v9813_v22  ;;  %v1996_v43 = vsub.f32 0.0, %v9815_v24  ;;  %v1950_v6 = vsub.f32 %v1942_v41, %v9714_v27  ;;  %v1982_v9 = vadd.f32 %v9755_v55, %v1973_v44 }
 0x421   :  { %v2005_v47 = vmul.f32 1.442695, %v1993_v45  ;;  %v2009_v48 = vmul.f32 1.442695, %v1995_v18  ;;  %v1949_v11 = vsub.f32 %v1941_v46, %v9719_v29  ;;  %v1951_v16 = vsub.f32 %v1943_v7, %v9721_v61 }
 0x422   :  { %v2007_v49 = vmul.f32 1.442695, %v1994_v42  ;;  %v2011_v50 = vmul.f32 1.442695, %v1996_v43  ;;  %v1953_v60 = vmul.f32 0.5, %v9776_v19  ;;  %v1984_v27 = vadd.f32 %v9755_v55, %v1975_v1 }
 0x423   :  { %8507 = vpow2.f32 %v2005_v47  ;;  %v1976_v14 = vmul.f32 %v1948_v4, %v1948_v4  ;;  %v1955_v26 = vmul.f32 0.5, %v9778_v21  ;;  %v1978_v30 = vmul.f32 %v1950_v6, %v1950_v6 }
 0x424   :  { %8509 = vpow2.f32 %v2009_v48  ;;  %v1963_v29 = vsub.f32 %v1952_v8, %v9764_v54  ;;  %v1977_v63 = vmul.f32 %v1949_v11, %v1949_v11  ;;  %v1965_v61 = vsub.f32 %v1954_v23, %v9764_v54 }
 0x425   :  { %v8500_v36 = vpop.eup %8499  ;;  %8511 = vpow2.f32 %v2007_v49  ;;  %v1979_v19 = vmul.f32 %v1951_v16, %v1951_v16  ;;  %v1964_v38 = vsub.f32 %v1953_v60, %v9764_v54  ;;  %v1966_v42 = vsub.f32 %v1955_v26, %v9764_v54 }
 0x426   :  { %v8502_v12 = vpop.eup %8501  ;;  %v2013_v17 = vmul.f32 0.5, %v8500_v36  ;;  %8513 = vpow2.f32 %v2011_v50  ;;  %v1956_v43 = vmul.f32 0.5, %v9809_v52  ;;  %v1985_v44 = vadd.f32 %v9755_v55, %v1976_v14 }
 0x427   :  { %v8504_v53 = vpop.eup %8503  ;;  %v2015_v25 = vmul.f32 0.5, %v8502_v12  ;;  %v1987_v46 = vadd.f32 %v9755_v55, %v1978_v30  ;;  %v1986_v50 = vadd.f32 %v9755_v55, %v1977_v63  ;;  %v1958_v1 = vmul.f32 0.5, %v9811_v20 }
 0x428   :  { %v8506_v28 = vpop.eup %8505  ;;  %v2021_v15 = vmul.f32 %v2013_v17, %v1981_v2  ;;  %v2014_v33 = vmul.f32 0.5, %v8504_v53  ;;  %v1957_v4 = vmul.f32 0.5, %v9813_v22  ;;  %v1967_v11 = vsub.f32 %v1956_v43, %v9764_v54 }
 0x429   :  { %v2023_v45 = vmul.f32 %v2015_v25, %v1983_v10  ;;  %v2016_v18 = vmul.f32 0.5, %v8506_v28  ;;  %v1959_v12 = vmul.f32 0.5, %v9815_v24 }
 0x42a   :  { %v2029_v37 = vadd.f32 %v2021_v15, %v1963_v29  ;;  %v2022_v40 = vmul.f32 %v2014_v33, %v1982_v9  ;;  %v1988_v9 = vadd.f32 %v9755_v55, %v1979_v19  ;;  %v1968_v55 = vsub.f32 %v1957_v4, %v9764_v54 }
 0x42b   :  { %v2031_v41 = vadd.f32 %v2023_v45, %v1965_v61  ;;  %v2024_v21 = vmul.f32 %v2016_v18, %v1984_v27  ;;  %v1969_v27 = vsub.f32 %v1958_v1, %v9764_v54  ;;  %v1970_v29 = vsub.f32 %v1959_v12, %v9764_v54 }
 0x42c   :  { %v7046_v47 = vadd.f32 -0.5, %v2029_v37  ;;  %v2030_v48 = vadd.f32 %v2022_v40, %v1964_v38  ;;  %v450_v18 = vsel %vm440_vm2, %v9828_v0, 0.0 }
 0x42d   :  { %v8508_v49 = vpop.eup %8507  ;;  %v2032_v2 = vadd.f32 %v2024_v21, %v1966_v42  ;;  %v7048_v6 = vadd.f32 -0.5, %v2031_v41  ;;  %v451_v21 = vadd.f32 %v450_v18, %v9838_v62  ;;  %v7183_v62 = vld [vmem:[%s11235_s29 + $0x1] ss:$0 sm:$0xff] }
 0x42e   :  { %v8510_v7 = vpop.eup %8509  ;;  %v2046_v10 = vsel %vm2045_vm3, %v7046_v47, 0.0  ;;  %v7047_v8 = vadd.f32 -0.5, %v2030_v48  ;;  %v2017_v52 = vmul.f32 0.5, %v8508_v49 }
 0x42f   :  { %v8512_v36 = vpop.eup %8511  ;;  %v2019_v23 = vmul.f32 0.5, %v8510_v7  ;;  %v7049_v20 = vadd.f32 -0.5, %v2032_v2  ;;  %v2049_v26 = vsel %vm2045_vm3, %v7048_v6, 0.0 }
 0x430   :  { %v8514_v16 = vpop.eup %8513  ;;  %v2047_v17 = vsel %vm2045_vm3, %v7047_v8, 0.0  ;;  %v2025_v60 = vmul.f32 %v2017_v52, %v1985_v44  ;;  %v2018_v22 = vmul.f32 0.5, %v8512_v36  ;;  %v6932_v44 = vadd.f32 -0.5, %v9834_v39 }
 0x431   :  { %v2048_v53 = vadd.f32 %v2047_v17, %v2046_v10  ;;  %v2020_v14 = vmul.f32 0.5, %v8514_v16  ;;  %v2027_v25 = vmul.f32 %v2019_v23, %v1987_v46  ;;  %v2051_v45 = vsel %vm2045_vm3, %v7049_v20, 0.0 }
 0x432   :  { %v2033_v28 = vadd.f32 %v2025_v60, %v1967_v11  ;;  %v2026_v30 = vmul.f32 %v2018_v22, %v1986_v50  ;;  %v452_v46 = vsel %vm440_vm2, %v9836_v56, 0.0  ;;  %v454_v4 = vsel %vm440_vm2, %v6932_v44, 0.0  ;;  %v7275_v44 = vld [vmem:[%s11195_s12 + $0x148] sm:$0xff] }
 0x433   :  { %v2028_v24 = vmul.f32 %v2020_v14, %v1988_v9  ;;  %v2035_v15 = vadd.f32 %v2027_v25, %v1969_v27  ;;  %v2050_v33 = vadd.f32 %v2049_v26, %v2048_v53  ;;  %v453_v49 = vadd.f32 %v452_v46, %v451_v21  ;;  %v7274_v21 = vld [vmem:[%s11195_s12 + $0x140] sm:$0xff] }
 0x434   :  { %v7050_v63 = vadd.f32 -0.5, %v2033_v28  ;;  %v2034_v61 = vadd.f32 %v2026_v30, %v1968_v55 }
 0x435   :  { %v2036_v19 = vadd.f32 %v2028_v24, %v1970_v29  ;;  %v2052_v37 = vadd.f32 %v2051_v45, %v2050_v33  ;;  %v7052_v40 = vadd.f32 -0.5, %v2035_v15  ;;  %v455_v11 = vadd.f32 %v454_v4, %v453_v49  ;;  %v8357_v15 = vld [vmem:[%s11193_s10 + $0x10] sm:$0xff]   ;;  %v8358_v33 = vld [vmem:[%s11193_s10 + $0x18] sm:$0xff]   ;;  %v7290_v49 = vld [vmem:[%s11195_s12 + $0x1c0] sm:$0xff] }
 0x436   :  { %v7051_v38 = vadd.f32 -0.5, %v2034_v61  ;;  %v2053_v41 = vsel %vm2045_vm3, %v7050_v63, 0.0  ;;  %8164 = vmatpush3.bf16.msra.mxu1 %v8357_v15  ;;  %v7253_v63 = vld [vmem:[%s11236_s26 + $0x1] ss:$0 sm:$0xff]  ;;  %v7279_v15 = vld [vmem:[%s11195_s12 + $0x168] sm:$0xff] }
 0x437   :  { %v2054_v42 = vadd.f32 %v2053_v41, %v2052_v37  ;;  %v7053_v54 = vadd.f32 -0.5, %v2036_v19  ;;  %v2057_v0 = vsel %vm2045_vm3, %v7052_v40, 0.0  ;;  %8165 = vmatprep.subr.bf16.mxu1 %v8658_v5 }
 0x438   :  { %v2055_v43 = vsel %vm2045_vm3, %v7051_v38, 0.0 }
 0x439   :  { %v2056_v47 = vadd.f32 %v2055_v43, %v2054_v42  ;;  %v2059_v1 = vsel %vm2045_vm3, %v7053_v54, 0.0  ;;  %v7266_v42 = vld [vmem:[%s11195_s12 + $0x100] sm:$0xff]  ;;  %v7267_v54 = vld [vmem:[%s11195_s12 + $0x108] sm:$0xff] }
 0x43a   :  { %8166 = vmatpush3.bf16.msra.mxu1 %v8358_v33  ;;  %v7301_v43 = vcombine.high %v7266_v42, %v7274_v21  ;;  %v7300_v46 = vcombine.low %v7266_v42, %v7274_v21 }
 0x43b   :  { %v2058_v48 = vadd.f32 %v2057_v0, %v2056_v47  ;;  %v7302_v47 = vcombine.low %v7267_v54, %v7275_v44  ;;  %v7303_v0 = vcombine.high %v7267_v54, %v7275_v44  ;;  %v7272_v54 = vld [vmem:[%s11195_s12 + $0x130] sm:$0xff]  ;;  %v7273_v44 = vld [vmem:[%s11195_s12 + $0x138] sm:$0xff] }
 0x43c   :  { %v7869_v50 = vpop.f32.mrb[28].mxu0  ;;  %v7891_v2 = vpop.f32.mrb[28].mxu1  ;;  %3215 = vmatprep.subr.bf16.mxu0 %v7301_v43  ;;  %v7280_v43 = vld [vmem:[%s11195_s12 + $0x170] sm:$0xff] }
 0x43d   :  { %v7870_v7 = vpop.f32.mrb[29].mxu0  ;;  %v7892_v39 = vpop.f32.mrb[29].mxu1  ;;  %v2060_v10 = vadd.f32 %v2059_v1, %v2058_v48  ;;  %3256 = vmatprep.subr.bf16.mxu1 %v7303_v0  ;;  %v7282_v48 = vld [vmem:[%s11195_s12 + $0x180] sm:$0xff]  ;;  %v7291_v1 = vld [vmem:[%s11195_s12 + $0x1c8] sm:$0xff] }
 0x43e   :  { %v7871_v6 = vadd.f32 %v7870_v7, %v7869_v50  ;;  %v7893_v56 = vadd.f32 %v7892_v39, %v7891_v2  ;;  %v7872_v8 = vpop.f32.mrb[30].mxu0  ;;  %v7894_v52 = vpop.f32.mrb[30].mxu1  ;;  %v7283_v50 = vld [vmem:[%s11195_s12 + $0x188] sm:$0xff]  ;;  %v7317_v2 = vcombine.high %v7282_v48, %v7290_v49  ;;  %v7316_v4 = vcombine.low %v7282_v48, %v7290_v49  ;;  %v7268_v39 = vld [vmem:[%s11195_s12 + $0x110] sm:$0xff] }
 0x43f   :  { %v7873_v36 = vpop.f32.mrb[31].mxu0  ;;  %v7895_v9 = vpop.f32.mrb[31].mxu1  ;;  %2061 = vadd.xlane.f32.xlu0 %v2060_v10  ;;  %v7319_v7 = vcombine.high %v7283_v50, %v7291_v1  ;;  %v7276_v10 = vld [vmem:[%s11195_s12 + $0x150] sm:$0xff]  ;;  %v7277_v52 = vld [vmem:[%s11195_s12 + $0x158] sm:$0xff]  ;;  %v7313_v48 = vcombine.high %v7272_v54, %v7280_v43 }
 0x440   :  { %v2664_v23 = vadd.f32 %v7871_v6, %v7183_v62  ;;  %v7318_v62 = vcombine.low %v7283_v50, %v7291_v1  ;;  %v7269_v6 = vld [vmem:[%s11195_s12 + $0x118] sm:$0xff]  ;;  %v7305_v8 = vcombine.high %v7268_v39, %v7276_v10  ;;  %v7288_v50 = vld [vmem:[%s11195_s12 + $0x1b0] sm:$0xff] }
 0x441   :  { %v7306_v36 = vcombine.low %v7269_v6, %v7277_v52  ;;  %v7307_v9 = vcombine.high %v7269_v6, %v7277_v52  ;;  %v7289_v1 = vld [vmem:[%s11195_s12 + $0x1b8] sm:$0xff]  ;;  %v3755_v6 = vld [vmem:[%s11205_s22 + $0x8] sm:$0xc0] }
 0x442   :  { %v2704_v12 = vadd.f32 %v7893_v56, %v2664_v23  ;;  %v7304_v56 = vcombine.low %v7268_v39, %v7276_v10 }
 0x443   :  { %456 = vadd.xlane.f32.xlu0 %v455_v11  ;;  %v7262_v11 = vld [vmem:[%s11194_s11 + $0x1] ss:$0 sm:$0xff] }
 0x45c   :  { %v7913_v16 = vpop.f32.mrb[32].mxu0  ;;  %v7935_v17 = vpop.f32.mrb[32].mxu1 }
 0x45d   :  { %v7914_v20 = vpop.f32.mrb[33].mxu0  ;;  %v7936_v60 = vpop.f32.mrb[33].mxu1 }
 0x45e   :  { %v7915_v22 = vadd.f32 %v7914_v20, %v7913_v16  ;;  %v7937_v53 = vadd.f32 %v7936_v60, %v7935_v17  ;;  %v7916_v27 = vpop.f32.mrb[34].mxu0  ;;  %v7938_v14 = vpop.f32.mrb[34].mxu1 }
 0x45f   :  { %v7917_v25 = vpop.f32.mrb[35].mxu0  ;;  %v7939_v26 = vpop.f32.mrb[35].mxu1  ;;  %v7285_v27 = vld [vmem:[%s11195_s12 + $0x198] sm:$0xff] }
 0x460   :  { %v2744_v28 = vadd.f32 %v7915_v22, %v2704_v12  ;;  %v7284_v22 = vld [vmem:[%s11195_s12 + $0x190] sm:$0xff]  ;;  %v7293_v14 = vld [vmem:[%s11195_s12 + $0x1d8] sm:$0xff] }
 0x462   :  { %v2784_v55 = vadd.f32 %v7937_v53, %v2744_v28  ;;  %v7292_v53 = vld [vmem:[%s11195_s12 + $0x1d0] sm:$0xff] }
 0x463   :  { %v7321_v28 = vcombine.high %v7284_v22, %v7292_v53  ;;  %v7320_v33 = vcombine.low %v7284_v22, %v7292_v53  ;;  %v8365_v53 = vld [vmem:[%s11231_s28 + $0x408] sm:$0xff]  }
 0x464   :  { %v2789_v30 = vmul.f32 0.01, %v2784_v55 }
 0x466   :  { %v2790_v29 = vmax.f32 %v2784_v55, %v2789_v30  ;;  %v7323_v55 = vcombine.high %v7285_v27, %v7293_v14  ;;  %v7270_v30 = vld [vmem:[%s11195_s12 + $0x120] sm:$0xff] }
 0x468   :  { %v2796_v24 = vpack.c.bf16 %v2790_v29, %v2790_v29  ;;  %v7278_v29 = vld [vmem:[%s11195_s12 + $0x160] sm:$0xff] }
 0x46a   :  { %8160 = vmatmul.mubr.msk.bf16.vlgmr.msra.gmra.mrb[36].mxu0 %vm1205_vm1, %v2796_v24  ;;  %v7271_v24 = vld [vmem:[%s11195_s12 + $0x128] sm:$0xff] }
 0x46b   :  { %3247 = vmatprep.mubr.bf16.mxu0 %v8660_v13  ;;  %3216 = vmatpush1.bf16.msra.mxu0 %v7300_v46  ;;  %v7281_v46 = vld [vmem:[%s11195_s12 + $0x178] sm:$0xff] }
 0x46c   :  { %3217 = vmatprep.subr.bf16.mxu0 %v7317_v2  ;;  %v7315_v49 = vcombine.high %v7273_v44, %v7281_v46  ;;  %v7296_v2 = vld [vmem:[%s11195_s12 + $0x1f0] sm:$0xff] }
 0x46d   :  { %v7329_v39 = vcombine.high %v7288_v50, %v7296_v2 }
 0x46f   :  { %3218 = vmatpush1.bf16.msra.mxu0 %v7316_v4  ;;  %v7297_v4 = vld [vmem:[%s11195_s12 + $0x1f8] sm:$0xff] }
 0x470   :  { %3297 = vmatprep.subr.bf16.mxu0 %v7305_v8  ;;  %v7331_v10 = vcombine.high %v7289_v1, %v7297_v4  ;;  %v7328_v8 = vcombine.low %v7288_v50, %v7296_v2  ;;  %v7330_v52 = vcombine.low %v7289_v1, %v7297_v4  ;;  %v8390_v50 = vld [vmem:[%s11231_s28 + $0x4b8] sm:$0xff]   ;;  %v8391_v2 = vld [vmem:[%s11231_s28 + $0x540] sm:$0xff]  }
 0x471   :  { %v8392_v1 = vld [vmem:[%s11231_s28 + $0x5c0] sm:$0xff]  }
 0x53d   :  { %v2854_v61 = vpop.f32.mrb[36].mxu0 }
 0x53e   :  { %v2855_v45 = vadd.f32 %v7253_v63, %v2854_v61  ;;  %v8161_v18 = vpop.f32.mrb[37].mxu0  ;;  %v7322_v63 = vcombine.low %v7285_v27, %v7293_v14  ;;  %v7309_v61 = vcombine.high %v7270_v30, %v7278_v29  ;;  %v8366_v27 = vld [vmem:[%s11231_s28 + $0x488] sm:$0xff]   ;;  %v8367_v14 = vld [vmem:[%s11231_s28 + $0x450] sm:$0xff]  }
 0x53f   :  { %v2857_v19 = vpop.f32.mrb[38].mxu0  ;;  %v7286_v18 = vld [vmem:[%s11195_s12 + $0x1a0] sm:$0xff] }
 0x540   :  { %v2860_v37 = vmul.f32 0.01, %v2855_v45  ;;  %v8162_v38 = vpop.f32.mrb[39].mxu0  ;;  %v7294_v19 = vld [vmem:[%s11195_s12 + $0x1e0] sm:$0xff] }
 0x541   :  { %v7295_v38 = vld [vmem:[%s11195_s12 + $0x1e8] sm:$0xff]  ;;  %v7325_v42 = vcombine.high %v7286_v18, %v7294_v19 }
 0x542   :  { %v2861_v40 = vmax.f32 %v2855_v45, %v2860_v37  ;;  %v7311_v45 = vcombine.high %v7271_v24, %v7279_v15  ;;  %v7287_v37 = vld [vmem:[%s11195_s12 + $0x1a8] sm:$0xff] }
 0x543   :  { %v7327_v21 = vcombine.high %v7287_v37, %v7295_v38  ;;  %v7326_v0 = vcombine.low %v7287_v37, %v7295_v38  ;;  %v8382_v37 = vld [vmem:[%s11231_s28 + $0x4a8] sm:$0xff]   ;;  %v8383_v38 = vld [vmem:[%s11231_s28 + $0x470] sm:$0xff]  }
 0x544   :  { %v2867_v41 = vpack.c.bf16 %v2861_v40, %v2861_v40  ;;  %v7308_v40 = vcombine.low %v7270_v30, %v7278_v29  ;;  %v8372_v30 = vld [vmem:[%s11231_s28 + $0x4d8] sm:$0xff]  }
 0x545   :  { %v8373_v29 = vld [vmem:[%s11231_s28 + $0x418] sm:$0xff]  }
 0x546   :  { %8168 = vmatmul.mubr.msk.bf16.vlgmr.msra.gmra.mrb[36].mxu1 %vm1205_vm1, %v2867_v41  ;;  %v7310_v41 = vcombine.low %v7271_v24, %v7279_v15  ;;  %v8374_v24 = vld [vmem:[%s11231_s28 + $0x498] sm:$0xff]   ;;  %v8375_v15 = vld [vmem:[%s11231_s28 + $0x460] sm:$0xff]  }
 0x547   :  { %3288 = vmatprep.mubr.bf16.mxu1 %v8660_v13  ;;  %3257 = vmatpush1.bf16.msra.mxu1 %v7302_v47  ;;  %v7324_v47 = vcombine.low %v7286_v18, %v7294_v19  ;;  %v8380_v18 = vld [vmem:[%s11231_s28 + $0x4e8] sm:$0xff]  }
 0x548   :  { %3258 = vmatprep.subr.bf16.mxu1 %v7319_v7  ;;  %v7314_v7 = vcombine.low %v7273_v44, %v7281_v46  ;;  %v8381_v19 = vld [vmem:[%s11231_s28 + $0x428] sm:$0xff]   ;;  %v8388_v44 = vld [vmem:[%s11231_s28 + $0x4f8] sm:$0xff]  }
 0x54b   :  { %3259 = vmatpush1.bf16.msra.mxu1 %v7318_v62  ;;  %v7312_v62 = vcombine.low %v7272_v54, %v7280_v43  ;;  %v3756_v54 = vld [vmem:[%s11205_s22 + $0x10] sm:$0xc0]  ;;  %v8387_v43 = vld [vmem:[%s11231_s28 + $0x478] sm:$0xff]  }
 0x54c   :  { %3338 = vmatprep.subr.bf16.mxu1 %v7307_v9  ;;  %v8360_v9 = vld [vmem:[%s11231_s28 + $0x4c0] sm:$0xff]  }
 0x619   :  { %v2925_v23 = vpop.f32.mrb[36].mxu1 }
 0x61a   :  { %v2926_v12 = vadd.f32 %v7262_v11, %v2925_v23  ;;  %v8169_v16 = vpop.f32.mrb[37].mxu1  ;;  %v3892_v11 = vpack.c.bf16 %v3755_v6, %v3755_v6  ;;  %v8394_v6 = vld [vmem:[%s11231_s28 + $0x580] sm:$0xff]  }
 0x61b   :  { %v2928_v17 = vpop.f32.mrb[38].mxu1  ;;  %v8362_v16 = vld [vmem:[%s11231_s28 + $0x480] sm:$0xff]  }
 0x61c   :  { %v2931_v20 = vmul.f32 0.01, %v2926_v12  ;;  %v8170_v60 = vpop.f32.mrb[39].mxu1  ;;  %v8363_v17 = vld [vmem:[%s11231_s28 + $0x448] sm:$0xff]  }
 0x61d   :  { %v3916_v60 = vrot.slane %v3892_v11, 3  ;;  %v8398_v11 = vld [vmem:[%s11231_s28 + $0x588] sm:$0xff]  }
 0x61e   :  { %v2932_v25 = vmax.f32 %v2926_v12, %v2931_v20  ;;  %v8361_v12 = vld [vmem:[%s11231_s28 + $0x400] sm:$0xff]   ;;  %v8364_v20 = vld [vmem:[%s11231_s28 + $0x4c8] sm:$0xff]  }
 0x620   :  { %v9954_v26 = vpack.c.bf16 %v2932_v25, %v2932_v25  ;;  %v8368_v25 = vld [vmem:[%s11231_s28 + $0x4d0] sm:$0xff]  }
 0x622   :  { %7332 = vmatmul.mubr.msk.bf16.vlgmr.msra.gmra.mrb[40].mxu0 %vm1205_vm1, %v9954_v26  ;;  %7333 = vmatmul.mubr.msk.bf16.vlgmr.msra.gmra.mrb[40].mxu1 %vm1205_vm1, %v9954_v26 }
 0x623   :  { %3298 = vmatpush1.bf16.msra.mxu0 %v7304_v56  ;;  %3339 = vmatpush1.bf16.msra.mxu1 %v7306_v36  ;;  %v3757_v56 = vld [vmem:[%s11205_s22 + $0x18] sm:$0xc0]  ;;  %v8359_v36 = vld [vmem:[%s11231_s28 + $0x440] sm:$0xff]  }
 0x624   :  { %3299 = vmatprep.subr.bf16.mxu0 %v7321_v28  ;;  %3340 = vmatprep.subr.bf16.mxu1 %v7323_v55  ;;  %v3894_v23 = vpack.c.bf16 %v3757_v56, %v3757_v56  ;;  %v8370_v28 = vld [vmem:[%s11231_s28 + $0x490] sm:$0xff]   ;;  %v8371_v55 = vld [vmem:[%s11231_s28 + $0x458] sm:$0xff]   ;;  %v8395_v56 = vld [vmem:[%s11231_s28 + $0x548] sm:$0xff]  }
 0x625   :  { %3329 = vmatprep.mubr.bf16.mxu0 %v8660_v13  ;;  %3370 = vmatprep.mubr.bf16.mxu1 %v8660_v13 }
 0x626   :  { %v3918_v22 = vrot.slane %v3894_v23, 3  ;;  %v8399_v23 = vld [vmem:[%s11231_s28 + $0x550] sm:$0xff]  }
 0x627   :  { %3300 = vmatpush1.bf16.msra.mxu0 %v7320_v33  ;;  %3341 = vmatpush1.bf16.msra.mxu1 %v7322_v63  ;;  %v8376_v33 = vld [vmem:[%s11231_s28 + $0x4e0] sm:$0xff]  }
 0x628   :  { %3379 = vmatprep.subr.bf16.mxu0 %v7309_v61  ;;  %3420 = vmatprep.subr.bf16.mxu1 %v7311_v45  ;;  %v8377_v63 = vld [vmem:[%s11231_s28 + $0x420] sm:$0xff]   ;;  %v8379_v45 = vld [vmem:[%s11231_s28 + $0x468] sm:$0xff]  }
 0x629   :  { %v8378_v61 = vld [vmem:[%s11231_s28 + $0x4a0] sm:$0xff]  }
 0x62a   :  { %7334 = vmatmul.mubr.msk.bf16.vlgmr.msra.gmra.mrb[44].mxu0 %vm1205_vm1, %v9954_v26  ;;  %7335 = vmatmul.mubr.msk.bf16.vlgmr.msra.gmra.mrb[44].mxu1 %vm1205_vm1, %v9954_v26 }
 0x62b   :  { %3380 = vmatpush1.bf16.msra.mxu0 %v7308_v40  ;;  %3421 = vmatpush1.bf16.msra.mxu1 %v7310_v41  ;;  %v8384_v40 = vld [vmem:[%s11231_s28 + $0x4f0] sm:$0xff]  }
 0x62c   :  { %3381 = vmatprep.subr.bf16.mxu0 %v7325_v42  ;;  %3422 = vmatprep.subr.bf16.mxu1 %v7327_v21  ;;  %v8385_v41 = vld [vmem:[%s11231_s28 + $0x430] sm:$0xff]   ;;  %v3754_v21 = vld [vmem:[%s11205_s22] sm:$0xc0] }
 0x62d   :  { %3411 = vmatprep.mubr.bf16.mxu0 %v8660_v13  ;;  %3452 = vmatprep.mubr.bf16.mxu1 %v8660_v13  ;;  %v8386_v42 = vld [vmem:[%s11231_s28 + $0x4b0] sm:$0xff]   ;;  %v3891_v46 = vpack.c.bf16 %v3754_v21, %v3754_v21 }
 0x62f   :  { %3382 = vmatpush1.bf16.msra.mxu0 %v7324_v47  ;;  %3423 = vmatpush1.bf16.msra.mxu1 %v7326_v0  ;;  %v3893_v47 = vpack.c.bf16 %v3756_v54, %v3756_v54  ;;  %v3759_v0 = vld [vmem:[%s11205_s22 + $0x28] sm:$0xc0]  ;;  %v8423_v54 = vld [vmem:[%s11234_s1 + $0x20] sm:$0xff]  }
 0x630   :  { %3461 = vmatprep.subr.bf16.mxu0 %v7313_v48  ;;  %3502 = vmatprep.subr.bf16.mxu1 %v7315_v49  ;;  %v3761_v48 = vld [vmem:[%s11205_s22 + $0x38] sm:$0xc0]  ;;  %v3896_v4 = vpack.c.bf16 %v3759_v0, %v3759_v0 }
 0x631   :  { %v8389_v49 = vld [vmem:[%s11231_s28 + $0x438] sm:$0xff]  }
 0x632   :  { %7336 = vmatmul.mubr.msk.bf16.vlgmr.msra.gmra.mrb[48].mxu0 %vm1205_vm1, %v9954_v26  ;;  %7337 = vmatmul.mubr.msk.bf16.vlgmr.msra.gmra.mrb[48].mxu1 %vm1205_vm1, %v9954_v26 }
 0x633   :  { %3462 = vmatpush1.bf16.msra.mxu0 %v7312_v62  ;;  %3503 = vmatpush1.bf16.msra.mxu1 %v7314_v7  ;;  %v3898_v62 = vpack.c.bf16 %v3761_v48, %v3761_v48  ;;  %v3915_v7 = vrot.slane %v3891_v46, 3 }
 0x634   :  { %3463 = vmatprep.subr.bf16.mxu0 %v7329_v39  ;;  %3504 = vmatprep.subr.bf16.mxu1 %v7331_v10  ;;  %v3917_v39 = vrot.slane %v3893_v47, 3  ;;  %v8393_v10 = vld [vmem:[%s11231_s28 + $0x500] sm:$0xff]  }
 0x635   :  { %3493 = vmatprep.mubr.bf16.mxu0 %v8660_v13  ;;  %3534 = vmatprep.mubr.bf16.mxu1 %v8660_v13 }
 0x637   :  { %3464 = vmatpush1.bf16.msra.mxu0 %v7328_v8  ;;  %3505 = vmatpush1.bf16.msra.mxu1 %v7330_v52  ;;  %v8396_v8 = vld [vmem:[%s11231_s28 + $0x5c8] sm:$0xff]   ;;  %v3920_v52 = vrot.slane %v3896_v4, 3 }
 0x638   :  { %7947 = vmatprep.subr.bf16.mxu0 %v8359_v36  ;;  %7969 = vmatprep.subr.bf16.mxu1 %v8360_v9  ;;  %v3922_v36 = vrot.slane %v3898_v62, 3  ;;  %v8397_v9 = vld [vmem:[%s11231_s28 + $0x508] sm:$0xff]  }
 0x63a   :  { %7338 = vmatmul.mubr.msk.bf16.vlgmr.msra.gmra.mrb[52].mxu0 %vm1205_vm1, %v9954_v26  ;;  %7339 = vmatmul.mubr.msk.bf16.vlgmr.msra.gmra.mrb[52].mxu1 %vm1205_vm1, %v9954_v26  ;;  %v8369_v26 = vld [vmem:[%s11231_s28 + $0x410] sm:$0xff]  }
 0x63b   :  { %7948 = vmatpush3.bf16.msra.mxu0 %v8361_v12  ;;  %7970 = vmatpush3.bf16.msra.mxu1 %v8362_v16  ;;  %v8400_v12 = vld [vmem:[%s11231_s28 + $0x5d0] sm:$0xff]  }
 0x63c   :  { %7949 = vmatprep.subr.bf16.mxu0 %v8363_v17  ;;  %7971 = vmatprep.subr.bf16.mxu1 %v8364_v20  ;;  %v8401_v16 = vld [vmem:[%s11231_s28 + $0x510] sm:$0xff]   ;;  %v8403_v20 = vld [vmem:[%s11231_s28 + $0x558] sm:$0xff]  }
 0x63d   :  { %4347 = vmatprep.mubr.bf16.mxu0 %v3916_v60  ;;  %4387 = vmatprep.mubr.bf16.mxu1 %v3918_v22  ;;  %v8402_v17 = vld [vmem:[%s11231_s28 + $0x590] sm:$0xff]   ;;  %v8404_v60 = vld [vmem:[%s11231_s28 + $0x5d8] sm:$0xff]  }
 0x63e   :  { %v8405_v22 = vld [vmem:[%s11231_s28 + $0x518] sm:$0xff]  }
 0x63f   :  { %7950 = vmatpush3.bf16.msra.mxu0 %v8365_v53  ;;  %7972 = vmatpush3.bf16.msra.mxu1 %v8366_v27  ;;  %v8406_v53 = vld [vmem:[%s11231_s28 + $0x598] sm:$0xff]   ;;  %v8407_v27 = vld [vmem:[%s11231_s28 + $0x560] sm:$0xff]  }
 0x640   :  { %7951 = vmatprep.subr.bf16.mxu0 %v8367_v14  ;;  %7973 = vmatprep.subr.bf16.mxu1 %v8368_v25  ;;  %v8408_v14 = vld [vmem:[%s11231_s28 + $0x5e0] sm:$0xff]  }
 0x641   :  { %v8409_v25 = vld [vmem:[%s11231_s28 + $0x520] sm:$0xff]  }
 0x643   :  { %7952 = vmatpush3.bf16.msra.mxu0 %v8369_v26  ;;  %7974 = vmatpush3.bf16.msra.mxu1 %v8370_v28  ;;  %v8410_v26 = vld [vmem:[%s11231_s28 + $0x5a0] sm:$0xff]   ;;  %v8411_v28 = vld [vmem:[%s11231_s28 + $0x568] sm:$0xff]  }
 0x644   :  { %7953 = vmatprep.subr.bf16.mxu0 %v8371_v55  ;;  %7975 = vmatprep.subr.bf16.mxu1 %v8372_v30  ;;  %v8412_v55 = vld [vmem:[%s11231_s28 + $0x5e8] sm:$0xff]  }
 0x645   :  { %v8413_v30 = vld [vmem:[%s11231_s28 + $0x528] sm:$0xff]  }
 0x647   :  { %7954 = vmatpush3.bf16.msra.mxu0 %v8373_v29  ;;  %7976 = vmatpush3.bf16.msra.mxu1 %v8374_v24  ;;  %v8414_v29 = vld [vmem:[%s11231_s28 + $0x5a8] sm:$0xff]   ;;  %v8415_v24 = vld [vmem:[%s11231_s28 + $0x570] sm:$0xff]  }
 0x648   :  { %7955 = vmatprep.subr.bf16.mxu0 %v8375_v15  ;;  %7977 = vmatprep.subr.bf16.mxu1 %v8376_v33  ;;  %v8416_v15 = vld [vmem:[%s11231_s28 + $0x5f0] sm:$0xff]  }
 0x649   :  { %v8417_v33 = vld [vmem:[%s11231_s28 + $0x530] sm:$0xff]  }
 0x64b   :  { %7956 = vmatpush3.bf16.msra.mxu0 %v8377_v63  ;;  %7978 = vmatpush3.bf16.msra.mxu1 %v8378_v61  ;;  %v8418_v63 = vld [vmem:[%s11231_s28 + $0x5b0] sm:$0xff]   ;;  %v3758_v61 = vld [vmem:[%s11205_s22 + $0x20] sm:$0xc0] }
 0x64c   :  { %7957 = vmatprep.subr.bf16.mxu0 %v8379_v45  ;;  %7979 = vmatprep.subr.bf16.mxu1 %v8380_v18  ;;  %v3760_v45 = vld [vmem:[%s11205_s22 + $0x30] sm:$0xc0]  ;;  %v8419_v18 = vld [vmem:[%s11231_s28 + $0x578] sm:$0xff]  }
 0x64f   :  { %7958 = vmatpush3.bf16.msra.mxu0 %v8381_v19  ;;  %7980 = vmatpush3.bf16.msra.mxu1 %v8382_v37  ;;  %v8420_v19 = vld [vmem:[%s11231_s28 + $0x5f8] sm:$0xff]   ;;  %v3895_v37 = vpack.c.bf16 %v3758_v61, %v3758_v61 }
 0x650   :  { %7959 = vmatprep.subr.bf16.mxu0 %v8383_v38  ;;  %7981 = vmatprep.subr.bf16.mxu1 %v8384_v40  ;;  %v3897_v38 = vpack.c.bf16 %v3760_v45, %v3760_v45  ;;  %v8421_v40 = vld [vmem:[%s11231_s28 + $0x538] sm:$0xff]  }
 0x652   :  { %v3921_v21 = vrot.slane %v3897_v38, 3 }
 0x653   :  { %7960 = vmatpush3.bf16.msra.mxu0 %v8385_v41  ;;  %7982 = vmatpush3.bf16.msra.mxu1 %v8386_v42  ;;  %v8422_v41 = vld [vmem:[%s11231_s28 + $0x5b8] sm:$0xff]   ;;  %v3919_v42 = vrot.slane %v3895_v37, 3  ;;  %s10352_s28 = sld [smem:[#allocation9 + $0x1]] }
 0x654   :  { %7961 = vmatprep.subr.bf16.mxu0 %v8387_v43  ;;  %7983 = vmatprep.subr.bf16.mxu1 %v8388_v44  ;;  %v8424_v43 = vld [vmem:[%s11234_s1 + $0x28] sm:$0xff]   ;;  %v7298_v44 = vld [vmem:[%s11196_s13 + $0x10] sm:$0xff] }
 0x655   :  { %v2975_v46 = vrot.slane %v7298_v44, %v9616_v31  ;;  %v2983_v47 = vrot.slane %v7298_v44, %v9619_v32  ;;  %v2979_v0 = vrot.slane %v7298_v44, %v9627_v34  ;;  %v2987_v48 = vrot.slane %v7298_v44, %v9630_v35 }
 0x657   :  { %7962 = vmatpush3.bf16.msra.mxu0 %v8389_v49  ;;  %7984 = vmatpush3.bf16.msra.mxu1 %v8390_v50 }
 0x658   :  { %7991 = vmatprep.subr.bf16.mxu0 %v8391_v2  ;;  %8013 = vmatprep.subr.bf16.mxu1 %v8392_v1 }
 0x65a   :  { %4348 = vmatmul.mubr.bf16.vlgmr.msra.gmra.mrb[56].mxu0 %v3915_v7  ;;  %4388 = vmatmul.mubr.bf16.vlgmr.msra.gmra.mrb[56].mxu1 %v3917_v39 }
 0x65b   :  { %7992 = vmatpush3.bf16.msra.mxu0 %v8393_v10  ;;  %8014 = vmatpush3.bf16.msra.mxu1 %v8394_v6 }
 0x65c   :  { %7993 = vmatprep.subr.bf16.mxu0 %v8395_v56  ;;  %8015 = vmatprep.subr.bf16.mxu1 %v8396_v8 }
 0x65d   :  { %4427 = vmatprep.mubr.bf16.mxu0 %v3920_v52  ;;  %4467 = vmatprep.mubr.bf16.mxu1 %v3922_v36 }
 0x65f   :  { %7994 = vmatpush3.bf16.msra.mxu0 %v8397_v9  ;;  %8016 = vmatpush3.bf16.msra.mxu1 %v8398_v11 }
 0x660   :  { %7995 = vmatprep.subr.bf16.mxu0 %v8399_v23  ;;  %8017 = vmatprep.subr.bf16.mxu1 %v8400_v12  ;;  %v2991_v23 = vrot.slane %v7298_v44, %v9651_v51  ;;  %v2999_v12 = vrot.slane %v7298_v44, %v9659_v58 }
 0x663   :  { %7996 = vmatpush3.bf16.msra.mxu0 %v8401_v16  ;;  %8018 = vmatpush3.bf16.msra.mxu1 %v8402_v17  ;;  %v2995_v16 = vrot.slane %v7298_v44, %v9662_v59  ;;  %v3003_v17 = vrot.slane %v7298_v44, %v9672_v3 }
 0x664   :  { %7997 = vmatprep.subr.bf16.mxu0 %v8403_v20  ;;  %8019 = vmatprep.subr.bf16.mxu1 %v8404_v60 }
 0x667   :  { %7998 = vmatpush3.bf16.msra.mxu0 %v8405_v22  ;;  %8020 = vmatpush3.bf16.msra.mxu1 %v8406_v53 }
 0x668   :  { %7999 = vmatprep.subr.bf16.mxu0 %v8407_v27  ;;  %8021 = vmatprep.subr.bf16.mxu1 %v8408_v14 }
 0x66b   :  { %8000 = vmatpush3.bf16.msra.mxu0 %v8409_v25  ;;  %8022 = vmatpush3.bf16.msra.mxu1 %v8410_v26 }
 0x66c   :  { %8001 = vmatprep.subr.bf16.mxu0 %v8411_v28  ;;  %8023 = vmatprep.subr.bf16.mxu1 %v8412_v55 }
 0x66f   :  { %8002 = vmatpush3.bf16.msra.mxu0 %v8413_v30  ;;  %8024 = vmatpush3.bf16.msra.mxu1 %v8414_v29  ;;  %v7299_v30 = vld [vmem:[%s11196_s13 + $0x18] sm:$0xff] }
 0x670   :  { %8003 = vmatprep.subr.bf16.mxu0 %v8415_v24  ;;  %8025 = vmatprep.subr.bf16.mxu1 %v8416_v15  ;;  %v3007_v45 = vrot.slane %v7299_v30, %v9616_v31  ;;  %v3019_v37 = vrot.slane %v7299_v30, %v9630_v35 }
 0x673   :  { %8004 = vmatpush3.bf16.msra.mxu0 %v8417_v33  ;;  %8026 = vmatpush3.bf16.msra.mxu1 %v8418_v63 }
 0x674   :  { %8005 = vmatprep.subr.bf16.mxu0 %v8419_v18  ;;  %8027 = vmatprep.subr.bf16.mxu1 %v8420_v19  ;;  %v3015_v18 = vrot.slane %v7299_v30, %v9619_v32  ;;  %v3011_v19 = vrot.slane %v7299_v30, %v9627_v34 }
 0x677   :  { %8006 = vmatpush3.bf16.msra.mxu0 %v8421_v40  ;;  %8028 = vmatpush3.bf16.msra.mxu1 %v8422_v41 }
 0x678   :  { %8171 = vmatprep.subr.bf16.mxu0 %v8658_v5  ;;  %8179 = vmatprep.subr.bf16.mxu1 %v8658_v5 }
 0x67a   :  { %4428 = vmatmul.mubr.bf16.vlgmr.msra.gmra.mrb[60].mxu0 %v3919_v42  ;;  %4468 = vmatmul.mubr.bf16.vlgmr.msra.gmra.mrb[60].mxu1 %v3921_v21 }
 0x67b   :  { %8175 = vmatprep.mubr.msk.bf16.mxu0 %vm8659_vm0, %v8658_v5  ;;  %8183 = vmatprep.mubr.msk.bf16.mxu1 %vm8659_vm0, %v8658_v5 }
 0x67c   :  { %8172 = vmatpush3.bf16.msra.mxu0 %v8423_v54 }
 0x67d   :  { %8173 = vmatprep.subr.bf16.mxu0 %v8658_v5 }
 0x680   :  { %8174 = vmatpush3.bf16.msra.mxu0 %v8424_v43 }
 0x6f5   :  { %v3249_v49 = vpop.f32.mrb[40].mxu0  ;;  %v3290_v50 = vpop.f32.mrb[40].mxu1 }
 0x6f6   :  { %v10262_v2 = vadd.f32 %v3249_v49, %v2975_v46  ;;  %v10264_v1 = vadd.f32 %v3290_v50, %v2983_v47  ;;  %v3251_v4 = vpop.f32.mrb[41].mxu0  ;;  %v3292_v62 = vpop.f32.mrb[41].mxu1 }
 0x6f7   :  { %v10266_v7 = vadd.f32 %v3251_v4, %v2979_v0  ;;  %v10268_v39 = vadd.f32 %v3292_v62, %v2987_v48  ;;  %v3253_v10 = vpop.f32.mrb[42].mxu0  ;;  %v3294_v6 = vpop.f32.mrb[42].mxu1  ;;  %v3575_v4 = vld [vmem:[%s11205_s22] sm:$0xc] }
 0x6f8   :  { %v3551_v56 = vrot.slane %v10262_v2, 6  ;;  %v3553_v8 = vrot.slane %v10264_v1, 6  ;;  %v3254_v52 = vpop.f32.mrb[43].mxu0  ;;  %v3295_v36 = vpop.f32.mrb[43].mxu1  ;;  %v3577_v6 = vld [vmem:[%s11205_s22 + $0x10] sm:$0xc] }
 0x6f9   :  { %v3552_v9 = vrot.slane %v10266_v7, 6  ;;  %v3554_v11 = vrot.slane %v10268_v39, 6  ;;  %v3579_v1 = vld [vmem:[%s11205_s22 + $0x20] sm:$0xc] }
 0x6fa   :  { %3567 = vst [vmem:[%s11206_s23] sm:$0xc] %v3551_v56  ;;  %3569 = vst [vmem:[%s11206_s23 + $0x10] sm:$0xc] %v3553_v8 }
 0x6fb   :  { %3568 = vst [vmem:[%s11206_s23 + $0x8] sm:$0xc] %v3552_v9  ;;  %3570 = vst [vmem:[%s11206_s23 + $0x18] sm:$0xc] %v3554_v11 }
 0x6fd   :  { %v3331_v20 = vpop.f32.mrb[44].mxu0  ;;  %v3372_v60 = vpop.f32.mrb[44].mxu1 }
 0x6fe   :  { %v10298_v22 = vadd.f32 %v3331_v20, %v2991_v23  ;;  %v10300_v53 = vadd.f32 %v3372_v60, %v2999_v12  ;;  %v3333_v27 = vpop.f32.mrb[45].mxu0  ;;  %v3374_v14 = vpop.f32.mrb[45].mxu1  ;;  %v3023_v23 = vrot.slane %v7299_v30, %v9651_v51  ;;  %v3031_v12 = vrot.slane %v7299_v30, %v9659_v58 }
 0x6ff   :  { %v10302_v25 = vadd.f32 %v3333_v27, %v2995_v16  ;;  %v10304_v26 = vadd.f32 %v3374_v14, %v3003_v17  ;;  %v3335_v28 = vpop.f32.mrb[46].mxu0  ;;  %v3376_v55 = vpop.f32.mrb[46].mxu1  ;;  %v3576_v16 = vld [vmem:[%s11205_s22 + $0x8] sm:$0xc]  ;;  %v3027_v60 = vrot.slane %v7299_v30, %v9662_v59  ;;  %v3035_v27 = vrot.slane %v7299_v30, %v9672_v3 }
 0x700   :  { %v3555_v29 = vrot.slane %v10298_v22, 6  ;;  %v3557_v24 = vrot.slane %v10300_v53, 6  ;;  %v3336_v15 = vpop.f32.mrb[47].mxu0  ;;  %v3377_v33 = vpop.f32.mrb[47].mxu1  ;;  %v3583_v14 = vsub.f32 %v3575_v4, %v3551_v56  ;;  %v3585_v28 = vsub.f32 %v3577_v6, %v3553_v8  ;;  %v3578_v55 = vld [vmem:[%s11205_s22 + $0x18] sm:$0xc] }
 0x701   :  { %v3556_v63 = vrot.slane %v10302_v25, 6  ;;  %v3558_v61 = vrot.slane %v10304_v26, 6  ;;  %v3581_v8 = vld [vmem:[%s11205_s22 + $0x30] sm:$0xc] }
 0x702   :  { %3571 = vst [vmem:[%s11206_s23 + $0x20] sm:$0xc] %v3555_v29  ;;  %3573 = vst [vmem:[%s11206_s23 + $0x30] sm:$0xc] %v3557_v24 }
 0x703   :  { %3572 = vst [vmem:[%s11206_s23 + $0x28] sm:$0xc] %v3556_v63  ;;  %3574 = vst [vmem:[%s11206_s23 + $0x38] sm:$0xc] %v3558_v61 }
 0x705   :  { %v3413_v38 = vpop.f32.mrb[48].mxu0  ;;  %v3454_v40 = vpop.f32.mrb[48].mxu1 }
 0x706   :  { %v10337_v41 = vadd.f32 %v3413_v38, %v3007_v45  ;;  %v10339_v42 = vadd.f32 %v3454_v40, %v3015_v18  ;;  %v3415_v21 = vpop.f32.mrb[49].mxu0  ;;  %v3456_v54 = vpop.f32.mrb[49].mxu1  ;;  %v3584_v45 = vsub.f32 %v3576_v16, %v3552_v9  ;;  %v3619_v38 = vstv %s10345_s4  ;;  %s3600_s4 = smul.f32 0.5, %s10352_s28 }
 0x707   :  { %v10341_v43 = vadd.f32 %v3415_v21, %v3011_v19  ;;  %v10343_v44 = vadd.f32 %v3456_v54, %v3019_v37  ;;  %v3417_v46 = vpop.f32.mrb[50].mxu0  ;;  %v3458_v47 = vpop.f32.mrb[50].mxu1  ;;  %v3586_v40 = vsub.f32 %v3578_v55, %v3554_v11  ;;  %v3580_v21 = vld [vmem:[%s11205_s22 + $0x28] sm:$0xc] }
 0x708   :  { %v3628_v0 = vsub.f32 0.0, %v10337_v41  ;;  %v3630_v48 = vsub.f32 0.0, %v10339_v42  ;;  %v3418_v49 = vpop.f32.mrb[51].mxu0  ;;  %v3459_v50 = vpop.f32.mrb[51].mxu1  ;;  %v3612_v4 = vmul.f32 %v3584_v45, %v3584_v45  ;;  %v3591_v26 = vmul.f32 0.5, %v10337_v41 }
 0x709   :  { %v3629_v62 = vsub.f32 0.0, %v10341_v43  ;;  %v3631_v10 = vsub.f32 0.0, %v10343_v44  ;;  %v3613_v49 = vmul.f32 %v3585_v28, %v3585_v28  ;;  %v3582_v50 = vld [vmem:[%s11205_s22 + $0x38] sm:$0xc]  ;;  %v3614_v16 = vmul.f32 %v3586_v40, %v3586_v40 }
 0x70a   :  { %v3636_v52 = vmul.f32 1.442695, %v3628_v0  ;;  %v3640_v36 = vmul.f32 1.442695, %v3630_v48  ;;  %v3611_v48 = vmul.f32 %v3583_v14, %v3583_v14 }
 0x70b   :  { %v3638_v17 = vmul.f32 1.442695, %v3629_v62  ;;  %v3642_v20 = vmul.f32 1.442695, %v3631_v10  ;;  %v3587_v62 = vsub.f32 %v3579_v1, %v3555_v29  ;;  %v3622_v29 = vadd.f32 %v3619_v38, %v3613_v49 }
 0x70c   :  { %8515 = vpow2.f32 %v3636_v52  ;;  %v3589_v52 = vsub.f32 %v3581_v8, %v3557_v24  ;;  %v3623_v55 = vadd.f32 %v3619_v38, %v3614_v16 }
 0x70d   :  { %8517 = vpow2.f32 %v3640_v36  ;;  %v3495_v15 = vpop.f32.mrb[52].mxu0  ;;  %v3536_v33 = vpop.f32.mrb[52].mxu1  ;;  %v3588_v36 = vsub.f32 %v3580_v21, %v3556_v63  ;;  %v3615_v14 = vmul.f32 %v3587_v62, %v3587_v62 }
 0x70e   :  { %8519 = vpow2.f32 %v3638_v17  ;;  %v10375_v30 = vadd.f32 %v3495_v15, %v3023_v23  ;;  %v10377_v18 = vadd.f32 %v3536_v33, %v3031_v12  ;;  %v3497_v2 = vpop.f32.mrb[53].mxu0  ;;  %v3538_v56 = vpop.f32.mrb[53].mxu1  ;;  %v3590_v17 = vsub.f32 %v3582_v50, %v3558_v61 }
 0x70f   :  { %8521 = vpow2.f32 %v3642_v20  ;;  %v10385_v19 = vadd.f32 %v3497_v2, %v3027_v60  ;;  %v10387_v7 = vadd.f32 %v3538_v56, %v3035_v27  ;;  %v3499_v9 = vpop.f32.mrb[54].mxu0  ;;  %v3540_v37 = vpop.f32.mrb[54].mxu1  ;;  %v3620_v20 = vadd.f32 %v3619_v38, %v3611_v48 }
 0x710   :  { %v3632_v54 = vsub.f32 0.0, %v10375_v30  ;;  %v3634_v46 = vsub.f32 0.0, %v10377_v18  ;;  %v3500_v47 = vpop.f32.mrb[55].mxu0  ;;  %v3541_v0 = vpop.f32.mrb[55].mxu1  ;;  %v10411_v60 = vstv %s3600_s4  ;;  %v3621_v27 = vadd.f32 %v3619_v38, %v3612_v4 }
 0x711   :  { %v3633_v39 = vsub.f32 0.0, %v10385_v19  ;;  %v3635_v11 = vsub.f32 0.0, %v10387_v7  ;;  %v3617_v24 = vmul.f32 %v3589_v52, %v3589_v52  ;;  %v3616_v25 = vmul.f32 %v3588_v36, %v3588_v36 }
 0x712   :  { %v3644_v10 = vmul.f32 1.442695, %v3632_v54  ;;  %v3648_v6 = vmul.f32 1.442695, %v3634_v46  ;;  %v3618_v15 = vmul.f32 %v3590_v17, %v3590_v17  ;;  %v3593_v2 = vmul.f32 0.5, %v10339_v42 }
 0x713   :  { %v3646_v23 = vmul.f32 1.442695, %v3633_v39  ;;  %v3650_v12 = vmul.f32 1.442695, %v3635_v11  ;;  %v3592_v56 = vmul.f32 0.5, %v10341_v43  ;;  %v3624_v8 = vadd.f32 %v3619_v38, %v3615_v14 }
 0x714   :  { %8523 = vpow2.f32 %v3644_v10  ;;  %v3594_v37 = vmul.f32 0.5, %v10343_v44  ;;  %v3626_v21 = vadd.f32 %v3619_v38, %v3617_v24  ;;  %v3625_v54 = vadd.f32 %v3619_v38, %v3616_v25 }
 0x715   :  { %8525 = vpow2.f32 %v3648_v6  ;;  %v3627_v0 = vadd.f32 %v3619_v38, %v3618_v15  ;;  %v3602_v41 = vsub.f32 %v3591_v26, %v10411_v60  ;;  %v3604_v42 = vsub.f32 %v3593_v2, %v10411_v60 }
 0x716   :  { %v8516_v22 = vpop.eup %8515  ;;  %8527 = vpow2.f32 %v3646_v23  ;;  %v3603_v43 = vsub.f32 %v3592_v56, %v10411_v60  ;;  %v3605_v44 = vsub.f32 %v3594_v37, %v10411_v60  ;;  %v3595_v10 = vmul.f32 0.5, %v10375_v30 }
 0x717   :  { %v8518_v53 = vpop.eup %8517  ;;  %v3652_v63 = vmul.f32 0.5, %v8516_v22  ;;  %8529 = vpow2.f32 %v3650_v12  ;;  %v3597_v23 = vmul.f32 0.5, %v10377_v18  ;;  %v3596_v22 = vmul.f32 0.5, %v10385_v19 }
 0x718   :  { %v8520_v28 = vpop.eup %8519  ;;  %v3654_v61 = vmul.f32 0.5, %v8518_v53 }
 0x719   :  { %v8522_v33 = vpop.eup %8521  ;;  %v3668_v45 = vrot.slane %v3652_v63, 6  ;;  %v3653_v1 = vmul.f32 0.5, %v8520_v28 }
 0x71a   :  { %v3670_v9 = vrot.slane %v3654_v61, 6  ;;  %v3655_v40 = vmul.f32 0.5, %v8522_v33  ;;  %v3606_v61 = vsub.f32 %v3595_v10, %v10411_v60  ;;  %v3598_v33 = vmul.f32 0.5, %v10387_v7 }
 0x71b   :  { %v3684_v46 = vmul.f32 %v3668_v45, %v3620_v20  ;;  %v3669_v47 = vrot.slane %v3653_v1, 6 }
 0x71c   :  { %v3686_v48 = vmul.f32 %v3670_v9, %v3622_v29  ;;  %v3671_v49 = vrot.slane %v3655_v40, 6  ;;  %v3608_v40 = vsub.f32 %v3597_v23, %v10411_v60  ;;  %v3609_v7 = vsub.f32 %v3598_v33, %v10411_v60 }
 0x71d   :  { %v3700_v50 = vrot.slane %v3684_v46, 2  ;;  %v3685_v39 = vmul.f32 %v3669_v47, %v3621_v27 }
 0x71e   :  { %v8524_v11 = vpop.eup %8523  ;;  %v3702_v4 = vrot.slane %v3686_v48, 2  ;;  %v3687_v62 = vmul.f32 %v3671_v49, %v3623_v55  ;;  %v3607_v48 = vsub.f32 %v3596_v22, %v10411_v60  ;;  %v7479_v60 = vld [vmem:[%s11235_s29 + $0x2] ss:$0 sm:$0xff] }
 0x71f   :  { %v8526_v6 = vpop.eup %8525  ;;  %v3716_v52 = vadd.f32 %v3700_v50, %v3602_v41  ;;  %v3701_v38 = vrot.slane %v3685_v39, 2  ;;  %v3656_v36 = vmul.f32 0.5, %v8524_v11 }
 0x720   :  { %v8528_v12 = vpop.eup %8527  ;;  %v3718_v16 = vadd.f32 %v3702_v4, %v3604_v42  ;;  %v3703_v17 = vrot.slane %v3687_v62, 2  ;;  %v3658_v20 = vmul.f32 0.5, %v8526_v6 }
 0x721   :  { %v8530_v29 = vpop.eup %8529  ;;  %v7342_v27 = vadd.f32 -0.5, %v3716_v52  ;;  %v3717_v14 = vadd.f32 %v3701_v38, %v3603_v43  ;;  %v3672_v53 = vrot.slane %v3656_v36, 6  ;;  %v3657_v24 = vmul.f32 0.5, %v8528_v12 }
 0x722   :  { %v7344_v25 = vadd.f32 -0.5, %v3718_v16  ;;  %v3719_v63 = vadd.f32 %v3703_v17, %v3605_v44  ;;  %v3674_v30 = vrot.slane %v3658_v20, 6  ;;  %v3659_v28 = vmul.f32 0.5, %v8530_v29 }
 0x723   :  { %v3732_v55 = vsel %vm2045_vm3, %v7342_v27, 0.0  ;;  %v7343_v15 = vadd.f32 -0.5, %v3717_v14  ;;  %v3688_v26 = vmul.f32 %v3672_v53, %v3624_v8  ;;  %v3673_v18 = vrot.slane %v3657_v24, 6 }
 0x724   :  { %v3675_v45 = vrot.slane %v3659_v28, 6  ;;  %v3690_v19 = vmul.f32 %v3674_v30, %v3626_v21  ;;  %v7345_v56 = vadd.f32 -0.5, %v3719_v63  ;;  %v3735_v41 = vsel %vm2045_vm3, %v7344_v25, 0.0 }
 0x725   :  { %v3733_v2 = vsel %vm2045_vm3, %v7343_v15, 0.0  ;;  %v3704_v1 = vrot.slane %v3688_v26, 2  ;;  %v3689_v9 = vmul.f32 %v3673_v18, %v3625_v54 }
 0x726   :  { %v3734_v37 = vadd.f32 %v3733_v2, %v3732_v55  ;;  %v3691_v46 = vmul.f32 %v3675_v45, %v3627_v0  ;;  %v3706_v47 = vrot.slane %v3690_v19, 2  ;;  %v3737_v54 = vsel %vm2045_vm3, %v7345_v56, 0.0 }
 0x727   :  { %v3720_v8 = vadd.f32 %v3704_v1, %v3606_v61  ;;  %v3705_v49 = vrot.slane %v3689_v9, 2 }
 0x728   :  { %v3707_v50 = vrot.slane %v3691_v46, 2  ;;  %v3722_v21 = vadd.f32 %v3706_v47, %v3608_v40  ;;  %v3736_v42 = vadd.f32 %v3735_v41, %v3734_v37  ;;  %v8425_v47 = vld [vmem:[%s11193_s10 + $0x20] sm:$0xff]   ;;  %v8426_v41 = vld [vmem:[%s11193_s10 + $0x28] sm:$0xff]  }
 0x729   :  { %v7346_v43 = vadd.f32 -0.5, %v3720_v8  ;;  %v3721_v39 = vadd.f32 %v3705_v49, %v3607_v48  ;;  %8180 = vmatpush3.bf16.msra.mxu1 %v8425_v47  ;;  %v7549_v8 = vld [vmem:[%s11236_s26 + $0x2] ss:$0 sm:$0xff]  ;;  %v7575_v47 = vld [vmem:[%s11195_s12 + $0x268] sm:$0xff]  ;;  %s10904_s26 = sld [smem:[#allocation8 + $0x2]] }
 0x72a   :  { %v3723_v11 = vadd.f32 %v3707_v50, %v3609_v7  ;;  %v3738_v4 = vadd.f32 %v3737_v54, %v3736_v42  ;;  %v7348_v0 = vadd.f32 -0.5, %v3722_v21  ;;  %8181 = vmatprep.subr.bf16.mxu1 %v8658_v5  ;;  %v7562_v54 = vld [vmem:[%s11195_s12 + $0x200] sm:$0xff] }
 0x72b   :  { %v7347_v44 = vadd.f32 -0.5, %v3721_v39  ;;  %v3739_v62 = vsel %vm2045_vm3, %v7346_v43, 0.0 }
 0x72c   :  { %v3740_v10 = vadd.f32 %v3739_v62, %v3738_v4  ;;  %v7349_v38 = vadd.f32 -0.5, %v3723_v11  ;;  %v3743_v27 = vsel %vm2045_vm3, %v7348_v0, 0.0  ;;  %v7570_v11 = vld [vmem:[%s11195_s12 + $0x240] sm:$0xff]  ;;  %v7563_v4 = vld [vmem:[%s11195_s12 + $0x208] sm:$0xff] }
 0x72d   :  { %v7963_v6 = vpop.f32.mrb[56].mxu0  ;;  %v7985_v52 = vpop.f32.mrb[56].mxu1  ;;  %v3741_v36 = vsel %vm2045_vm3, %v7347_v44, 0.0  ;;  %8182 = vmatpush3.bf16.msra.mxu1 %v8426_v41  ;;  %v7597_v44 = vcombine.high %v7562_v54, %v7570_v11  ;;  %v7571_v0 = vld [vmem:[%s11195_s12 + $0x248] sm:$0xff]  ;;  %v7596_v62 = vcombine.low %v7562_v54, %v7570_v11 }
 0x72e   :  { %v7964_v23 = vpop.f32.mrb[57].mxu0  ;;  %v7986_v12 = vpop.f32.mrb[57].mxu1  ;;  %v3742_v16 = vadd.f32 %v3741_v36, %v3740_v10  ;;  %v3745_v63 = vsel %vm2045_vm3, %v7349_v38, 0.0  ;;  %v7598_v10 = vcombine.low %v7563_v4, %v7571_v0  ;;  %v7586_v38 = vld [vmem:[%s11195_s12 + $0x2c0] sm:$0xff]  ;;  %v7579_v36 = vld [vmem:[%s11195_s12 + $0x288] sm:$0xff] }
 0x72f   :  { %v7965_v17 = vadd.f32 %v7964_v23, %v7963_v6  ;;  %v7987_v20 = vadd.f32 %v7986_v12, %v7985_v52  ;;  %v7966_v22 = vpop.f32.mrb[58].mxu0  ;;  %v7988_v29 = vpop.f32.mrb[58].mxu1  ;;  %v7599_v6 = vcombine.high %v7563_v4, %v7571_v0  ;;  %4901 = vmatprep.subr.bf16.mxu0 %v7597_v44  ;;  %v7578_v52 = vld [vmem:[%s11195_s12 + $0x280] sm:$0xff]  ;;  %v7587_v23 = vld [vmem:[%s11195_s12 + $0x2c8] sm:$0xff]  ;;  %v7568_v4 = vld [vmem:[%s11195_s12 + $0x230] sm:$0xff] }
 0x730   :  { %v7967_v14 = vpop.f32.mrb[59].mxu0  ;;  %v7989_v53 = vpop.f32.mrb[59].mxu1  ;;  %v3744_v24 = vadd.f32 %v3743_v27, %v3742_v16  ;;  %v7612_v12 = vcombine.low %v7578_v52, %v7586_v38  ;;  %v7614_v16 = vcombine.low %v7579_v36, %v7587_v23  ;;  %v7572_v22 = vld [vmem:[%s11195_s12 + $0x250] sm:$0xff]  ;;  %v7565_v29 = vld [vmem:[%s11195_s12 + $0x218] sm:$0xff] }
 0x731   :  { %v4350_v25 = vadd.f32 %v7965_v17, %v7479_v60  ;;  %4942 = vmatprep.subr.bf16.mxu1 %v7599_v6  ;;  %v7613_v60 = vcombine.high %v7578_v52, %v7586_v38  ;;  %v7615_v17 = vcombine.high %v7579_v36, %v7587_v23  ;;  %v7573_v53 = vld [vmem:[%s11195_s12 + $0x258] sm:$0xff]  ;;  %v7576_v44 = vld [vmem:[%s11195_s12 + $0x270] sm:$0xff] }
 0x732   :  { %v3746_v30 = vadd.f32 %v3745_v63, %v3744_v24  ;;  %v7602_v24 = vcombine.low %v7565_v29, %v7573_v53  ;;  %v7558_v63 = vld [vmem:[%s11194_s11 + $0x2] ss:$0 sm:$0xff]  ;;  %v7569_v0 = vld [vmem:[%s11195_s12 + $0x238] sm:$0xff]  ;;  %v7609_v52 = vcombine.high %v7568_v4, %v7576_v44  ;;  %v7584_v36 = vld [vmem:[%s11195_s12 + $0x2b0] sm:$0xff]  ;;  %s5286_s11 = smul.f32 0.5, %s10911_s25 }
 0x733   :  { %v4390_v28 = vadd.f32 %v7987_v20, %v4350_v25  ;;  %v7564_v20 = vld [vmem:[%s11195_s12 + $0x210] sm:$0xff]  ;;  %v7603_v25 = vcombine.high %v7565_v29, %v7573_v53  ;;  %v7585_v23 = vld [vmem:[%s11195_s12 + $0x2b8] sm:$0xff]  ;;  %v8428_v53 = vld [vmem:[%s11197_s14 + $0xc0] sm:$0xff]  }
 0x734   :  { %3747 = vadd.xlane.f32.xlu1 %v3746_v30  ;;  %v7600_v27 = vcombine.low %v7564_v20, %v7572_v22  ;;  %v7601_v14 = vcombine.high %v7564_v20, %v7572_v22 }
 0x74d   :  { %v8007_v55 = vpop.f32.mrb[60].mxu0  ;;  %v8029_v15 = vpop.f32.mrb[60].mxu1 }
 0x74e   :  { %v8008_v26 = vpop.f32.mrb[61].mxu0  ;;  %v8030_v18 = vpop.f32.mrb[61].mxu1 }
 0x74f   :  { %v8009_v61 = vadd.f32 %v8008_v26, %v8007_v55  ;;  %v8031_v33 = vadd.f32 %v8030_v18, %v8029_v15  ;;  %v8010_v45 = vpop.f32.mrb[62].mxu0  ;;  %v8032_v19 = vpop.f32.mrb[62].mxu1 }
 0x750   :  { %v8011_v2 = vpop.f32.mrb[63].mxu0  ;;  %v8033_v56 = vpop.f32.mrb[63].mxu1  ;;  %v7581_v45 = vld [vmem:[%s11195_s12 + $0x298] sm:$0xff] }
 0x751   :  { %v4430_v1 = vadd.f32 %v8009_v61, %v4390_v28  ;;  %v7580_v61 = vld [vmem:[%s11195_s12 + $0x290] sm:$0xff]  ;;  %v7589_v19 = vld [vmem:[%s11195_s12 + $0x2d8] sm:$0xff] }
 0x753   :  { %v4470_v9 = vadd.f32 %v8031_v33, %v4430_v1  ;;  %v7588_v33 = vld [vmem:[%s11195_s12 + $0x2d0] sm:$0xff] }
 0x754   :  { %v7617_v1 = vcombine.high %v7580_v61, %v7588_v33  ;;  %v7616_v41 = vcombine.low %v7580_v61, %v7588_v33  ;;  %v8434_v61 = vld [vmem:[%s11197_s14 + $0x88] sm:$0xff]   ;;  %v8435_v33 = vld [vmem:[%s11197_s14 + $0x50] sm:$0xff]  }
 0x755   :  { %v4475_v37 = vmul.f32 0.01, %v4470_v9 }
 0x757   :  { %v4476_v40 = vmax.f32 %v4470_v9, %v4475_v37  ;;  %v7619_v9 = vcombine.high %v7581_v45, %v7589_v19  ;;  %v7566_v37 = vld [vmem:[%s11195_s12 + $0x220] sm:$0xff] }
 0x759   :  { %v4482_v46 = vpack.c.bf16 %v4476_v40, %v4476_v40  ;;  %v7574_v40 = vld [vmem:[%s11195_s12 + $0x260] sm:$0xff] }
 0x75b   :  { %8176 = vmatmul.mubr.msk.bf16.vlgmr.msra.gmra.mrb[64].mxu0 %vm1205_vm1, %v4482_v46  ;;  %v7567_v46 = vld [vmem:[%s11195_s12 + $0x228] sm:$0xff] }
 0x75c   :  { %4933 = vmatprep.mubr.bf16.mxu0 %v8660_v13  ;;  %4902 = vmatpush1.bf16.msra.mxu0 %v7596_v62  ;;  %v7577_v62 = vld [vmem:[%s11195_s12 + $0x278] sm:$0xff] }
 0x75d   :  { %4903 = vmatprep.subr.bf16.mxu0 %v7613_v60  ;;  %v7611_v38 = vcombine.high %v7569_v0, %v7577_v62  ;;  %v7592_v60 = vld [vmem:[%s11195_s12 + $0x2f0] sm:$0xff] }
 0x75e   :  { %v7625_v20 = vcombine.high %v7584_v36, %v7592_v60  ;;  %v7624_v29 = vcombine.low %v7584_v36, %v7592_v60  ;;  %v5447_v36 = vld [vmem:[%s11205_s22 + $0x38] sm:$0x3]  ;;  %v8461_v60 = vld [vmem:[%s11197_s14 + $0x100] sm:$0xff]  }
 0x760   :  { %4904 = vmatpush1.bf16.msra.mxu0 %v7612_v12  ;;  %v7593_v12 = vld [vmem:[%s11195_s12 + $0x2f8] sm:$0xff] }
 0x761   :  { %4983 = vmatprep.subr.bf16.mxu0 %v7601_v14  ;;  %v7627_v22 = vcombine.high %v7585_v23, %v7593_v12  ;;  %v8427_v14 = vld [vmem:[%s11197_s14 + $0x40] sm:$0xff]  }
 0x82e   :  { %v4540_v48 = vpop.f32.mrb[64].mxu0 }
 0x82f   :  { %v4541_v49 = vadd.f32 %v7549_v8, %v4540_v48  ;;  %v8177_v7 = vpop.f32.mrb[65].mxu0  ;;  %v7618_v8 = vcombine.low %v7581_v45, %v7589_v19  ;;  %v7605_v48 = vcombine.high %v7566_v37, %v7574_v40  ;;  %v8436_v45 = vld [vmem:[%s11197_s14 + $0xd0] sm:$0xff]  }
 0x830   :  { %v4543_v50 = vpop.f32.mrb[66].mxu0  ;;  %v7582_v7 = vld [vmem:[%s11195_s12 + $0x2a0] sm:$0xff]  ;;  %v8437_v19 = vld [vmem:[%s11197_s14 + $0x10] sm:$0xff]  }
 0x831   :  { %v4546_v21 = vmul.f32 0.01, %v4541_v49  ;;  %v8178_v42 = vpop.f32.mrb[67].mxu0  ;;  %v7590_v50 = vld [vmem:[%s11195_s12 + $0x2e0] sm:$0xff] }
 0x832   :  { %v7591_v42 = vld [vmem:[%s11195_s12 + $0x2e8] sm:$0xff]  ;;  %v7621_v54 = vcombine.high %v7582_v7, %v7590_v50 }
 0x833   :  { %v4547_v43 = vmax.f32 %v4541_v49, %v4546_v21  ;;  %v7607_v49 = vcombine.high %v7567_v46, %v7575_v47  ;;  %v7583_v21 = vld [vmem:[%s11195_s12 + $0x2a8] sm:$0xff] }
 0x834   :  { %v7623_v11 = vcombine.high %v7583_v21, %v7591_v42  ;;  %v7622_v6 = vcombine.low %v7583_v21, %v7591_v42  ;;  %v8452_v21 = vld [vmem:[%s11197_s14 + $0xf0] sm:$0xff]  }
 0x835   :  { %v4553_v39 = vpack.c.bf16 %v4547_v43, %v4547_v43  ;;  %v7604_v43 = vcombine.low %v7566_v37, %v7574_v40  ;;  %v8442_v37 = vld [vmem:[%s11197_s14 + $0x98] sm:$0xff]   ;;  %v8443_v40 = vld [vmem:[%s11197_s14 + $0x60] sm:$0xff]   ;;  %v8453_v42 = vld [vmem:[%s11197_s14 + $0x30] sm:$0xff]  }
 0x837   :  { %8184 = vmatmul.mubr.msk.bf16.vlgmr.msra.gmra.mrb[64].mxu1 %vm1205_vm1, %v4553_v39  ;;  %v7606_v39 = vcombine.low %v7567_v46, %v7575_v47  ;;  %v8444_v46 = vld [vmem:[%s11197_s14 + $0xe0] sm:$0xff]  }
 0x838   :  { %4974 = vmatprep.mubr.bf16.mxu1 %v8660_v13  ;;  %4943 = vmatpush1.bf16.msra.mxu1 %v7598_v10  ;;  %v7620_v10 = vcombine.low %v7582_v7, %v7590_v50  ;;  %v8445_v47 = vld [vmem:[%s11197_s14 + $0x20] sm:$0xff]   ;;  %v8450_v7 = vld [vmem:[%s11197_s14 + $0xa8] sm:$0xff]   ;;  %v8451_v50 = vld [vmem:[%s11197_s14 + $0x70] sm:$0xff]  }
 0x839   :  { %4944 = vmatprep.subr.bf16.mxu1 %v7615_v17  ;;  %v7610_v17 = vcombine.low %v7569_v0, %v7577_v62  ;;  %v5442_v0 = vld [vmem:[%s11205_s22 + $0x10] sm:$0x3]  ;;  %v8459_v62 = vld [vmem:[%s11197_s14 + $0x140] sm:$0xff]  }
 0x83c   :  { %4945 = vmatpush1.bf16.msra.mxu1 %v7614_v16  ;;  %v7608_v16 = vcombine.low %v7568_v4, %v7576_v44  ;;  %v8458_v4 = vld [vmem:[%s11197_s14 + $0xb8] sm:$0xff]   ;;  %v5440_v44 = vld [vmem:[%s11205_s22] sm:$0x3] }
 0x83d   :  { %5024 = vmatprep.subr.bf16.mxu1 %v7603_v25  ;;  %v5443_v25 = vld [vmem:[%s11205_s22 + $0x18] sm:$0x3] }
 0x90a   :  { %v4611_v30 = vpop.f32.mrb[64].mxu1 }
 0x90b   :  { %v4612_v28 = vadd.f32 %v7558_v63, %v4611_v30  ;;  %v8185_v55 = vpop.f32.mrb[65].mxu1  ;;  %v8429_v63 = vld [vmem:[%s11197_s14] sm:$0xff]  }
 0x90c   :  { %v4614_v15 = vpop.f32.mrb[66].mxu1  ;;  %v8430_v30 = vld [vmem:[%s11197_s14 + $0x80] sm:$0xff]   ;;  %v8432_v55 = vld [vmem:[%s11197_s14 + $0xc8] sm:$0xff]  }
 0x90d   :  { %v4617_v26 = vmul.f32 0.01, %v4612_v28  ;;  %v8186_v18 = vpop.f32.mrb[67].mxu1 }
 0x90e   :  { %v8433_v18 = vld [vmem:[%s11197_s14 + $0x8] sm:$0xff]  }
 0x90f   :  { %v4618_v2 = vmax.f32 %v4612_v28, %v4617_v26  ;;  %v8431_v28 = vld [vmem:[%s11197_s14 + $0x48] sm:$0xff]   ;;  %v5579_v26 = vpack.c.bf16 %v5443_v25, %v5443_v25  ;;  %v8471_v25 = vld [vmem:[%s11197_s14 + $0x158] sm:$0xff]  }
 0x911   :  { %v10505_v56 = vpack.c.bf16 %v4618_v2, %v4618_v2  ;;  %v8438_v2 = vld [vmem:[%s11197_s14 + $0x90] sm:$0xff]  }
 0x913   :  { %7628 = vmatmul.mubr.msk.bf16.vlgmr.msra.gmra.mrb[68].mxu0 %vm1205_vm1, %v10505_v56  ;;  %7629 = vmatmul.mubr.msk.bf16.vlgmr.msra.gmra.mrb[68].mxu1 %vm1205_vm1, %v10505_v56 }
 0x914   :  { %4984 = vmatpush1.bf16.msra.mxu0 %v7600_v27  ;;  %5025 = vmatpush1.bf16.msra.mxu1 %v7602_v24  ;;  %v7626_v27 = vcombine.low %v7585_v23, %v7593_v12  ;;  %v5441_v24 = vld [vmem:[%s11205_s22 + $0x8] sm:$0x3]  ;;  %v8462_v23 = vld [vmem:[%s11197_s14 + $0x180] sm:$0xff]  }
 0x915   :  { %4985 = vmatprep.subr.bf16.mxu0 %v7617_v1  ;;  %5026 = vmatprep.subr.bf16.mxu1 %v7619_v9  ;;  %v5577_v15 = vpack.c.bf16 %v5441_v24, %v5441_v24  ;;  %v8440_v1 = vld [vmem:[%s11197_s14 + $0xd8] sm:$0xff]   ;;  %v8463_v12 = vld [vmem:[%s11197_s14 + $0x148] sm:$0xff]   ;;  %v8470_v24 = vld [vmem:[%s11197_s14 + $0x190] sm:$0xff]  }
 0x916   :  { %5015 = vmatprep.mubr.bf16.mxu0 %v8660_v13  ;;  %5056 = vmatprep.mubr.bf16.mxu1 %v8660_v13  ;;  %v8441_v9 = vld [vmem:[%s11197_s14 + $0x18] sm:$0xff]  }
 0x918   :  { %4986 = vmatpush1.bf16.msra.mxu0 %v7616_v41  ;;  %5027 = vmatpush1.bf16.msra.mxu1 %v7618_v8  ;;  %v8446_v41 = vld [vmem:[%s11197_s14 + $0xa0] sm:$0xff]   ;;  %v8447_v8 = vld [vmem:[%s11197_s14 + $0x68] sm:$0xff]  }
 0x919   :  { %5065 = vmatprep.subr.bf16.mxu0 %v7605_v48  ;;  %5106 = vmatprep.subr.bf16.mxu1 %v7607_v49  ;;  %v8448_v48 = vld [vmem:[%s11197_s14 + $0xe8] sm:$0xff]  }
 0x91a   :  { %v8449_v49 = vld [vmem:[%s11197_s14 + $0x28] sm:$0xff]  }
 0x91b   :  { %7630 = vmatmul.mubr.msk.bf16.vlgmr.msra.gmra.mrb[72].mxu0 %vm1205_vm1, %v10505_v56  ;;  %7631 = vmatmul.mubr.msk.bf16.vlgmr.msra.gmra.mrb[72].mxu1 %vm1205_vm1, %v10505_v56 }
 0x91c   :  { %5066 = vmatpush1.bf16.msra.mxu0 %v7604_v43  ;;  %5107 = vmatpush1.bf16.msra.mxu1 %v7606_v39  ;;  %v8454_v43 = vld [vmem:[%s11197_s14 + $0xb0] sm:$0xff]   ;;  %v8455_v39 = vld [vmem:[%s11197_s14 + $0x78] sm:$0xff]  }
 0x91d   :  { %5067 = vmatprep.subr.bf16.mxu0 %v7621_v54  ;;  %5108 = vmatprep.subr.bf16.mxu1 %v7623_v11  ;;  %v8456_v54 = vld [vmem:[%s11197_s14 + $0xf8] sm:$0xff]  }
 0x91e   :  { %5097 = vmatprep.mubr.bf16.mxu0 %v8660_v13  ;;  %5138 = vmatprep.mubr.bf16.mxu1 %v8660_v13  ;;  %v8457_v11 = vld [vmem:[%s11197_s14 + $0x38] sm:$0xff]  }
 0x920   :  { %5068 = vmatpush1.bf16.msra.mxu0 %v7620_v10  ;;  %5109 = vmatpush1.bf16.msra.mxu1 %v7622_v6  ;;  %v8460_v10 = vld [vmem:[%s11197_s14 + $0x1c0] sm:$0xff]   ;;  %v5576_v6 = vpack.c.bf16 %v5440_v44, %v5440_v44 }
 0x921   :  { %5147 = vmatprep.subr.bf16.mxu0 %v7609_v52  ;;  %5188 = vmatprep.subr.bf16.mxu1 %v7611_v38  ;;  %v5578_v52 = vpack.c.bf16 %v5442_v0, %v5442_v0  ;;  %v5445_v38 = vld [vmem:[%s11205_s22 + $0x28] sm:$0x3] }
 0x923   :  { %7632 = vmatmul.mubr.msk.bf16.vlgmr.msra.gmra.mrb[76].mxu0 %vm1205_vm1, %v10505_v56  ;;  %7633 = vmatmul.mubr.msk.bf16.vlgmr.msra.gmra.mrb[76].mxu1 %vm1205_vm1, %v10505_v56 }
 0x924   :  { %5148 = vmatpush1.bf16.msra.mxu0 %v7608_v16  ;;  %5189 = vmatpush1.bf16.msra.mxu1 %v7610_v17  ;;  %v8464_v16 = vld [vmem:[%s11197_s14 + $0x1c8] sm:$0xff]   ;;  %v5581_v17 = vpack.c.bf16 %v5445_v38, %v5445_v38 }
 0x925   :  { %5149 = vmatprep.subr.bf16.mxu0 %v7625_v20  ;;  %5190 = vmatprep.subr.bf16.mxu1 %v7627_v22  ;;  %v5583_v20 = vpack.c.bf16 %v5447_v36, %v5447_v36  ;;  %v8465_v22 = vld [vmem:[%s11197_s14 + $0x108] sm:$0xff]  }
 0x926   :  { %5179 = vmatprep.mubr.bf16.mxu0 %v8660_v13  ;;  %5220 = vmatprep.mubr.bf16.mxu1 %v8660_v13 }
 0x928   :  { %5150 = vmatpush1.bf16.msra.mxu0 %v7624_v29  ;;  %5191 = vmatpush1.bf16.msra.mxu1 %v7626_v27  ;;  %v8466_v29 = vld [vmem:[%s11197_s14 + $0x188] sm:$0xff]   ;;  %v8467_v27 = vld [vmem:[%s11197_s14 + $0x150] sm:$0xff]  }
 0x929   :  { %8041 = vmatprep.subr.bf16.mxu0 %v8427_v14  ;;  %8063 = vmatprep.subr.bf16.mxu1 %v8428_v53  ;;  %v8468_v14 = vld [vmem:[%s11197_s14 + $0x1d0] sm:$0xff]  }
 0x92a   :  { %v8469_v53 = vld [vmem:[%s11197_s14 + $0x110] sm:$0xff]  }
 0x92b   :  { %7634 = vmatmul.mubr.msk.bf16.vlgmr.msra.gmra.mrb[80].mxu0 %vm1205_vm1, %v10505_v56  ;;  %7635 = vmatmul.mubr.msk.bf16.vlgmr.msra.gmra.mrb[80].mxu1 %vm1205_vm1, %v10505_v56  ;;  %v8439_v56 = vld [vmem:[%s11197_s14 + $0x58] sm:$0xff]  }
 0x92c   :  { %8042 = vmatpush3.bf16.msra.mxu0 %v8429_v63  ;;  %8064 = vmatpush3.bf16.msra.mxu1 %v8430_v30  ;;  %v8472_v63 = vld [vmem:[%s11197_s14 + $0x1d8] sm:$0xff]  }
 0x92d   :  { %8043 = vmatprep.subr.bf16.mxu0 %v8431_v28  ;;  %8065 = vmatprep.subr.bf16.mxu1 %v8432_v55  ;;  %v8473_v30 = vld [vmem:[%s11197_s14 + $0x118] sm:$0xff]   ;;  %v8475_v55 = vld [vmem:[%s11197_s14 + $0x160] sm:$0xff]  }
 0x92e   :  { %6007 = vmatprep.mubr.bf16.mxu0 %v5577_v15  ;;  %6047 = vmatprep.mubr.bf16.mxu1 %v5579_v26  ;;  %v8474_v28 = vld [vmem:[%s11197_s14 + $0x198] sm:$0xff]   ;;  %v8476_v15 = vld [vmem:[%s11197_s14 + $0x1e0] sm:$0xff]  }
 0x92f   :  { %v8477_v26 = vld [vmem:[%s11197_s14 + $0x120] sm:$0xff]  }
 0x930   :  { %8044 = vmatpush3.bf16.msra.mxu0 %v8433_v18  ;;  %8066 = vmatpush3.bf16.msra.mxu1 %v8434_v61  ;;  %v8478_v18 = vld [vmem:[%s11197_s14 + $0x1a0] sm:$0xff]   ;;  %v8479_v61 = vld [vmem:[%s11197_s14 + $0x168] sm:$0xff]  }
 0x931   :  { %8045 = vmatprep.subr.bf16.mxu0 %v8435_v33  ;;  %8067 = vmatprep.subr.bf16.mxu1 %v8436_v45  ;;  %v8480_v33 = vld [vmem:[%s11197_s14 + $0x1e8] sm:$0xff]  }
 0x932   :  { %v8481_v45 = vld [vmem:[%s11197_s14 + $0x128] sm:$0xff]  }
 0x934   :  { %8046 = vmatpush3.bf16.msra.mxu0 %v8437_v19  ;;  %8068 = vmatpush3.bf16.msra.mxu1 %v8438_v2  ;;  %v8482_v19 = vld [vmem:[%s11197_s14 + $0x1a8] sm:$0xff]   ;;  %v8483_v2 = vld [vmem:[%s11197_s14 + $0x170] sm:$0xff]  }
 0x935   :  { %8047 = vmatprep.subr.bf16.mxu0 %v8439_v56  ;;  %8069 = vmatprep.subr.bf16.mxu1 %v8440_v1  ;;  %v8484_v56 = vld [vmem:[%s11197_s14 + $0x1f0] sm:$0xff]  }
 0x936   :  { %v8485_v1 = vld [vmem:[%s11197_s14 + $0x130] sm:$0xff]  }
 0x938   :  { %8048 = vmatpush3.bf16.msra.mxu0 %v8441_v9  ;;  %8070 = vmatpush3.bf16.msra.mxu1 %v8442_v37  ;;  %v8486_v9 = vld [vmem:[%s11197_s14 + $0x1b0] sm:$0xff]   ;;  %v8487_v37 = vld [vmem:[%s11197_s14 + $0x178] sm:$0xff]  }
 0x939   :  { %8049 = vmatprep.subr.bf16.mxu0 %v8443_v40  ;;  %8071 = vmatprep.subr.bf16.mxu1 %v8444_v46  ;;  %v8488_v40 = vld [vmem:[%s11197_s14 + $0x1f8] sm:$0xff]  }
 0x93a   :  { %v8489_v46 = vld [vmem:[%s11197_s14 + $0x138] sm:$0xff]  }
 0x93c   :  { %8050 = vmatpush3.bf16.msra.mxu0 %v8445_v47  ;;  %8072 = vmatpush3.bf16.msra.mxu1 %v8446_v41  ;;  %v8490_v47 = vld [vmem:[%s11197_s14 + $0x1b8] sm:$0xff]   ;;  %v5444_v41 = vld [vmem:[%s11205_s22 + $0x20] sm:$0x3] }
 0x93d   :  { %8051 = vmatprep.subr.bf16.mxu0 %v8447_v8  ;;  %8073 = vmatprep.subr.bf16.mxu1 %v8448_v48  ;;  %v5446_v8 = vld [vmem:[%s11205_s22 + $0x30] sm:$0x3]  ;;  %v5580_v48 = vpack.c.bf16 %v5444_v41, %v5444_v41 }
 0x940   :  { %8052 = vmatpush3.bf16.msra.mxu0 %v8449_v49  ;;  %8074 = vmatpush3.bf16.msra.mxu1 %v8450_v7  ;;  %v5582_v49 = vpack.c.bf16 %v5446_v8, %v5446_v8  ;;  %v8491_v7 = vld [vmem:[%s11199_s16] sm:$0xff]  }
 0x941   :  { %8053 = vmatprep.subr.bf16.mxu0 %v8451_v50  ;;  %8075 = vmatprep.subr.bf16.mxu1 %v8452_v21  ;;  %v8492_v50 = vld [vmem:[%s11199_s16 + $0x8] sm:$0xff]   ;;  %v8493_v21 = vld [vmem:[%s11199_s16 + $0x10] sm:$0xff]  }
 0x944   :  { %8054 = vmatpush3.bf16.msra.mxu0 %v8453_v42  ;;  %8076 = vmatpush3.bf16.msra.mxu1 %v8454_v43  ;;  %v8494_v42 = vld [vmem:[%s11199_s16 + $0x18] sm:$0xff]   ;;  %v7594_v43 = vld [vmem:[%s11196_s13 + $0x20] sm:$0xff] }
 0x945   :  { %8055 = vmatprep.subr.bf16.mxu0 %v8455_v39  ;;  %8077 = vmatprep.subr.bf16.mxu1 %v8456_v54  ;;  %v4661_v39 = vrot.slane %v7594_v43, %v9616_v31  ;;  %v4669_v54 = vrot.slane %v7594_v43, %v9619_v32 }
 0x948   :  { %8056 = vmatpush3.bf16.msra.mxu0 %v8457_v11  ;;  %8078 = vmatpush3.bf16.msra.mxu1 %v8458_v4  ;;  %v4665_v11 = vrot.slane %v7594_v43, %v9627_v34  ;;  %v4673_v4 = vrot.slane %v7594_v43, %v9630_v35 }
 0x949   :  { %8085 = vmatprep.subr.bf16.mxu0 %v8459_v62  ;;  %8107 = vmatprep.subr.bf16.mxu1 %v8460_v10 }
 0x94b   :  { %6008 = vmatmul.mubr.bf16.vlgmr.msra.gmra.mrb[84].mxu0 %v5576_v6  ;;  %6048 = vmatmul.mubr.bf16.vlgmr.msra.gmra.mrb[84].mxu1 %v5578_v52 }
 0x94c   :  { %8086 = vmatpush3.bf16.msra.mxu0 %v8461_v60  ;;  %8108 = vmatpush3.bf16.msra.mxu1 %v8462_v23 }
 0x94d   :  { %8087 = vmatprep.subr.bf16.mxu0 %v8463_v12  ;;  %8109 = vmatprep.subr.bf16.mxu1 %v8464_v16 }
 0x94e   :  { %6087 = vmatprep.mubr.bf16.mxu0 %v5581_v17  ;;  %6127 = vmatprep.mubr.bf16.mxu1 %v5583_v20 }
 0x950   :  { %8088 = vmatpush3.bf16.msra.mxu0 %v8465_v22  ;;  %8110 = vmatpush3.bf16.msra.mxu1 %v8466_v29 }
 0x951   :  { %8089 = vmatprep.subr.bf16.mxu0 %v8467_v27  ;;  %8111 = vmatprep.subr.bf16.mxu1 %v8468_v14  ;;  %v4677_v27 = vrot.slane %v7594_v43, %v9651_v51  ;;  %v4685_v14 = vrot.slane %v7594_v43, %v9659_v58 }
 0x954   :  { %8090 = vmatpush3.bf16.msra.mxu0 %v8469_v53  ;;  %8112 = vmatpush3.bf16.msra.mxu1 %v8470_v24  ;;  %v4681_v53 = vrot.slane %v7594_v43, %v9662_v59  ;;  %v4689_v24 = vrot.slane %v7594_v43, %v9672_v3 }
 0x955   :  { %8091 = vmatprep.subr.bf16.mxu0 %v8471_v25  ;;  %8113 = vmatprep.subr.bf16.mxu1 %v8472_v63 }
 0x958   :  { %8092 = vmatpush3.bf16.msra.mxu0 %v8473_v30  ;;  %8114 = vmatpush3.bf16.msra.mxu1 %v8474_v28 }
 0x959   :  { %8093 = vmatprep.subr.bf16.mxu0 %v8475_v55  ;;  %8115 = vmatprep.subr.bf16.mxu1 %v8476_v15 }
 0x95c   :  { %8094 = vmatpush3.bf16.msra.mxu0 %v8477_v26  ;;  %8116 = vmatpush3.bf16.msra.mxu1 %v8478_v18 }
 0x95d   :  { %8095 = vmatprep.subr.bf16.mxu0 %v8479_v61  ;;  %8117 = vmatprep.subr.bf16.mxu1 %v8480_v33 }
 0x960   :  { %8096 = vmatpush3.bf16.msra.mxu0 %v8481_v45  ;;  %8118 = vmatpush3.bf16.msra.mxu1 %v8482_v19  ;;  %v7595_v45 = vld [vmem:[%s11196_s13 + $0x28] sm:$0xff] }
 0x961   :  { %8097 = vmatprep.subr.bf16.mxu0 %v8483_v2  ;;  %8119 = vmatprep.subr.bf16.mxu1 %v8484_v56  ;;  %v4705_v41 = vrot.slane %v7595_v45, %v9630_v35 }
 0x964   :  { %8098 = vmatpush3.bf16.msra.mxu0 %v8485_v1  ;;  %8120 = vmatpush3.bf16.msra.mxu1 %v8486_v9 }
 0x965   :  { %8099 = vmatprep.subr.bf16.mxu0 %v8487_v37  ;;  %8121 = vmatprep.subr.bf16.mxu1 %v8488_v40  ;;  %v4693_v40 = vrot.slane %v7595_v45, %v9616_v31 }
 0x968   :  { %8100 = vmatpush3.bf16.msra.mxu0 %v8489_v46  ;;  %8122 = vmatpush3.bf16.msra.mxu1 %v8490_v47  ;;  %v4701_v46 = vrot.slane %v7595_v45, %v9619_v32  ;;  %v4697_v47 = vrot.slane %v7595_v45, %v9627_v34 }
 0x969   :  { %8187 = vmatprep.subr.bf16.mxu0 %v8658_v5  ;;  %8199 = vmatprep.subr.bf16.mxu1 %v8658_v5 }
 0x96b   :  { %6088 = vmatmul.mubr.bf16.vlgmr.msra.gmra.mrb[88].mxu0 %v5580_v48  ;;  %6128 = vmatmul.mubr.bf16.vlgmr.msra.gmra.mrb[88].mxu1 %v5582_v49 }
 0x96c   :  { %8195 = vmatprep.mubr.msk.bf16.mxu0 %vm8659_vm0, %v8658_v5  ;;  %8207 = vmatprep.mubr.msk.bf16.mxu1 %vm8659_vm0, %v8658_v5 }
 0x96d   :  { %8188 = vmatpush3.bf16.msra.mxu0 %v8491_v7 }
 0x96e   :  { %8189 = vmatprep.subr.bf16.mxu0 %v8658_v5 }
 0x971   :  { %8190 = vmatpush3.bf16.msra.mxu0 %v8492_v50 }
 0x972   :  { %8191 = vmatprep.subr.bf16.mxu0 %v8658_v5 }
 0x975   :  { %8192 = vmatpush3.bf16.msra.mxu0 %v8493_v21 }
 0x976   :  { %8193 = vmatprep.subr.bf16.mxu0 %v8658_v5 }
 0x979   :  { %8194 = vmatpush3.bf16.msra.mxu0 %v8494_v42 }
 0x9e6   :  { %v4935_v44 = vpop.f32.mrb[68].mxu0  ;;  %v4976_v0 = vpop.f32.mrb[68].mxu1 }
 0x9e7   :  { %v10821_v62 = vadd.f32 %v4935_v44, %v4661_v39  ;;  %v10823_v10 = vadd.f32 %v4976_v0, %v4669_v54  ;;  %v4937_v6 = vpop.f32.mrb[69].mxu0  ;;  %v4978_v52 = vpop.f32.mrb[69].mxu1 }
 0x9e8   :  { %v10825_v38 = vadd.f32 %v4937_v6, %v4665_v11  ;;  %v10827_v36 = vadd.f32 %v4978_v52, %v4673_v4  ;;  %v4939_v60 = vpop.f32.mrb[70].mxu0  ;;  %v4980_v23 = vpop.f32.mrb[70].mxu1  ;;  %v5261_v6 = vld [vmem:[%s11205_s22] sm:$0x30] }
 0x9e9   :  { %v5237_v12 = vrot.slane %v10821_v62, 4  ;;  %v5239_v16 = vrot.slane %v10823_v10, 4  ;;  %v4940_v17 = vpop.f32.mrb[71].mxu0  ;;  %v4981_v20 = vpop.f32.mrb[71].mxu1  ;;  %v5263_v23 = vld [vmem:[%s11205_s22 + $0x10] sm:$0x30] }
 0x9ea   :  { %v5238_v22 = vrot.slane %v10825_v38, 4  ;;  %v5240_v29 = vrot.slane %v10827_v36, 4  ;;  %v5265_v10 = vld [vmem:[%s11205_s22 + $0x20] sm:$0x30] }
 0x9eb   :  { %5253 = vst [vmem:[%s11206_s23] sm:$0x30] %v5237_v12  ;;  %5255 = vst [vmem:[%s11206_s23 + $0x10] sm:$0x30] %v5239_v16 }
 0x9ec   :  { %5254 = vst [vmem:[%s11206_s23 + $0x8] sm:$0x30] %v5238_v22  ;;  %5256 = vst [vmem:[%s11206_s23 + $0x18] sm:$0x30] %v5240_v29 }
 0x9ee   :  { %v5017_v25 = vpop.f32.mrb[72].mxu0  ;;  %v5058_v63 = vpop.f32.mrb[72].mxu1 }
 0x9ef   :  { %v10857_v30 = vadd.f32 %v5017_v25, %v4677_v27  ;;  %v10859_v28 = vadd.f32 %v5058_v63, %v4685_v14  ;;  %v5019_v55 = vpop.f32.mrb[73].mxu0  ;;  %v5060_v15 = vpop.f32.mrb[73].mxu1  ;;  %v4709_v27 = vrot.slane %v7595_v45, %v9651_v51  ;;  %v4717_v14 = vrot.slane %v7595_v45, %v9659_v58 }
 0x9f0   :  { %v10861_v26 = vadd.f32 %v5019_v55, %v4681_v53  ;;  %v10863_v18 = vadd.f32 %v5060_v15, %v4689_v24  ;;  %v5021_v61 = vpop.f32.mrb[74].mxu0  ;;  %v5062_v33 = vpop.f32.mrb[74].mxu1  ;;  %v5262_v53 = vld [vmem:[%s11205_s22 + $0x8] sm:$0x30]  ;;  %v4713_v63 = vrot.slane %v7595_v45, %v9662_v59  ;;  %v4721_v55 = vrot.slane %v7595_v45, %v9672_v3 }
 0x9f1   :  { %v5241_v19 = vrot.slane %v10857_v30, 4  ;;  %v5243_v2 = vrot.slane %v10859_v28, 4  ;;  %v5022_v56 = vpop.f32.mrb[75].mxu0  ;;  %v5063_v1 = vpop.f32.mrb[75].mxu1  ;;  %v5269_v15 = vsub.f32 %v5261_v6, %v5237_v12  ;;  %v5271_v61 = vsub.f32 %v5263_v23, %v5239_v16  ;;  %v5264_v33 = vld [vmem:[%s11205_s22 + $0x18] sm:$0x30] }
 0x9f2   :  { %v5242_v9 = vrot.slane %v10861_v26, 4  ;;  %v5244_v37 = vrot.slane %v10863_v18, 4  ;;  %v5267_v16 = vld [vmem:[%s11205_s22 + $0x30] sm:$0x30] }
 0x9f3   :  { %5257 = vst [vmem:[%s11206_s23 + $0x20] sm:$0x30] %v5241_v19  ;;  %5259 = vst [vmem:[%s11206_s23 + $0x30] sm:$0x30] %v5243_v2 }
 0x9f4   :  { %5258 = vst [vmem:[%s11206_s23 + $0x28] sm:$0x30] %v5242_v9  ;;  %5260 = vst [vmem:[%s11206_s23 + $0x38] sm:$0x30] %v5244_v37 }
 0x9f6   :  { %v5099_v8 = vpop.f32.mrb[76].mxu0  ;;  %v5140_v48 = vpop.f32.mrb[76].mxu1 }
 0x9f7   :  { %v10896_v49 = vadd.f32 %v5099_v8, %v4693_v40  ;;  %v10898_v7 = vadd.f32 %v5140_v48, %v4701_v46  ;;  %v5101_v50 = vpop.f32.mrb[77].mxu0  ;;  %v5142_v21 = vpop.f32.mrb[77].mxu1  ;;  %v5270_v40 = vsub.f32 %v5262_v53, %v5238_v22  ;;  %v5305_v8 = vstv %s10904_s26 }
 0x9f8   :  { %v10900_v42 = vadd.f32 %v5101_v50, %v4697_v47  ;;  %v10902_v43 = vadd.f32 %v5142_v21, %v4705_v41  ;;  %v5103_v39 = vpop.f32.mrb[78].mxu0  ;;  %v5144_v54 = vpop.f32.mrb[78].mxu1  ;;  %v5272_v48 = vsub.f32 %v5264_v33, %v5240_v29  ;;  %v5266_v50 = vld [vmem:[%s11205_s22 + $0x28] sm:$0x30] }
 0x9f9   :  { %v5314_v11 = vsub.f32 0.0, %v10896_v49  ;;  %v5316_v4 = vsub.f32 0.0, %v10898_v7  ;;  %v5104_v44 = vpop.f32.mrb[79].mxu0  ;;  %v5145_v0 = vpop.f32.mrb[79].mxu1  ;;  %v5298_v6 = vmul.f32 %v5270_v40, %v5270_v40  ;;  %v5277_v18 = vmul.f32 0.5, %v10896_v49 }
 0x9fa   :  { %v5315_v52 = vsub.f32 0.0, %v10900_v42  ;;  %v5317_v60 = vsub.f32 0.0, %v10902_v43  ;;  %v5299_v44 = vmul.f32 %v5271_v61, %v5271_v61  ;;  %v5268_v0 = vld [vmem:[%s11205_s22 + $0x38] sm:$0x30]  ;;  %v5300_v53 = vmul.f32 %v5272_v48, %v5272_v48 }
 0x9fb   :  { %v5322_v17 = vmul.f32 1.442695, %v5314_v11  ;;  %v5326_v20 = vmul.f32 1.442695, %v5316_v4  ;;  %v5297_v4 = vmul.f32 %v5269_v15, %v5269_v15 }
 0x9fc   :  { %v5324_v24 = vmul.f32 1.442695, %v5315_v52  ;;  %v5328_v25 = vmul.f32 1.442695, %v5317_v60  ;;  %v5273_v52 = vsub.f32 %v5265_v10, %v5241_v19  ;;  %v5308_v19 = vadd.f32 %v5305_v8, %v5299_v44 }
 0x9fd   :  { %8531 = vpow2.f32 %v5322_v17  ;;  %v5275_v17 = vsub.f32 %v5267_v16, %v5243_v2  ;;  %v5309_v33 = vadd.f32 %v5305_v8, %v5300_v53 }
 0x9fe   :  { %8533 = vpow2.f32 %v5326_v20  ;;  %v5181_v56 = vpop.f32.mrb[80].mxu0  ;;  %v5222_v1 = vpop.f32.mrb[80].mxu1  ;;  %v5274_v20 = vsub.f32 %v5266_v50, %v5242_v9  ;;  %v5301_v15 = vmul.f32 %v5273_v52, %v5273_v52 }
 0x9ff   :  { %8535 = vpow2.f32 %v5324_v24  ;;  %v10934_v45 = vadd.f32 %v5181_v56, %v4709_v27  ;;  %v10936_v46 = vadd.f32 %v5222_v1, %v4717_v14  ;;  %v5183_v62 = vpop.f32.mrb[81].mxu0  ;;  %v5224_v12 = vpop.f32.mrb[81].mxu1  ;;  %v5276_v24 = vsub.f32 %v5268_v0, %v5244_v37 }
 0xa00   :  { %8537 = vpow2.f32 %v5328_v25  ;;  %v10944_v47 = vadd.f32 %v5183_v62, %v4713_v63  ;;  %v10946_v38 = vadd.f32 %v5224_v12, %v4721_v55  ;;  %v5185_v22 = vpop.f32.mrb[82].mxu0  ;;  %v5226_v41 = vpop.f32.mrb[82].mxu1  ;;  %v5306_v25 = vadd.f32 %v5305_v8, %v5297_v4 }
 0xa01   :  { %v5318_v21 = vsub.f32 0.0, %v10934_v45  ;;  %v5320_v39 = vsub.f32 0.0, %v10936_v46  ;;  %v5186_v54 = vpop.f32.mrb[83].mxu0  ;;  %v5227_v11 = vpop.f32.mrb[83].mxu1  ;;  %v10970_v63 = vstv %s5286_s11  ;;  %v5307_v55 = vadd.f32 %v5305_v8, %v5298_v6 }
 0xa02   :  { %v5319_v36 = vsub.f32 0.0, %v10944_v47  ;;  %v5321_v29 = vsub.f32 0.0, %v10946_v38  ;;  %v5303_v2 = vmul.f32 %v5275_v17, %v5275_v17  ;;  %v5302_v26 = vmul.f32 %v5274_v20, %v5274_v20 }
 0xa03   :  { %v5330_v60 = vmul.f32 1.442695, %v5318_v21  ;;  %v5334_v23 = vmul.f32 1.442695, %v5320_v39  ;;  %v5304_v56 = vmul.f32 %v5276_v24, %v5276_v24  ;;  %v5279_v62 = vmul.f32 0.5, %v10898_v7 }
 0xa04   :  { %v5332_v27 = vmul.f32 1.442695, %v5319_v36  ;;  %v5336_v14 = vmul.f32 1.442695, %v5321_v29  ;;  %v5278_v12 = vmul.f32 0.5, %v10900_v42  ;;  %v5310_v16 = vadd.f32 %v5305_v8, %v5301_v15 }
 0xa05   :  { %8539 = vpow2.f32 %v5330_v60  ;;  %v5280_v41 = vmul.f32 0.5, %v10902_v43  ;;  %v5312_v50 = vadd.f32 %v5305_v8, %v5303_v2  ;;  %v5311_v21 = vadd.f32 %v5305_v8, %v5302_v26 }
 0xa06   :  { %8541 = vpow2.f32 %v5334_v23  ;;  %v5313_v11 = vadd.f32 %v5305_v8, %v5304_v56  ;;  %v5288_v49 = vsub.f32 %v5277_v18, %v10970_v63  ;;  %v5290_v7 = vsub.f32 %v5279_v62, %v10970_v63 }
 0xa07   :  { %v8532_v30 = vpop.eup %8531  ;;  %8543 = vpow2.f32 %v5332_v27  ;;  %v5289_v42 = vsub.f32 %v5278_v12, %v10970_v63  ;;  %v5291_v43 = vsub.f32 %v5280_v41, %v10970_v63  ;;  %v5281_v60 = vmul.f32 0.5, %v10934_v45 }
 0xa08   :  { %v8534_v28 = vpop.eup %8533  ;;  %v5338_v9 = vmul.f32 0.5, %v8532_v30  ;;  %8545 = vpow2.f32 %v5336_v14  ;;  %v5283_v27 = vmul.f32 0.5, %v10936_v46  ;;  %v5282_v30 = vmul.f32 0.5, %v10944_v47 }
 0xa09   :  { %v8536_v61 = vpop.eup %8535  ;;  %v5340_v37 = vmul.f32 0.5, %v8534_v28 }
 0xa0a   :  { %v8538_v1 = vpop.eup %8537  ;;  %v5354_v40 = vrot.slane %v5338_v9, 4  ;;  %v5339_v10 = vmul.f32 0.5, %v8536_v61 }
 0xa0b   :  { %v5356_v22 = vrot.slane %v5340_v37, 4  ;;  %v5341_v48 = vmul.f32 0.5, %v8538_v1  ;;  %v5292_v37 = vsub.f32 %v5281_v60, %v10970_v63 }
 0xa0c   :  { %v5370_v39 = vmul.f32 %v5354_v40, %v5306_v25  ;;  %v5355_v54 = vrot.slane %v5339_v10, 4  ;;  %v5284_v40 = vmul.f32 0.5, %v10946_v38 }
 0xa0d   :  { %v5372_v4 = vmul.f32 %v5356_v22, %v5308_v19  ;;  %v5357_v44 = vrot.slane %v5341_v48, 4  ;;  %v5294_v48 = vsub.f32 %v5283_v27, %v10970_v63 }
 0xa0e   :  { %v5386_v0 = vrot.slane %v5370_v39, 4  ;;  %v5371_v36 = vmul.f32 %v5355_v54, %v5307_v55  ;;  %v5295_v38 = vsub.f32 %v5284_v40, %v10970_v63 }
 0xa0f   :  { %v8540_v29 = vpop.eup %8539  ;;  %v5388_v6 = vrot.slane %v5372_v4, 4  ;;  %v5373_v52 = vmul.f32 %v5357_v44, %v5309_v33  ;;  %v5293_v4 = vsub.f32 %v5282_v30, %v10970_v63  ;;  %v7646_v63 = vld [vmem:[%s11198_s15] ss:$0 sm:$0xff] }
 0xa10   :  { %v8542_v23 = vpop.eup %8541  ;;  %v5402_v17 = vadd.f32 %v5386_v0, %v5288_v49  ;;  %v5387_v8 = vrot.slane %v5371_v36, 4  ;;  %v5342_v20 = vmul.f32 0.5, %v8540_v29 }
 0xa11   :  { %v8544_v14 = vpop.eup %8543  ;;  %v5404_v53 = vadd.f32 %v5388_v6, %v5290_v7  ;;  %v5389_v24 = vrot.slane %v5373_v52, 4  ;;  %v5344_v25 = vmul.f32 0.5, %v8542_v23 }
 0xa12   :  { %v8546_v19 = vpop.eup %8545  ;;  %v7638_v55 = vadd.f32 -0.5, %v5402_v17  ;;  %v5403_v15 = vadd.f32 %v5387_v8, %v5289_v42  ;;  %v5358_v28 = vrot.slane %v5342_v20, 4  ;;  %v5343_v2 = vmul.f32 0.5, %v8544_v14 }
 0xa13   :  { %v7640_v26 = vadd.f32 -0.5, %v5404_v53  ;;  %v5405_v9 = vadd.f32 %v5389_v24, %v5291_v43  ;;  %v5360_v45 = vrot.slane %v5344_v25, 4  ;;  %v5345_v61 = vmul.f32 0.5, %v8546_v19 }
 0xa14   :  { %v5418_v33 = vsel %vm2045_vm3, %v7638_v55, 0.0  ;;  %v7639_v56 = vadd.f32 -0.5, %v5403_v15  ;;  %v5374_v18 = vmul.f32 %v5358_v28, %v5310_v16  ;;  %v5359_v46 = vrot.slane %v5343_v2, 4 }
 0xa15   :  { %v5376_v1 = vmul.f32 %v5360_v45, %v5312_v50  ;;  %v5361_v47 = vrot.slane %v5345_v61, 4  ;;  %v7641_v12 = vadd.f32 -0.5, %v5405_v9  ;;  %v5421_v49 = vsel %vm2045_vm3, %v7640_v26, 0.0 }
 0xa16   :  { %v5419_v62 = vsel %vm2045_vm3, %v7639_v56, 0.0  ;;  %v5390_v10 = vrot.slane %v5374_v18, 4  ;;  %v5375_v22 = vmul.f32 %v5359_v46, %v5311_v21  ;;  %v8496_v56 = vld [vmem:[%s11201_s18 + $0x8] sm:$0xff]  }
 0xa17   :  { %v5420_v41 = vadd.f32 %v5419_v62, %v5418_v33  ;;  %v5392_v39 = vrot.slane %v5376_v1, 4  ;;  %v5377_v54 = vmul.f32 %v5361_v47, %v5313_v11  ;;  %v5423_v42 = vsel %vm2045_vm3, %v7641_v12, 0.0  ;;  %v8495_v33 = vld [vmem:[%s11201_s18] sm:$0xff]  }
 0xa18   :  { %v5406_v16 = vadd.f32 %v5390_v10, %v5292_v37  ;;  %v5391_v44 = vrot.slane %v5375_v22, 4  ;;  %8200 = vmatpush3.bf16.msra.mxu1 %v8495_v33  ;;  %v6333_v33 = vld [vmem:[%s11203_s20 + $0xc8] sm:$0xff] }
 0xa19   :  { %v5408_v50 = vadd.f32 %v5392_v39, %v5294_v48  ;;  %v5393_v0 = vrot.slane %v5377_v54, 4  ;;  %v5422_v7 = vadd.f32 %v5421_v49, %v5420_v41  ;;  %8201 = vmatprep.subr.bf16.mxu1 %v8658_v5 }
 0xa1a   :  { %v7642_v36 = vadd.f32 -0.5, %v5406_v16  ;;  %v5407_v21 = vadd.f32 %v5391_v44, %v5293_v4  ;;  %v8497_v16 = vld [vmem:[%s11201_s18 + $0x10] sm:$0xff]   ;;  %v8498_v4 = vld [vmem:[%s11201_s18 + $0x18] sm:$0xff]   ;;  %v6308_v44 = vld [vmem:[%s11203_s20] sm:$0xff] }
 0xa1b   :  { %v5409_v29 = vadd.f32 %v5393_v0, %v5295_v38  ;;  %v5424_v6 = vadd.f32 %v5423_v42, %v5422_v7  ;;  %v7644_v52 = vadd.f32 -0.5, %v5408_v50  ;;  %v6312_v50 = vld [vmem:[%s11203_s20 + $0x20] sm:$0xff]  ;;  %v6309_v38 = vld [vmem:[%s11203_s20 + $0x8] sm:$0xff] }
 0xa1c   :  { %v7643_v43 = vadd.f32 -0.5, %v5407_v21  ;;  %v5425_v11 = vsel %vm2045_vm3, %v7642_v36, 0.0  ;;  %8202 = vmatpush3.bf16.msra.mxu1 %v8496_v56  ;;  %v7723_v0 = vcombine.low %v6308_v44, %v6312_v50  ;;  %v7724_v7 = vcombine.high %v6308_v44, %v6312_v50  ;;  %v6316_v42 = vld [vmem:[%s11203_s20 + $0x40] sm:$0xff] }
 0xa1d   :  { %v5426_v60 = vadd.f32 %v5425_v11, %v5424_v6  ;;  %v7645_v8 = vadd.f32 -0.5, %v5409_v29  ;;  %v5429_v55 = vsel %vm2045_vm3, %v7644_v52, 0.0  ;;  %8203 = vmatprep.subr.bf16.mxu1 %v8658_v5  ;;  %v6320_v36 = vld [vmem:[%s11203_s20 + $0x60] sm:$0xff] }
 0xa1e   :  { %v8057_v23 = vpop.f32.mrb[84].mxu0  ;;  %v8079_v17 = vpop.f32.mrb[84].mxu1  ;;  %v5427_v20 = vsel %vm2045_vm3, %v7643_v43, 0.0  ;;  %v7732_v6 = vcombine.high %v6316_v42, %v6320_v36  ;;  %6546 = vmatprep.subr.bf16.mxu0 %v7724_v7  ;;  %v7731_v43 = vcombine.low %v6316_v42, %v6320_v36  ;;  %v7711_v52 = vld [vmem:[%s11200_s17] ss:$0 sm:$0xff]  ;;  %v6319_v7 = vld [vmem:[%s11203_s20 + $0x58] sm:$0xff] }
 0xa1f   :  { %v8058_v27 = vpop.f32.mrb[85].mxu0  ;;  %v8080_v14 = vpop.f32.mrb[85].mxu1  ;;  %v5428_v53 = vadd.f32 %v5427_v20, %v5426_v60  ;;  %v5431_v9 = vsel %vm2045_vm3, %v7645_v8, 0.0 }
 0xa20   :  { %v8059_v24 = vadd.f32 %v8058_v27, %v8057_v23  ;;  %v8081_v25 = vadd.f32 %v8080_v14, %v8079_v17  ;;  %v8060_v30 = vpop.f32.mrb[86].mxu0  ;;  %v8082_v19 = vpop.f32.mrb[86].mxu1  ;;  %8204 = vmatpush3.bf16.msra.mxu1 %v8497_v16  ;;  %v6321_v27 = vld [vmem:[%s11203_s20 + $0x68] sm:$0xff] }
 0xa21   :  { %v8061_v15 = vpop.f32.mrb[87].mxu0  ;;  %v8083_v28 = vpop.f32.mrb[87].mxu1  ;;  %v5430_v2 = vadd.f32 %v5429_v55, %v5428_v53  ;;  %8205 = vmatprep.subr.bf16.mxu1 %v8658_v5  ;;  %v6313_v5 = vld [vmem:[%s11203_s20 + $0x28] sm:$0xff]  ;;  %v6324_v30 = vld [vmem:[%s11203_s20 + $0x80] sm:$0xff] }
 0xa22   :  { %v6010_v26 = vadd.f32 %v8059_v24, %v7646_v63  ;;  %v7725_v21 = vcombine.low %v6309_v38, %v6313_v5  ;;  %v7726_v29 = vcombine.high %v6309_v38, %v6313_v5  ;;  %v6317_v63 = vld [vmem:[%s11203_s20 + $0x48] sm:$0xff]  ;;  %v6328_v19 = vld [vmem:[%s11203_s20 + $0xa0] sm:$0xff]  ;;  %v6318_v38 = vld [vmem:[%s11203_s20 + $0x50] sm:$0xff] }
 0xa23   :  { %v5432_v45 = vadd.f32 %v5431_v9, %v5430_v2  ;;  %v7734_v24 = vcombine.high %v6317_v63, %v6321_v27  ;;  %v6325_v55 = vld [vmem:[%s11203_s20 + $0x88] sm:$0xff]  ;;  %v7740_v15 = vcombine.high %v6324_v30, %v6328_v19  ;;  %v7739_v2 = vcombine.low %v6324_v30, %v6328_v19  ;;  %v6323_v5 = vld [vmem:[%s11203_s20 + $0x78] sm:$0xff] }
 0xa24   :  { %v6050_v61 = vadd.f32 %v8081_v25, %v6010_v26  ;;  %8206 = vmatpush3.bf16.msra.mxu1 %v8498_v4  ;;  %v7733_v25 = vcombine.low %v6317_v63, %v6321_v27  ;;  %v6329_v28 = vld [vmem:[%s11203_s20 + $0xa8] sm:$0xff]  ;;  %v6338_v63 = vld [vmem:[%s11203_s20 + $0xf0] sm:$0xff]  ;;  %v6335_v27 = vld [vmem:[%s11203_s20 + $0xd8] sm:$0xff] }
 0xa25   :  { %5433 = vadd.xlane.f32.xlu1 %v5432_v45  ;;  %6587 = vmatprep.subr.bf16.mxu1 %v7726_v29  ;;  %v7741_v26 = vcombine.low %v6325_v55, %v6329_v28  ;;  %v7742_v9 = vcombine.high %v6325_v55, %v6329_v28  ;;  %v6332_v45 = vld [vmem:[%s11203_s20 + $0xc0] sm:$0xff]  ;;  %v7738_v29 = vcombine.high %v6319_v7, %v6323_v5 }
 0xa3e   :  { %v8101_v18 = vpop.f32.mrb[88].mxu0  ;;  %v8123_v46 = vpop.f32.mrb[88].mxu1 }
 0xa3f   :  { %v8102_v37 = vpop.f32.mrb[89].mxu0  ;;  %v8124_v1 = vpop.f32.mrb[89].mxu1 }
 0xa40   :  { %v8103_v40 = vadd.f32 %v8102_v37, %v8101_v18  ;;  %v8125_v47 = vadd.f32 %v8124_v1, %v8123_v46  ;;  %v8104_v62 = vpop.f32.mrb[90].mxu0  ;;  %v8126_v12 = vpop.f32.mrb[90].mxu1  ;;  %v6337_v18 = vld [vmem:[%s11203_s20 + $0xe8] sm:$0xff] }
 0xa41   :  { %v8105_v10 = vpop.f32.mrb[91].mxu0  ;;  %v8127_v22 = vpop.f32.mrb[91].mxu1  ;;  %v7749_v37 = vcombine.low %v6333_v33, %v6337_v18  ;;  %v7750_v1 = vcombine.high %v6333_v33, %v6337_v18  ;;  %v6311_v62 = vld [vmem:[%s11203_s20 + $0x18] sm:$0xff] }
 0xa42   :  { %v6090_v41 = vadd.f32 %v8103_v40, %v6050_v61  ;;  %v6336_v61 = vld [vmem:[%s11203_s20 + $0xe0] sm:$0xff]  ;;  %v6310_v40 = vld [vmem:[%s11203_s20 + $0x10] sm:$0xff]  ;;  %v6315_v22 = vld [vmem:[%s11203_s20 + $0x38] sm:$0xff] }
 0xa43   :  { %v7748_v56 = vcombine.high %v6332_v45, %v6336_v61  ;;  %v7747_v46 = vcombine.low %v6332_v45, %v6336_v61 }
 0xa44   :  { %v6130_v48 = vadd.f32 %v8125_v47, %v6090_v41  ;;  %v6314_v47 = vld [vmem:[%s11203_s20 + $0x30] sm:$0xff]  ;;  %v7729_v41 = vcombine.low %v6311_v62, %v6315_v22 }
 0xa45   :  { %v7727_v12 = vcombine.low %v6310_v40, %v6314_v47  ;;  %v7728_v10 = vcombine.high %v6310_v40, %v6314_v47 }
 0xa46   :  { %v6135_v39 = vmul.f32 0.01, %v6130_v48 }
 0xa48   :  { %v6136_v54 = vmax.f32 %v6130_v48, %v6135_v39  ;;  %v7730_v48 = vcombine.high %v6311_v62, %v6315_v22  ;;  %v7717_v39 = vld [vmem:[%s11202_s19] ss:$0 sm:$0xff] }
 0xa4a   :  { %v6145_v49 = vpack.c.bf16 %v6136_v54, %v6136_v54 }
 0xa4c   :  { %8196 = vmatmul.mubr.msk.bf16.vlgmr.msra.gmra.mrb[92].mxu0 %vm6177_vm4, %v6145_v49 }
 0xa4d   :  { %6578 = vmatprep.mubr.bf16.mxu0 %v8660_v13  ;;  %6547 = vmatpush1.bf16.msra.mxu0 %v7723_v0  ;;  %v6322_v0 = vld [vmem:[%s11203_s20 + $0x70] sm:$0xff] }
 0xa4e   :  { %6548 = vmatprep.subr.bf16.mxu0 %v7732_v6  ;;  %v6326_v6 = vld [vmem:[%s11203_s20 + $0x90] sm:$0xff] }
 0xa51   :  { %6549 = vmatpush1.bf16.msra.mxu0 %v7731_v43  ;;  %v6330_v43 = vld [vmem:[%s11203_s20 + $0xb0] sm:$0xff] }
 0xa52   :  { %6550 = vmatprep.subr.bf16.mxu0 %v7740_v15 }
 0xa55   :  { %6551 = vmatpush1.bf16.msra.mxu0 %v7739_v2 }
 0xa56   :  { %6552 = vmatprep.subr.bf16.mxu0 %v7748_v56 }
 0xa59   :  { %6553 = vmatpush1.bf16.msra.mxu0 %v7747_v46 }
 0xa5a   :  { %6628 = vmatprep.subr.bf16.mxu0 %v7728_v10 }
 0xb1f   :  { %v6215_v11 = vpop.f32.mrb[92].mxu0 }
 0xb20   :  { %v6216_v60 = vadd.f32 %v7711_v52, %v6215_v11  ;;  %v8197_v23 = vpop.f32.mrb[93].mxu0  ;;  %v6327_v52 = vld [vmem:[%s11203_s20 + $0x98] sm:$0xff] }
 0xb21   :  { %v6218_v17 = vpop.f32.mrb[94].mxu0  ;;  %v6331_v11 = vld [vmem:[%s11203_s20 + $0xb8] sm:$0xff]  ;;  %v7737_v23 = vcombine.low %v6319_v7, %v6323_v5 }
 0xb22   :  { %v6221_v8 = vmul.f32 0.01, %v6216_v60  ;;  %v8198_v20 = vpop.f32.mrb[95].mxu0  ;;  %v7744_v17 = vcombine.high %v6326_v6, %v6330_v43 }
 0xb23   :  { %v6334_v20 = vld [vmem:[%s11203_s20 + $0xd0] sm:$0xff] }
 0xb24   :  { %v6222_v14 = vmax.f32 %v6216_v60, %v6221_v8  ;;  %v7735_v60 = vcombine.low %v6318_v38, %v6322_v0  ;;  %v7746_v8 = vcombine.high %v6327_v52, %v6331_v11  ;;  %v7751_v19 = vcombine.low %v6334_v20, %v6338_v63 }
 0xb26   :  { %v6231_v53 = vpack.c.bf16 %v6222_v14, %v6222_v14  ;;  %v6339_v14 = vld [vmem:[%s11203_s20 + $0xf8] sm:$0xff] }
 0xb27   :  { %v7754_v30 = vcombine.high %v6335_v27, %v6339_v14  ;;  %v7753_v55 = vcombine.low %v6335_v27, %v6339_v14 }
 0xb28   :  { %8208 = vmatmul.mubr.msk.bf16.vlgmr.msra.gmra.mrb[92].mxu1 %vm6177_vm4, %v6231_v53  ;;  %v7743_v53 = vcombine.low %v6326_v6, %v6330_v43 }
 0xb29   :  { %6588 = vmatpush1.bf16.msra.mxu1 %v7725_v21  ;;  %6619 = vmatprep.mubr.bf16.mxu1 %v8660_v13  ;;  %v7736_v21 = vcombine.high %v6318_v38, %v6322_v0 }
 0xb2a   :  { %6589 = vmatprep.subr.bf16.mxu1 %v7734_v24  ;;  %v7745_v24 = vcombine.low %v6327_v52, %v6331_v11 }
 0xb2d   :  { %6590 = vmatpush1.bf16.msra.mxu1 %v7733_v25  ;;  %v7752_v25 = vcombine.high %v6334_v20, %v6338_v63 }
 0xb2e   :  { %6591 = vmatprep.subr.bf16.mxu1 %v7742_v9 }
 0xb31   :  { %6592 = vmatpush1.bf16.msra.mxu1 %v7741_v26 }
 0xb32   :  { %6593 = vmatprep.subr.bf16.mxu1 %v7750_v1 }
 0xb35   :  { %6594 = vmatpush1.bf16.msra.mxu1 %v7749_v37 }
 0xb36   :  { %6669 = vmatprep.subr.bf16.mxu1 %v7730_v48 }
 0xbfb   :  { %v6300_v54 = vpop.f32.mrb[92].mxu1 }
 0xbfc   :  { %v6301_v49 = vadd.f32 %v7717_v39, %v6300_v54  ;;  %v8209_v16 = vpop.f32.mrb[93].mxu1 }
 0xbfd   :  { %v6303_v4 = vpop.f32.mrb[94].mxu1 }
 0xbfe   :  { %v6306_v44 = vmul.f32 0.01, %v6301_v49  ;;  %v8210_v50 = vpop.f32.mrb[95].mxu1 }
 0xc00   :  { %v6307_v42 = vmax.f32 %v6301_v49, %v6306_v44 }
 0xc02   :  { %v6340_v36 = vpack.c.bf16 %v6307_v42, %v6307_v42  ;;  %v6764_v42 = vld [vmem:[%s11232_s8] sm:$0xff] }
 0xc04   :  { %7755 = vmatmul.mubr.msk.bf16.vlgmr.msra.gmra.mrb[96].mxu0 %vm6177_vm4, %v6340_v36  ;;  %7756 = vmatmul.mubr.msk.bf16.vlgmr.msra.gmra.mrb[96].mxu1 %vm6177_vm4, %v6340_v36 }
 0xc05   :  { %6629 = vmatpush1.bf16.msra.mxu0 %v7727_v12  ;;  %6670 = vmatpush1.bf16.msra.mxu1 %v7729_v41 }
 0xc06   :  { %6630 = vmatprep.subr.bf16.mxu0 %v7736_v21  ;;  %6671 = vmatprep.subr.bf16.mxu1 %v7738_v29 }
 0xc07   :  { %6660 = vmatprep.mubr.bf16.mxu0 %v8660_v13  ;;  %6701 = vmatprep.mubr.bf16.mxu1 %v8660_v13  ;;  %v6341_v13 = vld [vmem:[%s11204_s21] sm:$0xff] }
 0xc08   :  { %v6346_v15 = vrot.slane %v6341_v13, %v9616_v31  ;;  %v6354_v28 = vrot.slane %v6341_v13, %v9619_v32  ;;  %v6350_v2 = vrot.slane %v6341_v13, %v9627_v34  ;;  %v6358_v26 = vrot.slane %v6341_v13, %v9630_v35 }
 0xc09   :  { %6631 = vmatpush1.bf16.msra.mxu0 %v7735_v60  ;;  %6672 = vmatpush1.bf16.msra.mxu1 %v7737_v23  ;;  %v6362_v32 = vrot.slane %v6341_v13, %v9651_v51  ;;  %v6370_v34 = vrot.slane %v6341_v13, %v9659_v58  ;;  %v6366_v12 = vrot.slane %v6341_v13, %v9662_v59 }
 0xc0a   :  { %6632 = vmatprep.subr.bf16.mxu0 %v7744_v17  ;;  %6673 = vmatprep.subr.bf16.mxu1 %v7746_v8  ;;  %v6374_v10 = vrot.slane %v6341_v13, %v9672_v3 }
 0xc0d   :  { %6633 = vmatpush1.bf16.msra.mxu0 %v7743_v53  ;;  %6674 = vmatpush1.bf16.msra.mxu1 %v7745_v24  ;;  %v6765_v24 = vld [vmem:[%s11232_s8 + $0x8] sm:$0xff]  ;;  %s8661_s8 = smov [#allocation11]  }
 0xc0e   :  { %6634 = vmatprep.subr.bf16.mxu0 %v7752_v25  ;;  %6675 = vmatprep.subr.bf16.mxu1 %v7754_v30  ;;  %s6867_s15 = sshll.u32 %s8661_s8, 4  ;;  %s6868_s15 = int_to_ptr.vmem [resolvable:$true] %s6867_s15 }
 0xc0f   :  { %s8611_s5 = scalar_lea.vmem %s6868_s15, 256  ;;  %p8616_p7 = scmp.lt.s32.totalorder %s6868_s15, %s6868_s15 }
 0xc10   :  { %p8612_p6 = scmp.ne.s32.totalorder %s6868_s15, %s8611_s5  ;;  %p8617_p8 = scmp.lt.s32.totalorder %s8611_s5, %s8611_s5 }
 0xc11   :  { %6635 = vmatpush1.bf16.msra.mxu0 %v7751_v19  ;;  %6676 = vmatpush1.bf16.msra.mxu1 %v7753_v55 }
 0xc12   :  { %p8618_p9 = por %p8617_p8, %p8616_p7 }
 0xc14   :  { %7757 = vmatmul.mubr.msk.bf16.vlgmr.msra.gmra.mrb[100].mxu0 %vm6177_vm4, %v6340_v36  ;;  %7758 = vmatmul.mubr.msk.bf16.vlgmr.msra.gmra.mrb[100].mxu1 %vm6177_vm4, %v6340_v36  ;;  %p8619_p10 = pnand %p8618_p9, %p8612_p6 }
 0xcd7   :  { %v6580_v9 = vpop.f32.mrb[96].mxu0  ;;  %v6621_v45 = vpop.f32.mrb[96].mxu1 }
 0xcd8   :  { %v6581_v61 = vadd.f32 %v6580_v9, %v6346_v15  ;;  %v6622_v33 = vadd.f32 %v6621_v45, %v6354_v28  ;;  %v6582_v56 = vpop.f32.mrb[97].mxu0  ;;  %v6623_v18 = vpop.f32.mrb[97].mxu1 }
 0xcd9   :  { %v6583_v46 = vadd.f32 %v6582_v56, %v6350_v2  ;;  %v6624_v37 = vadd.f32 %v6623_v18, %v6358_v26  ;;  %v6584_v1 = vpop.f32.mrb[98].mxu0  ;;  %v6625_v40 = vpop.f32.mrb[98].mxu1 }
 0xcda   :  { %8547 = vtanh.f32 %v6581_v61  ;;  %v6585_v47 = vpop.f32.mrb[99].mxu0  ;;  %v6626_v62 = vpop.f32.mrb[99].mxu1 }
 0xcdb   :  { %8549 = vtanh.f32 %v6622_v33 }
 0xcdc   :  { %8551 = vtanh.f32 %v6583_v46 }
 0xcdd   :  { %8553 = vtanh.f32 %v6624_v37 }
 0xce4   :  { %v8548_v31 = vpop.eup %8547 }
 0xce5   :  { %v8550_v35 = vpop.eup %8549 }
 0xce6   :  { %v8552_v22 = vpop.eup %8551 }
 0xce7   :  { %v8554_v41 = vpop.eup %8553  ;;  %v6726_v48 = vcombine.low %v8548_v31, %v8552_v22  ;;  %v6662_v39 = vpop.f32.mrb[100].mxu0 }
 0xce8   :  { %v6703_v54 = vpop.f32.mrb[100].mxu1  ;;  %v6727_v49 = vcombine.low %v8550_v35, %v8554_v41  ;;  %v6663_v16 = vadd.f32 %v6662_v39, %v6362_v32  ;;  %v6664_v44 = vpop.f32.mrb[101].mxu0 }
 0xce9   :  { %v6704_v4 = vadd.f32 %v6703_v54, %v6370_v34  ;;  %v6705_v50 = vpop.f32.mrb[101].mxu1  ;;  %v6734_v38 = vrot.slane %v6726_v48, %v8935_v57  ;;  %v6665_v51 = vadd.f32 %v6664_v44, %v6366_v12  ;;  %v6666_v58 = vpop.f32.mrb[102].mxu0 }
 0xcea   :  { %v6706_v0 = vadd.f32 %v6705_v50, %v6374_v10  ;;  %v6707_v7 = vpop.f32.mrb[102].mxu1  ;;  %v6741_v59 = vrot.slane %v6727_v49, %v8935_v57  ;;  %8555 = vtanh.f32 %v6663_v16  ;;  %v6667_v3 = vpop.f32.mrb[103].mxu0 }
 0xceb   :  { %v6708_v5 = vpop.f32.mrb[103].mxu1  ;;  %8557 = vtanh.f32 %v6704_v4  ;;  %v2062_v22 = vpop.xlane.xlu0 %2061 }
 0xcec   :  { %v6742_v36 = vcombine.low %v6734_v38, %v6741_v59  ;;  %8559 = vtanh.f32 %v6665_v51  ;;  %v3748_v41 = vpop.xlane.xlu1 %3747 }
 0xced   :  { %8561 = vtanh.f32 %v6706_v0  ;;  %v3749_v54 = vmul.f32 0.0009765625, %v3748_v41 }
 0xcee   :  { %v6766_v21 = vsub.f32 %v6764_v42, %v6742_v36  ;;  %6762 = vst [vmem:[#allocation11] sm:$0xff] %v6742_v36 }
 0xcef   :  { %v457_v48 = vpop.xlane.xlu0 %456  ;;  %v3751_v44 = vrot.slane %v3749_v54, 2 }
 0xcf0   :  { %v6768_v29 = vmul.f32 0.5, %v6766_v21  ;;  %v5434_v39 = vpop.xlane.xlu1 %5433  ;;  %v459_v49 = vmul.f32 0.0009765625, %v457_v48 }
 0xcf1   :  { %v5435_v16 = vmul.f32 0.0009765625, %v5434_v39 }
 0xcf2   :  { %v6770_v6 = vmul.f32 %v6768_v29, %v6766_v21 }
 0xcf3   :  { %v5437_v38 = vrot.slane %v5435_v16, 2 }
 0xcf4   :  { %v8556_v43 = vpop.eup %8555  ;;  %v6772_v52 = vsub.f32 -0.9189385, %v6770_v6 }
 0xcf5   :  { %v8558_v11 = vpop.eup %8557 }
 0xcf6   :  { %v8560_v60 = vpop.eup %8559  ;;  %v6783_v23 = vrot.slane %v6772_v52, %v8935_v57  ;;  %v6776_v53 = vcombine.high %v6772_v52, %v6772_v52 }
 0xcf7   :  { %v8562_v17 = vpop.eup %8561  ;;  %v6743_v8 = vcombine.low %v8556_v43, %v8560_v60 }
 0xcf8   :  { %v6744_v20 = vcombine.low %v8558_v11, %v8562_v17  ;;  %v6791_v63 = vcombine.high %v6783_v23, %v6783_v23  ;;  %v6790_v55 = vrot.slane %v6776_v53, %v8935_v57  ;;  %v6818_v13 = vsel %vm2045_vm3, %v6783_v23, 0.0 }
 0xcf9   :  { %v6751_v27 = vrot.slane %v6743_v8, %v8935_v57 }
 0xcfa   :  { %v6758_v14 = vrot.slane %v6744_v20, %v8935_v57  ;;  %v6819_v30 = vsel %vm2045_vm3, %v6791_v63, 0.0  ;;  %v6792_v26 = vcombine.high %v6790_v55, %v6790_v55  ;;  %v6821_v9 = vsel %vm2045_vm3, %v6790_v55, 0.0 }
 0xcfb   :  { %v6820_v15 = vadd.f32 %v6819_v30, %v6818_v13 }
 0xcfc   :  { %v6759_v25 = vcombine.low %v6751_v27, %v6758_v14  ;;  %v6823_v18 = vsel %vm2045_vm3, %v6792_v26, 0.0 }
 0xcfd   :  { %v6822_v45 = vadd.f32 %v6821_v9, %v6820_v15 }
 0xcfe   :  { %v6767_v19 = vsub.f32 %v6765_v24, %v6759_v25  ;;  %6763 = vst [vmem:[#allocation11 + $0x8] sm:$0xff] %v6759_v25 }
 0xcff   :  { %v6824_v46 = vadd.f32 %v6823_v18, %v6822_v45 }
 0xd00   :  { %v6769_v28 = vmul.f32 0.5, %v6767_v19 }
 0xd02   :  { %v6771_v2 = vmul.f32 %v6769_v28, %v6767_v19 }
 0xd04   :  { %v6773_v61 = vsub.f32 -0.9189385, %v6771_v2 }
 0xd06   :  { %v6793_v33 = vcombine.high %v6773_v61, %v6773_v61  ;;  %v6800_v56 = vrot.slane %v6773_v61, %v8935_v57 }
 0xd08   :  { %v6807_v37 = vrot.slane %v6793_v33, %v8935_v57  ;;  %v6808_v1 = vcombine.high %v6800_v56, %v6800_v56  ;;  %v6825_v40 = vsel %vm2045_vm3, %v6800_v56, 0.0  ;;  %v2063_v57 = vmul.f32 0.0009765625, %v2062_v22 }
 0xd09   :  { %v6826_v47 = vadd.f32 %v6825_v40, %v6824_v46 }
 0xd0a   :  { %v6809_v62 = vcombine.high %v6807_v37, %v6807_v37  ;;  %v6827_v31 = vsel %vm2045_vm3, %v6808_v1, 0.0  ;;  %v6829_v34 = vsel %vm2045_vm3, %v6807_v37, 0.0  ;;  %v2065_v4 = vrot.slane %v2063_v57, 2 }
 0xd0b   :  { %v6828_v32 = vadd.f32 %v6827_v31, %v6826_v47 }
 0xd0c   :  { %v6831_v12 = vsel %vm2045_vm3, %v6809_v62, 0.0  ;;  %v2067_v50 = vadd.f32 %v2065_v4, %v459_v49 }
 0xd0d   :  { %v6830_v35 = vadd.f32 %v6829_v34, %v6828_v32 }
 0xd0e   :  { %v3753_v51 = vadd.f32 %v3751_v44, %v2067_v50 }
 0xd0f   :  { %v6832_v10 = vadd.f32 %v6831_v12, %v6830_v35 }
 0xd10   :  { %v5439_v0 = vadd.f32 %v5437_v38, %v3753_v51 }
 0xd11   :  { %6833 = vadd.xlane.f32.xlu0 %v6832_v10 }
 0xd12   :  { %v6837_v7 = vrot.slane %v5439_v0, 6 }
 0xd9e   :  { %v6834_v58 = vpop.xlane.xlu0 %6833 }
 0xd9f   :  { %v6835_v59 = vmul.f32 0.0009765625, %v6834_v58 }
 0xda1   :  { %v6839_v3 = vsub.f32 %v6835_v59, %v6837_v7 }
 0xda3   :  { %v6841_v5 = vsel %vm6840_vm5, %v6839_v3, 0.0 }
 0xda4   :  { %6842 = vadd.xlane.f32.xlu1 %v6841_v5 }
 0xda5   :  { %8622 = shalt.err (!%p8619_p10)
}
 0xda6   :  { %s8623_s2 = scalar_lea.hbm %s11207_s24, 256 }
 0xda7   :  { %p8624_p11 = scmp.ne.s32.totalorder %s11207_s24, %s8623_s2  ;;  %p8627_p12 = scmp.lt.u32.totalorder %s8623_s2, %s11207_s24 }
 0xda9   :  { %p8629_p13 = pnand %p8627_p12, %p8624_p11 }
 0xdab   :  { %8632 = shalt.err (!%p8629_p13)
}
 0xdac   :  { %6870 = dma.vmem_to_hbm [thread:$0]  %s6868_s15, 256, %s11207_s24, [#allocation3]  }
 0xdad   :  { %s11237_s18 = sld [smem:[#allocation28_spill]] }
 0xdb3   :  { %s8633_s27 = scalar_lea.hbm %s11237_s18, 16 }
 0xdb4   :  { %p8634_p0 = scmp.ne.s32.totalorder %s11237_s18, %s8633_s27  ;;  %p8637_p1 = scmp.lt.u32.totalorder %s8633_s27, %s11237_s18 }
 0xdb6   :  { %p8639_p2 = pnand %p8637_p1, %p8634_p0 }
 0xe31   :  { %v6843_v42 = vpop.xlane.xlu1 %6842 }
 0xe32   :  { %v6844_v36 = vrot.slane %v6843_v42, 4 }
 0xe34   :  { %v6845_v21 = vadd.f32 %v6844_v36, %v6843_v42 }
 0xe36   :  { %v6846_v29 = vrot.slane %v6845_v21, 2 }
 0xe38   :  { %v6847_v6 = vadd.f32 %v6846_v29, %v6845_v21 }
 0xe3a   :  { %v6848_v43 = vrot.slane %v6847_v6, 1 }
 0xe3c   :  { %v6849_v52 = vadd.f32 %v6848_v43, %v6847_v6 }
 0xe3e   :  { %8211 = vpush %v6849_v52 }
 0xe6f   :  { %s8212_s29 = spop %8211 }
 0xe70   :  { %s6851_s1 = ssub.f32 0.0, %s8212_s29 }
 0xe72   :  { %s6854_s0 = smul.f32 0.5, %s6851_s1 }
 0xe74   :  { %6856 = sst [smem:[#allocation12]] %s6854_s0 }
 0xe75   :  { %8642 = shalt.err (!%p8639_p2)
}
 0xe76   :  { %s8662_s13 = smov [#allocation12]  }
 0xe77   :  { %6878 = dma.smem_to_hbm %s8662_s13, 16, %s11237_s18, [#allocation4]  }
 0xe78   :  { %8649 = dma.done.wait [#allocation3], 256  }
 0xe79   :  { %8650 = vsyncadd [#allocation3], 4294967040 }
 0xe7a   :  { %8651 = dma.done.wait [#allocation4], 16  }
 0xe7b   :  { %8652 = vsyncadd [#allocation4], 4294967280 }
 0xe7c   :  { %6889 = sfence }
 0xe7d   :  { %6890 = vsyncpa [#allocation3], 1 }
 0xe7e   :  { %6891 = vsyncpa [#allocation4], 1 }
 0xe7f   :  { %6892 = vsyncpa [#allocation5], 1 }
 0xe80   :  { %6893 = vsyncpa [#allocation7], 1 }
 0xe81   :  { %6894 = vsyncpa [#allocation10], 1 }

</bundles_post_ra>
